<compile_context>
chip_gen: v5e
topology: v5e:2x2
jax: 0.10.0
libtpu: 0.0.40
codegen_flags: <defaults>
</compile_context>

<pallas_src>
import functools

import jax
import jax.numpy as jnp
import numpy as np
from jax.experimental import pallas as pl
from jax.experimental.pallas import tpu as pltpu


# ---------------------------------------------------------------------------
# Bilinear 2x interpolation matrix (align_corners=False).  Used by the wrapper
# (width direction, fused with x's layout change in one einsum) and by the
# pure-JAX reference.  Only valid for exactly 2x scaling.
# ---------------------------------------------------------------------------
def _interp_matrix(in_size: int) -> jnp.ndarray:
    out_size = 2 * in_size
    dst = np.arange(out_size, dtype=np.float64)
    src = np.maximum((dst + 0.5) * 0.5 - 0.5, 0.0)       # PyTorch source index
    i0 = np.floor(src).astype(np.int64)
    i1 = np.minimum(i0 + 1, in_size - 1)
    w1 = (src - i0).astype(np.float32)
    m = np.zeros((out_size, in_size), np.float32)
    m[np.arange(out_size), i0] += 1.0 - w1
    m[np.arange(out_size), i1] += w1                      # i0 == i1 at clamps
    return jnp.asarray(m)


# ---------------------------------------------------------------------------
# Fused kernel factory.
#   refs = (xw, y, w0, b0, w1, b1, ..., o, buf_a, buf_b)
#     xw : (1, H, 2W, C)      width-upsampled x, NHWC
#     y  : (1, 2H, 2W, C)     skip connection, NHWC
#     wi : (9*Cbuf, Cout_i)   channel-padded im2col weights
#     bi : (1, Cout_i)
#     o  : (1, 2H, 2W, Cout_last)
#     buf_a/buf_b : VMEM scratch (2H+2, 2W+2, Cbuf) f32 (halo-padded NHWC)
# ---------------------------------------------------------------------------
def _make_fused_kernel(num_layers, c_in, c_buf, H, W, layer_couts):
    H2, W2 = 2 * H, 2 * W

    def kernel(*refs):
        xw_ref, y_ref = refs[0], refs[1]
        wb = refs[2:2 + 2 * num_layers]
        o_ref = refs[2 + 2 * num_layers]
        buf_a = refs[3 + 2 * num_layers]
        buf_b = refs[4 + 2 * num_layers]

        # Fused "same" padding: zero the halo (and everything else, it's tiny).
        # Done every grid step so it is correct with megacore-parallel grids.
        buf_a[...] = jnp.zeros_like(buf_a)
        buf_b[...] = jnp.zeros_like(buf_b)

        # --- height-direction bilinear 2x as two shifted lerps on the VPU ---
        # out[2i]   = 0.75*x[i] + 0.25*x[i-1]   (clamped at the top edge)
        # out[2i+1] = 0.75*x[i] + 0.25*x[i+1]   (clamped at the bottom edge)
        xw = xw_ref[0].astype(jnp.float32)                       # (H, 2W, C)
        sh_up = jnp.concatenate([xw[:1], xw[:-1]], axis=0)       # x[i-1], clamp
        sh_dn = jnp.concatenate([xw[1:], xw[-1:]], axis=0)       # x[i+1], clamp
        even = 0.75 * xw + 0.25 * sh_up
        odd = 0.75 * xw + 0.25 * sh_dn
        up_x = jnp.concatenate([even[:, None], odd[:, None]], axis=1)
        up_x = up_x.reshape(H2, W2, c_in)        # leading-dim merge (free)

        # --- fused channel concat: [upsampled x | skip y | zero pad] ---------
        pieces = [up_x, y_ref[0].astype(jnp.float32)]
        if c_buf > 2 * c_in:
            pieces.append(jnp.zeros((H2, W2, c_buf - 2 * c_in), jnp.float32))
        buf_a[1:1 + H2, 1:1 + W2, :] = jnp.concatenate(pieces, axis=-1)

        # --- stacked 3x3 conv + bias + ReLU; one K=9*Cbuf matmul per layer ---
        src, dst = buf_a, buf_b
        for i in range(num_layers):              # static & small (layer count)
            w_ref, b_ref = wb[2 * i], wb[2 * i + 1]
            cout = layer_couts[i]
            cols = []
            for dh in range(3):
                for dw in range(3):
                    patch = src[dh:dh + H2, dw:dw + W2, :]       # (2H,2W,Cbuf)
                    cols.append(patch.reshape(H2 * W2, c_buf))   # free reshape
            im2col = jnp.concatenate(cols, axis=1)               # (HW, 9*Cbuf)
            act = jnp.dot(im2col, w_ref[...],
                          preferred_element_type=jnp.float32)    # (HW, Cout)
            act = jnp.maximum(act + b_ref[...], 0.0)
            act = act.reshape(H2, W2, cout)                      # free reshape
            if i == num_layers - 1:
                o_ref[0] = act.astype(o_ref.dtype)
            else:
                if cout < c_buf:
                    # Pad to full lane extent; the padded weight rows of the
                    # next layer are zero, so stale channels never contribute.
                    act = jnp.concatenate(
                        [act, jnp.zeros((H2, W2, c_buf - cout), jnp.float32)],
                        axis=-1)
                dst[1:1 + H2, 1:1 + W2, :] = act
                src, dst = dst, src

    return kernel


# ---------------------------------------------------------------------------
# Parameter init (matches the PyTorch Upsample channel schedule).
# ---------------------------------------------------------------------------
def init_upsample_params(key, in_channels: int, out_channels: int, layers: int):
    if layers < 1:
        raise ValueError("Upsample layers must be at least 1")
    params = []
    for i in range(layers):
        if i == 0:
            cin = 2 * in_channels
        elif i == 1:
            cin = in_channels
        else:
            cin = out_channels
        cout = in_channels if (i == 0 and layers > 1) else out_channels
        key, kw, kb = jax.random.split(key, 3)
        bound = 1.0 / np.sqrt(cin * 9)
        w_oihw = jax.random.uniform(kw, (cout, cin, 3, 3), jnp.float32, -bound, bound)
        b = jax.random.uniform(kb, (cout,), jnp.float32, -bound, bound)
        params.append((w_oihw, b))
    return params


# ---------------------------------------------------------------------------
# Forward pass: x (N, Cin, H, W), y (N, Cin, 2H, 2W)  ->  (N, Cout, 2H, 2W)
# ---------------------------------------------------------------------------
def upsample_forward(params, x_nchw: jnp.ndarray, y_nchw: jnp.ndarray) -> jnp.ndarray:
    N, C, H, W = x_nchw.shape
    H2, W2 = 2 * H, 2 * W
    L = len(params)

    cins = [w.shape[1] for w, _ in params]
    couts = [w.shape[0] for w, _ in params]
    c_buf = max(cins)
    assert cins[0] == 2 * C, "layer 0 consumes concat(upsampled x, skip y)"

    # Weight prep (tiny, static): OIHW -> (9*Cbuf, Cout) with zero-padded input
    # channels so every layer is one im2col matmul; biases -> (1, Cout).
    w_in, b_in = [], []
    for (w_oihw, b), cin in zip(params, cins):
        cout = w_oihw.shape[0]
        wt = jnp.transpose(w_oihw, (2, 3, 1, 0))                 # (3,3,Cin,Cout)
        wt = jnp.pad(wt, ((0, 0), (0, 0), (0, c_buf - cin), (0, 0)))
        w_in.append(wt.reshape(9 * c_buf, cout))
        b_in.append(b.reshape(1, cout))

    # Width-direction 2x bilinear upsample of the (small) low-res input, fused
    # with its NCHW->NHWC relayout in a single XLA einsum -> (N, H, 2W, C).
    uw = _interp_matrix(W)                                       # (2W, W)
    xw_nhwc = jnp.einsum("qw,nchw->nhqc", uw, x_nchw)
    # TODO(synk): fuse this einsum plus the y / output layout transposes into
    # the Pallas kernel as well (needs an in-kernel minor-dim relayout).
    y_nhwc = jnp.transpose(y_nchw, (0, 2, 3, 1))

    kernel = _make_fused_kernel(L, C, c_buf, H, W, tuple(couts))

    in_specs = [
        pl.BlockSpec((1, H, W2, C), lambda n: (n, 0, 0, 0)),
        pl.BlockSpec((1, H2, W2, C), lambda n: (n, 0, 0, 0)),
    ]
    operands = [xw_nhwc, y_nhwc]
    for i in range(L):
        operands += [w_in[i], b_in[i]]
        in_specs += [
            pl.BlockSpec(w_in[i].shape, lambda n: (0, 0)),
            pl.BlockSpec(b_in[i].shape, lambda n: (0, 0)),
        ]

    # One fused kernel; grid over batch (parallel -> v7x megacore split).  For
    # large images one would add an H-row-tile grid axis with a 1-row halo.
    out_nhwc = pl.pallas_call(
        kernel,
        out_shape=jax.ShapeDtypeStruct((N, H2, W2, couts[-1]), x_nchw.dtype),
        grid=(N,),
        in_specs=in_specs,
        out_specs=pl.BlockSpec((1, H2, W2, couts[-1]), lambda n: (n, 0, 0, 0)),
        scratch_shapes=[
            pltpu.VMEM((H2 + 2, W2 + 2, c_buf), jnp.float32),
            pltpu.VMEM((H2 + 2, W2 + 2, c_buf), jnp.float32),
        ],
        compiler_params=pltpu.CompilerParams(
            dimension_semantics=("parallel",),
            vmem_limit_bytes=32 * 1024 * 1024,
        ),
    )(*operands)

    return jnp.transpose(out_nhwc, (0, 3, 1, 2))                 # NHWC -> NCHW


# ---------------------------------------------------------------------------
# Pure-JAX reference (sanity check)
# ---------------------------------------------------------------------------
def _reference_forward(params, x, y):
    _, _, H, W = x.shape
    uh = _interp_matrix(H)
    uw = _interp_matrix(W)
    x_up = jnp.einsum("ph,nchw->ncpw", uh, x)
    x_up = jnp.einsum("qw,ncpw->ncpq", uw, x_up)
    h = jnp.concatenate([x_up, y], axis=1)
    for w_oihw, b in params:
        h = jax.lax.conv_general_dilated(
            h, w_oihw, window_strides=(1, 1), padding=((1, 1), (1, 1)),
            dimension_numbers=("NCHW", "OIHW", "NCHW"))
        h = jnp.maximum(h + b[None, :, None, None], 0.0)
    return h


if __name__ == "__main__":
    in_channels, out_channels, layers = 4, 8, 2
    N, H, W = 2, 8, 8

    key = jax.random.PRNGKey(0)
    kx, ky, kp = jax.random.split(key, 3)
    x = jax.random.normal(kx, (N, in_channels, H, W), jnp.float32)
    y = jax.random.normal(ky, (N, in_channels, 2 * H, 2 * W), jnp.float32)
    params = init_upsample_params(kp, in_channels, out_channels, layers)

    fwd = jax.jit(functools.partial(upsample_forward, params))
    out = jax.block_until_ready(fwd(x, y))
    assert out.shape == (N, out_channels, 2 * H, 2 * W), out.shape
    assert out.dtype == jnp.float32

    ref = _reference_forward(params, x, y)
    np.testing.assert_allclose(np.asarray(out), np.asarray(ref), rtol=2e-2, atol=2e-2)

    print("KERNEL_OK")
</pallas_src>

<mosaic_0001>
module attributes {stable_mosaic.version = 11 : i64} {
  func.func @kernel(%arg0: i32, %arg1: memref<1x8x16x4xf32, #tpu.memory_space<vmem>>, %arg2: memref<1x16x16x4xf32, #tpu.memory_space<vmem>>, %arg3: memref<72x4xf32, #tpu.memory_space<vmem>>, %arg4: memref<1x4xf32, #tpu.memory_space<vmem>>, %arg5: memref<72x8xf32, #tpu.memory_space<vmem>>, %arg6: memref<1x8xf32, #tpu.memory_space<vmem>>, %arg7: memref<1x16x16x8xf32, #tpu.memory_space<vmem>>, %arg8: memref<18x18x8xf32, #tpu.memory_space<vmem>>, %arg9: memref<18x18x8xf32, #tpu.memory_space<vmem>>) attributes {dimension_semantics = [#tpu.dimension_semantics<parallel>], iteration_bounds = array<i64: 2>, scalar_prefetch = 0 : i64, scratch_operands = 2 : i64, tpu.core_type = #tpu.core_type<tc>, window_params = [{transform_indices = @transform_0, window_bounds = array<i64: 1, 8, 16, 4>}, {transform_indices = @transform_1, window_bounds = array<i64: 1, 16, 16, 4>}, {pipeline_mode = #tpu.pipeline_mode<synchronous>, transform_indices = @transform_2, window_bounds = array<i64: 72, 4>}, {pipeline_mode = #tpu.pipeline_mode<synchronous>, transform_indices = @transform_3, window_bounds = array<i64: 1, 4>}, {pipeline_mode = #tpu.pipeline_mode<synchronous>, transform_indices = @transform_4, window_bounds = array<i64: 72, 8>}, {pipeline_mode = #tpu.pipeline_mode<synchronous>, transform_indices = @transform_5, window_bounds = array<i64: 1, 8>}, {transform_indices = @transform_6, window_bounds = array<i64: 1, 16, 16, 8>}]} {
    %cst = arith.constant 0.000000e+00 : f32
    %0 = vector.broadcast %cst : f32 to vector<18x18x8xf32>
    %c0 = arith.constant 0 : index
    %c0_0 = arith.constant 0 : index
    %c0_1 = arith.constant 0 : index
    %1 = vector.load %arg8[%c0, %c0_0, %c0_1] : memref<18x18x8xf32, #tpu.memory_space<vmem>>, vector<18x18x8xf32>
    tpu.vector_store %arg8[%c0, %c0_0, %c0_1], %0 {strides = array<i32>} : memref<18x18x8xf32, #tpu.memory_space<vmem>>, vector<18x18x8xf32>,
    %cst_2 = arith.constant 0.000000e+00 : f32
    %2 = vector.broadcast %cst_2 : f32 to vector<18x18x8xf32>
    %c0_3 = arith.constant 0 : index
    %c0_4 = arith.constant 0 : index
    %c0_5 = arith.constant 0 : index
    %3 = vector.load %arg9[%c0_3, %c0_4, %c0_5] : memref<18x18x8xf32, #tpu.memory_space<vmem>>, vector<18x18x8xf32>
    tpu.vector_store %arg9[%c0_3, %c0_4, %c0_5], %2 {strides = array<i32>} : memref<18x18x8xf32, #tpu.memory_space<vmem>>, vector<18x18x8xf32>,
    %c0_6 = arith.constant 0 : index
    %c0_7 = arith.constant 0 : index
    %c0_8 = arith.constant 0 : index
    %c0_9 = arith.constant 0 : index
    %4 = vector.load %arg1[%c0_6, %c0_7, %c0_8, %c0_9] : memref<1x8x16x4xf32, #tpu.memory_space<vmem>>, vector<1x8x16x4xf32>
    %5 = vector.shape_cast %4 : vector<1x8x16x4xf32> to vector<8x16x4xf32>
    %6 = vector.extract_strided_slice %5 {offsets = [0, 0, 0], sizes = [1, 16, 4], strides = [1, 1, 1]} : vector<8x16x4xf32> to vector<1x16x4xf32>
    %7 = vector.extract_strided_slice %5 {offsets = [0, 0, 0], sizes = [7, 16, 4], strides = [1, 1, 1]} : vector<8x16x4xf32> to vector<7x16x4xf32>
    %8 = tpu.concatenate %6, %7 in 0 : vector<1x16x4xf32>, vector<7x16x4xf32> -> vector<8x16x4xf32>
    %9 = vector.extract_strided_slice %5 {offsets = [1, 0, 0], sizes = [7, 16, 4], strides = [1, 1, 1]} : vector<8x16x4xf32> to vector<7x16x4xf32>
    %10 = vector.extract_strided_slice %5 {offsets = [7, 0, 0], sizes = [1, 16, 4], strides = [1, 1, 1]} : vector<8x16x4xf32> to vector<1x16x4xf32>
    %11 = tpu.concatenate %9, %10 in 0 : vector<7x16x4xf32>, vector<1x16x4xf32> -> vector<8x16x4xf32>
    %cst_10 = arith.constant 7.500000e-01 : f32
    %12 = vector.broadcast %cst_10 : f32 to vector<8x16x4xf32>
    %13 = arith.mulf %12, %5 : vector<8x16x4xf32>
    %cst_11 = arith.constant 2.500000e-01 : f32
    %14 = vector.broadcast %cst_11 : f32 to vector<8x16x4xf32>
    %15 = arith.mulf %14, %8 : vector<8x16x4xf32>
    %16 = arith.addf %13, %15 : vector<8x16x4xf32>
    %cst_12 = arith.constant 7.500000e-01 : f32
    %17 = vector.broadcast %cst_12 : f32 to vector<8x16x4xf32>
    %18 = arith.mulf %17, %5 : vector<8x16x4xf32>
    %cst_13 = arith.constant 2.500000e-01 : f32
    %19 = vector.broadcast %cst_13 : f32 to vector<8x16x4xf32>
    %20 = arith.mulf %19, %11 : vector<8x16x4xf32>
    %21 = arith.addf %18, %20 : vector<8x16x4xf32>
    %22 = vector.shape_cast %16 : vector<8x16x4xf32> to vector<8x1x16x4xf32>
    %23 = vector.shape_cast %21 : vector<8x16x4xf32> to vector<8x1x16x4xf32>
    %24 = tpu.concatenate %22, %23 in 1 : vector<8x1x16x4xf32>, vector<8x1x16x4xf32> -> vector<8x2x16x4xf32>
    %25 = vector.shape_cast %24 : vector<8x2x16x4xf32> to vector<16x16x4xf32>
    %c0_14 = arith.constant 0 : index
    %c0_15 = arith.constant 0 : index
    %c0_16 = arith.constant 0 : index
    %c0_17 = arith.constant 0 : index
    %26 = vector.load %arg2[%c0_14, %c0_15, %c0_16, %c0_17] : memref<1x16x16x4xf32, #tpu.memory_space<vmem>>, vector<1x16x16x4xf32>
    %27 = vector.shape_cast %26 : vector<1x16x16x4xf32> to vector<16x16x4xf32>
    %28 = tpu.concatenate %25, %27 in 2 : vector<16x16x4xf32>, vector<16x16x4xf32> -> vector<16x16x8xf32>
    %c1 = arith.constant 1 : index
    %c1_18 = arith.constant 1 : index
    %c0_19 = arith.constant 0 : index
    %29 = vector.load %arg8[%c1, %c1_18, %c0_19] : memref<18x18x8xf32, #tpu.memory_space<vmem>>, vector<16x16x8xf32>
    tpu.vector_store %arg8[%c1, %c1_18, %c0_19], %28 {strides = array<i32>} : memref<18x18x8xf32, #tpu.memory_space<vmem>>, vector<16x16x8xf32>,
    %c0_20 = arith.constant 0 : index
    %c0_21 = arith.constant 0 : index
    %c0_22 = arith.constant 0 : index
    %30 = vector.load %arg8[%c0_20, %c0_21, %c0_22] : memref<18x18x8xf32, #tpu.memory_space<vmem>>, vector<16x16x8xf32>
    %31 = vector.shape_cast %30 : vector<16x16x8xf32> to vector<256x8xf32>
    %c0_23 = arith.constant 0 : index
    %c1_24 = arith.constant 1 : index
    %c0_25 = arith.constant 0 : index
    %32 = vector.load %arg8[%c0_23, %c1_24, %c0_25] : memref<18x18x8xf32, #tpu.memory_space<vmem>>, vector<16x16x8xf32>
    %33 = vector.shape_cast %32 : vector<16x16x8xf32> to vector<256x8xf32>
    %c0_26 = arith.constant 0 : index
    %c2 = arith.constant 2 : index
    %c0_27 = arith.constant 0 : index
    %34 = vector.load %arg8[%c0_26, %c2, %c0_27] : memref<18x18x8xf32, #tpu.memory_space<vmem>>, vector<16x16x8xf32>
    %35 = vector.shape_cast %34 : vector<16x16x8xf32> to vector<256x8xf32>
    %c1_28 = arith.constant 1 : index
    %c0_29 = arith.constant 0 : index
    %c0_30 = arith.constant 0 : index
    %36 = vector.load %arg8[%c1_28, %c0_29, %c0_30] : memref<18x18x8xf32, #tpu.memory_space<vmem>>, vector<16x16x8xf32>
    %37 = vector.shape_cast %36 : vector<16x16x8xf32> to vector<256x8xf32>
    %c1_31 = arith.constant 1 : index
    %c1_32 = arith.constant 1 : index
    %c0_33 = arith.constant 0 : index
    %38 = vector.load %arg8[%c1_31, %c1_32, %c0_33] : memref<18x18x8xf32, #tpu.memory_space<vmem>>, vector<16x16x8xf32>
    %39 = vector.shape_cast %38 : vector<16x16x8xf32> to vector<256x8xf32>
    %c1_34 = arith.constant 1 : index
    %c2_35 = arith.constant 2 : index
    %c0_36 = arith.constant 0 : index
    %40 = vector.load %arg8[%c1_34, %c2_35, %c0_36] : memref<18x18x8xf32, #tpu.memory_space<vmem>>, vector<16x16x8xf32>
    %41 = vector.shape_cast %40 : vector<16x16x8xf32> to vector<256x8xf32>
    %c2_37 = arith.constant 2 : index
    %c0_38 = arith.constant 0 : index
    %c0_39 = arith.constant 0 : index
    %42 = vector.load %arg8[%c2_37, %c0_38, %c0_39] : memref<18x18x8xf32, #tpu.memory_space<vmem>>, vector<16x16x8xf32>
    %43 = vector.shape_cast %42 : vector<16x16x8xf32> to vector<256x8xf32>
    %c2_40 = arith.constant 2 : index
    %c1_41 = arith.constant 1 : index
    %c0_42 = arith.constant 0 : index
    %44 = vector.load %arg8[%c2_40, %c1_41, %c0_42] : memref<18x18x8xf32, #tpu.memory_space<vmem>>, vector<16x16x8xf32>
    %45 = vector.shape_cast %44 : vector<16x16x8xf32> to vector<256x8xf32>
    %c2_43 = arith.constant 2 : index
    %c2_44 = arith.constant 2 : index
    %c0_45 = arith.constant 0 : index
    %46 = vector.load %arg8[%c2_43, %c2_44, %c0_45] : memref<18x18x8xf32, #tpu.memory_space<vmem>>, vector<16x16x8xf32>
    %47 = vector.shape_cast %46 : vector<16x16x8xf32> to vector<256x8xf32>
    %48 = tpu.concatenate %31, %33, %35, %37, %39, %41, %43, %45, %47 in 1 : vector<256x8xf32>, vector<256x8xf32>, vector<256x8xf32>, vector<256x8xf32>, vector<256x8xf32>, vector<256x8xf32>, vector<256x8xf32>, vector<256x8xf32>, vector<256x8xf32> -> vector<256x72xf32>
    %c0_46 = arith.constant 0 : index
    %c0_47 = arith.constant 0 : index
    %49 = vector.load %arg3[%c0_46, %c0_47] : memref<72x4xf32, #tpu.memory_space<vmem>>, vector<72x4xf32>
    %cst_48 = arith.constant dense<0.000000e+00> : vector<256x4xf32>
    %50 = tpu.matmul %48, %49, %cst_48 {dimension_numbers = #tpu.dot_dimension_numbers<[1], [0], [0], [1], [0, 0, 1, 1], [], []>} : vector<256x72xf32>, vector<72x4xf32>, vector<256x4xf32> -> vector<256x4xf32>
    %c0_49 = arith.constant 0 : index
    %c0_50 = arith.constant 0 : index
    %51 = vector.load %arg4[%c0_49, %c0_50] : memref<1x4xf32, #tpu.memory_space<vmem>>, vector<1x4xf32>
    %52 = vector.broadcast %51 : vector<1x4xf32> to vector<256x4xf32>
    %53 = arith.addf %50, %52 : vector<256x4xf32>
    %cst_51 = arith.constant 0.000000e+00 : f32
    %54 = vector.broadcast %cst_51 : f32 to vector<256x4xf32>
    %55 = arith.maximumf %53, %54 : vector<256x4xf32>
    %56 = vector.shape_cast %55 : vector<256x4xf32> to vector<16x16x4xf32>
    %cst_52 = arith.constant 0.000000e+00 : f32
    %57 = vector.broadcast %cst_52 : f32 to vector<16x16x4xf32>
    %58 = tpu.concatenate %56, %57 in 2 : vector<16x16x4xf32>, vector<16x16x4xf32> -> vector<16x16x8xf32>
    %c1_53 = arith.constant 1 : index
    %c1_54 = arith.constant 1 : index
    %c0_55 = arith.constant 0 : index
    %59 = vector.load %arg9[%c1_53, %c1_54, %c0_55] : memref<18x18x8xf32, #tpu.memory_space<vmem>>, vector<16x16x8xf32>
    tpu.vector_store %arg9[%c1_53, %c1_54, %c0_55], %58 {strides = array<i32>} : memref<18x18x8xf32, #tpu.memory_space<vmem>>, vector<16x16x8xf32>,
    %c0_56 = arith.constant 0 : index
    %c0_57 = arith.constant 0 : index
    %c0_58 = arith.constant 0 : index
    %60 = vector.load %arg9[%c0_56, %c0_57, %c0_58] : memref<18x18x8xf32, #tpu.memory_space<vmem>>, vector<16x16x8xf32>
    %61 = vector.shape_cast %60 : vector<16x16x8xf32> to vector<256x8xf32>
    %c0_59 = arith.constant 0 : index
    %c1_60 = arith.constant 1 : index
    %c0_61 = arith.constant 0 : index
    %62 = vector.load %arg9[%c0_59, %c1_60, %c0_61] : memref<18x18x8xf32, #tpu.memory_space<vmem>>, vector<16x16x8xf32>
    %63 = vector.shape_cast %62 : vector<16x16x8xf32> to vector<256x8xf32>
    %c0_62 = arith.constant 0 : index
    %c2_63 = arith.constant 2 : index
    %c0_64 = arith.constant 0 : index
    %64 = vector.load %arg9[%c0_62, %c2_63, %c0_64] : memref<18x18x8xf32, #tpu.memory_space<vmem>>, vector<16x16x8xf32>
    %65 = vector.shape_cast %64 : vector<16x16x8xf32> to vector<256x8xf32>
    %c1_65 = arith.constant 1 : index
    %c0_66 = arith.constant 0 : index
    %c0_67 = arith.constant 0 : index
    %66 = vector.load %arg9[%c1_65, %c0_66, %c0_67] : memref<18x18x8xf32, #tpu.memory_space<vmem>>, vector<16x16x8xf32>
    %67 = vector.shape_cast %66 : vector<16x16x8xf32> to vector<256x8xf32>
    %c1_68 = arith.constant 1 : index
    %c1_69 = arith.constant 1 : index
    %c0_70 = arith.constant 0 : index
    %68 = vector.load %arg9[%c1_68, %c1_69, %c0_70] : memref<18x18x8xf32, #tpu.memory_space<vmem>>, vector<16x16x8xf32>
    %69 = vector.shape_cast %68 : vector<16x16x8xf32> to vector<256x8xf32>
    %c1_71 = arith.constant 1 : index
    %c2_72 = arith.constant 2 : index
    %c0_73 = arith.constant 0 : index
    %70 = vector.load %arg9[%c1_71, %c2_72, %c0_73] : memref<18x18x8xf32, #tpu.memory_space<vmem>>, vector<16x16x8xf32>
    %71 = vector.shape_cast %70 : vector<16x16x8xf32> to vector<256x8xf32>
    %c2_74 = arith.constant 2 : index
    %c0_75 = arith.constant 0 : index
    %c0_76 = arith.constant 0 : index
    %72 = vector.load %arg9[%c2_74, %c0_75, %c0_76] : memref<18x18x8xf32, #tpu.memory_space<vmem>>, vector<16x16x8xf32>
    %73 = vector.shape_cast %72 : vector<16x16x8xf32> to vector<256x8xf32>
    %c2_77 = arith.constant 2 : index
    %c1_78 = arith.constant 1 : index
    %c0_79 = arith.constant 0 : index
    %74 = vector.load %arg9[%c2_77, %c1_78, %c0_79] : memref<18x18x8xf32, #tpu.memory_space<vmem>>, vector<16x16x8xf32>
    %75 = vector.shape_cast %74 : vector<16x16x8xf32> to vector<256x8xf32>
    %c2_80 = arith.constant 2 : index
    %c2_81 = arith.constant 2 : index
    %c0_82 = arith.constant 0 : index
    %76 = vector.load %arg9[%c2_80, %c2_81, %c0_82] : memref<18x18x8xf32, #tpu.memory_space<vmem>>, vector<16x16x8xf32>
    %77 = vector.shape_cast %76 : vector<16x16x8xf32> to vector<256x8xf32>
    %78 = tpu.concatenate %61, %63, %65, %67, %69, %71, %73, %75, %77 in 1 : vector<256x8xf32>, vector<256x8xf32>, vector<256x8xf32>, vector<256x8xf32>, vector<256x8xf32>, vector<256x8xf32>, vector<256x8xf32>, vector<256x8xf32>, vector<256x8xf32> -> vector<256x72xf32>
    %c0_83 = arith.constant 0 : index
    %c0_84 = arith.constant 0 : index
    %79 = vector.load %arg5[%c0_83, %c0_84] : memref<72x8xf32, #tpu.memory_space<vmem>>, vector<72x8xf32>
    %cst_85 = arith.constant dense<0.000000e+00> : vector<256x8xf32>
    %80 = tpu.matmul %78, %79, %cst_85 {dimension_numbers = #tpu.dot_dimension_numbers<[1], [0], [0], [1], [0, 0, 1, 1], [], []>} : vector<256x72xf32>, vector<72x8xf32>, vector<256x8xf32> -> vector<256x8xf32>
    %c0_86 = arith.constant 0 : index
    %c0_87 = arith.constant 0 : index
    %81 = vector.load %arg6[%c0_86, %c0_87] : memref<1x8xf32, #tpu.memory_space<vmem>>, vector<1x8xf32>
    %82 = vector.broadcast %81 : vector<1x8xf32> to vector<256x8xf32>
    %83 = arith.addf %80, %82 : vector<256x8xf32>
    %cst_88 = arith.constant 0.000000e+00 : f32
    %84 = vector.broadcast %cst_88 : f32 to vector<256x8xf32>
    %85 = arith.maximumf %83, %84 : vector<256x8xf32>
    %86 = vector.shape_cast %85 : vector<256x8xf32> to vector<16x16x8xf32>
    %c0_89 = arith.constant 0 : index
    %c0_90 = arith.constant 0 : index
    %c0_91 = arith.constant 0 : index
    %c0_92 = arith.constant 0 : index
    %87 = vector.load %arg7[%c0_89, %c0_90, %c0_91, %c0_92] : memref<1x16x16x8xf32, #tpu.memory_space<vmem>>, vector<1x16x16x8xf32>
    %88 = vector.shape_cast %87 : vector<1x16x16x8xf32> to vector<16x16x8xf32>
    %89 = vector.shape_cast %86 : vector<16x16x8xf32> to vector<1x16x16x8xf32>
    tpu.vector_store %arg7[%c0_89, %c0_90, %c0_91, %c0_92], %89 {strides = array<i32>} : memref<1x16x16x8xf32, #tpu.memory_space<vmem>>, vector<1x16x16x8xf32>,
    return
  }
  func.func @transform_0(%arg0: i32) -> (i32, i32, i32, i32) {
    %c0_i32 = arith.constant 0 : i32
    %c0_i32_0 = arith.constant 0 : i32
    %c0_i32_1 = arith.constant 0 : i32
    %c0_i32_2 = arith.constant 0 : i32
    return %arg0, %c0_i32, %c0_i32_0, %c0_i32_1 : i32, i32, i32, i32
  }
  func.func @transform_1(%arg0: i32) -> (i32, i32, i32, i32) {
    %c0_i32 = arith.constant 0 : i32
    %c0_i32_0 = arith.constant 0 : i32
    %c0_i32_1 = arith.constant 0 : i32
    %c0_i32_2 = arith.constant 0 : i32
    return %arg0, %c0_i32, %c0_i32_0, %c0_i32_1 : i32, i32, i32, i32
  }
  func.func @transform_2(%arg0: i32) -> (i32, i32) {
    %c0_i32 = arith.constant 0 : i32
    %c0_i32_0 = arith.constant 0 : i32
    %c0_i32_1 = arith.constant 0 : i32
    return %c0_i32, %c0_i32_0 : i32, i32
  }
  func.func @transform_3(%arg0: i32) -> (i32, i32) {
    %c0_i32 = arith.constant 0 : i32
    %c0_i32_0 = arith.constant 0 : i32
    %c0_i32_1 = arith.constant 0 : i32
    return %c0_i32, %c0_i32_0 : i32, i32
  }
  func.func @transform_4(%arg0: i32) -> (i32, i32) {
    %c0_i32 = arith.constant 0 : i32
    %c0_i32_0 = arith.constant 0 : i32
    %c0_i32_1 = arith.constant 0 : i32
    return %c0_i32, %c0_i32_0 : i32, i32
  }
  func.func @transform_5(%arg0: i32) -> (i32, i32) {
    %c0_i32 = arith.constant 0 : i32
    %c0_i32_0 = arith.constant 0 : i32
    %c0_i32_1 = arith.constant 0 : i32
    return %c0_i32, %c0_i32_0 : i32, i32
  }
  func.func @transform_6(%arg0: i32) -> (i32, i32, i32, i32) {
    %c0_i32 = arith.constant 0 : i32
    %c0_i32_0 = arith.constant 0 : i32
    %c0_i32_1 = arith.constant 0 : i32
    %c0_i32_2 = arith.constant 0 : i32
    return %arg0, %c0_i32, %c0_i32_0, %c0_i32_1 : i32, i32, i32, i32
  }
}

</mosaic_0001>

<bundles_post_ra>
// kernel: upsample_forward.1
= control target key start
LH: loop header
LB: loop body
LE: loop exit
PB: predicated region body
PF: predicated region fallthrough
CT: control target
= control target key end

     0   :  { %s4719_s21 = smov 0   ;;  %s8383_s0 = inlined_call_operand.vmem [shape: f32[2,8,16,4], index: 0, kind: input, shape index: {}]   ;;  %s8384_s1 = inlined_call_operand.vmem [shape: f32[2,16,16,4], index: 1, kind: input, shape index: {}]   ;;  %s8385_s2 = inlined_call_operand.vmem [shape: f32[72,4], index: 2, kind: input, shape index: {}]   ;;  %s8386_s3 = inlined_call_operand.vmem [shape: f32[1,4], index: 3, kind: input, shape index: {}]   ;;  %s8387_s4 = inlined_call_operand.vmem [shape: f32[72,8], index: 4, kind: input, shape index: {}]   ;;  %s8388_s5 = inlined_call_operand.vmem [shape: f32[1,8], index: 5, kind: input, shape index: {}]   ;;  %s8389_s6 = inlined_call_operand.vmem [shape: f32[2,16,16,8], index: 6, kind: output, shape index: {}]  }
   0x1 LB: > { %s4506_s22 = sadd.s32 4294967295, %s4672_s21   ;;  %p4510_p0 = scmp.ge.s32.totalorder %s4672_s21, 1  ;;  %s4672_s21 = sphi %s4719_s21, %s16_s21  }
   0x2   : > { %p222_p1 = scmp.lt.s32.totalorder %s4672_s21, 3 }
   0x4   : > { %p223_p2 = pnand %p4510_p0, %p222_p1 }
   0x6   : > { %226 = sbr.rel (%p223_p2) target bundleno = 1983 (0x7bf), region = 44 }
   0xb   : > { %p257_p3 = scmp.lt.s32.totalorder %s4506_s22, 1  ;;  %s4674_s27 = smov 4   ;;  %vm272_vm0 = vcmask 64512   ;;  %v4675_v21 = vmov 0.0   ;;  %vm622_vm1 = vcmask 31744   ;;  %vm275_vm2 = vcmask 58368  }
   0xc   : > { %283 = vst.msk [vmem:[#allocation2 + $0x48] sm:$0xff] %vm272_vm0, %v4675_v21  ;;  %s4676_s8 = smov 8   ;;  %s4677_s9 = smov 16   ;;  %vm2033_vm3 = vcmask 130048   ;;  %vm2099_vm4 = vcmask 261120   ;;  %vm2066_vm5 = vcmask 195584  }
   0xd   : > { %s9047_s22 = smov (!%p257_p3, %s4506_s22), 1  ;;  %284 = vst.msk [vmem:[#allocation2 + $0x50] sm:$0xff] %vm272_vm0, %v4675_v21  ;;  %s4678_s10 = smov 24   ;;  %vm2132_vm6 = vcmask 326656   ;;  %vm2198_vm7 = vcmask 457728   ;;  %vm2165_vm8 = vcmask 392192  }
   0xe   : > { %s4584_s23 = sshll.u32 %s9047_s22, 8  ;;  %273 = vst.msk [vmem:[#allocation2] sm:$0xff] %vm272_vm0, %v4675_v21  ;;  %s4583_s28 = sshll.u32 %s9047_s22, 7  ;;  %vm2277_vm9 = vcmask 588800   ;;  %vm2231_vm10 = vcmask 523264  }
   0xf   : > { %s4735_s26 = scalar_lea.vmem %s8384_s1, %s4584_s23  ;;  %274 = vst.msk [vmem:[#allocation2 + $0x8] sm:$0xff] %vm272_vm0, %v4675_v21  ;;  %s4867_s7 = scalar_lea.vmem %s8383_s0, %s4583_s28 }
  0x10   : > { %v464_v0 = vld [vmem:[%s4735_s26 + $0x10] sm:$0xff]  ;;  %v462_v1 = vld [vmem:[%s4735_s26] sm:$0xff]  ;;  %v465_v3 = vld [vmem:[%s4735_s26 + $0x18] sm:$0xff]  ;;  %277 = vst.msk [vmem:[#allocation2 + $0x18] sm:$0xff] %vm272_vm0, %v4675_v21  ;;  %s4679_s11 = smov 32   ;;  %s4680_s12 = smov 40  }
  0x11   : > { %530 = vrot.lane.b32.xlu1 %v464_v0, %s4674_s27  ;;  %526 = vrot.lane.b32.xlu0 %v462_v1, %s4674_s27  ;;  %v466_v2 = vld [vmem:[%s4735_s26 + $0x20] sm:$0xff]  ;;  %v463_v4 = vld [vmem:[%s4735_s26 + $0x8] sm:$0xff]  ;;  %278 = vst.msk [vmem:[#allocation2 + $0x20] sm:$0xff] %vm272_vm0, %v4675_v21  ;;  %s4681_s13 = smov 48   ;;  %s4682_s14 = smov 56  }
  0x12   : > { %534 = vrot.lane.b32.xlu2 %v466_v2, %s4674_s27  ;;  %v467_v5 = vld [vmem:[%s4735_s26 + $0x28] sm:$0xff]  ;;  %v469_v6 = vld [vmem:[%s4735_s26 + $0x38] sm:$0xff]  ;;  %v468_v7 = vld [vmem:[%s4735_s26 + $0x30] sm:$0xff]  ;;  %280 = vst.msk [vmem:[#allocation2 + $0x30] sm:$0xff] %vm272_vm0, %v4675_v21  ;;  %s4683_s15 = smov 64  }
  0x13   : > { %v470_v8 = vld [vmem:[%s4735_s26 + $0x40] sm:$0xff]  ;;  %v472_v9 = vld [vmem:[%s4735_s26 + $0x50] sm:$0xff]  ;;  %v471_v10 = vld [vmem:[%s4735_s26 + $0x48] sm:$0xff]  ;;  %281 = vst.msk [vmem:[#allocation2 + $0x38] sm:$0xff] %vm272_vm0, %v4675_v21 }
  0x14   : > { %v473_v11 = vld [vmem:[%s4735_s26 + $0x58] sm:$0xff]  ;;  %v475_v12 = vld [vmem:[%s4735_s26 + $0x68] sm:$0xff]  ;;  %v474_v13 = vld [vmem:[%s4735_s26 + $0x60] sm:$0xff]  ;;  %286 = vst.msk [vmem:[#allocation2 + $0x60] sm:$0xff] %vm272_vm0, %v4675_v21 }
  0x15   : > { %v476_v14 = vld [vmem:[%s4735_s26 + $0x70] sm:$0xff]  ;;  %v478_v15 = vld [vmem:[%s4735_s26 + $0x80] sm:$0xff]  ;;  %v477_v16 = vld [vmem:[%s4735_s26 + $0x78] sm:$0xff]  ;;  %287 = vst.msk [vmem:[#allocation2 + $0x68] sm:$0xff] %vm272_vm0, %v4675_v21 }
  0x16   : > { %v479_v17 = vld [vmem:[%s4735_s26 + $0x88] sm:$0xff]  ;;  %v481_v18 = vld [vmem:[%s4735_s26 + $0x98] sm:$0xff]  ;;  %v480_v19 = vld [vmem:[%s4735_s26 + $0x90] sm:$0xff]  ;;  %289 = vst.msk [vmem:[#allocation2 + $0x78] sm:$0xff] %vm272_vm0, %v4675_v21 }
  0x17   : > { %v482_v20 = vld [vmem:[%s4735_s26 + $0xa0] sm:$0xff]  ;;  %v484_v22 = vld [vmem:[%s4735_s26 + $0xb0] sm:$0xff]  ;;  %v483_v23 = vld [vmem:[%s4735_s26 + $0xa8] sm:$0xff]  ;;  %290 = vst.msk [vmem:[#allocation2 + $0x80] sm:$0xff] %vm272_vm0, %v4675_v21 }
  0x18   : > { %v485_v24 = vld [vmem:[%s4735_s26 + $0xb8] sm:$0xff]  ;;  %v487_v25 = vld [vmem:[%s4735_s26 + $0xc8] sm:$0xff]  ;;  %v486_v26 = vld [vmem:[%s4735_s26 + $0xc0] sm:$0xff]  ;;  %292 = vst.msk [vmem:[#allocation2 + $0x90] sm:$0xff] %vm272_vm0, %v4675_v21 }
  0x19   : > { %532 = vrot.lane.b32.xlu1 %v465_v3, %s4674_s27  ;;  %528 = vrot.lane.b32.xlu0 %v463_v4, %s4674_s27  ;;  %293 = vst.msk [vmem:[#allocation2 + $0x98] sm:$0xff] %vm272_vm0, %v4675_v21  ;;  %v488_v27 = vld [vmem:[%s4735_s26 + $0xd0] sm:$0xff]  ;;  %v489_v28 = vld [vmem:[%s4735_s26 + $0xd8] sm:$0xff]  ;;  %v720_v51 = vld [vmem:[#allocation2 + $0x1] sm:$0xff] }
  0x1a   : > { %536 = vrot.lane.b32.xlu2 %v467_v5, %s4674_s27  ;;  %295 = vst.msk [vmem:[#allocation2 + $0xa8] sm:$0xff] %vm272_vm0, %v4675_v21  ;;  %v490_v29 = vld [vmem:[%s4735_s26 + $0xe0] sm:$0xff]  ;;  %v491_v30 = vld [vmem:[%s4735_s26 + $0xe8] sm:$0xff]  ;;  %v492_v31 = vld [vmem:[%s4735_s26 + $0xf0] sm:$0xff] }
  0x1b   : > { %296 = vst.msk [vmem:[#allocation2 + $0xb0] sm:$0xff] %vm272_vm0, %v4675_v21  ;;  %v382_v32 = vld [vmem:[%s4867_s7] sm:$0xff]  ;;  %v384_v33 = vld [vmem:[%s4867_s7 + $0x10] sm:$0xff]  ;;  %v493_v37 = vld [vmem:[%s4735_s26 + $0xf8] sm:$0xff]  ;;  %s8151_s26 = scalar_lea.vmem %s8389_s6, %s4584_s23 }
  0x1c   : > { %298 = vst.msk [vmem:[#allocation2 + $0xc0] sm:$0xff] %vm272_vm0, %v4675_v21  ;;  %v4879_v34 = vmul.f32 0.75, %v384_v33  ;;  %v414_v35 = vmul.f32 0.25, %v382_v32  ;;  %v398_v40 = vmul.f32 0.75, %v382_v32  ;;  %v4938_v41 = vmul.f32 0.25, %v384_v33  ;;  %v383_v61 = vld [vmem:[%s4867_s7 + $0x8] sm:$0xff] }
  0x1d   : > { %299 = vst.msk [vmem:[#allocation2 + $0xc8] sm:$0xff] %vm272_vm0, %v4675_v21  ;;  %v385_v62 = vld [vmem:[%s4867_s7 + $0x18] sm:$0xff]  ;;  %v415_v1 = vmul.f32 0.25, %v383_v61  ;;  %v386_v2 = vld [vmem:[%s4867_s7 + $0x20] sm:$0xff]  ;;  %v399_v3 = vmul.f32 0.75, %v383_v61  ;;  %v387_v5 = vld [vmem:[%s4867_s7 + $0x28] sm:$0xff] }
  0x1e   : > { %301 = vst.msk [vmem:[#allocation2 + $0xd8] sm:$0xff] %vm272_vm0, %v4675_v21  ;;  %v430_v36 = vadd.f32 %v414_v35, %v4879_v34  ;;  %v446_v42 = vadd.f32 %v4938_v41, %v398_v40  ;;  %v428_v44 = vadd.f32 %v414_v35, %v398_v40  ;;  %v401_v0 = vmul.f32 0.75, %v385_v62 }
  0x1f   : > { %302 = vst.msk [vmem:[#allocation2 + $0xe0] sm:$0xff] %vm272_vm0, %v4675_v21  ;;  %v417_v4 = vmul.f32 0.25, %v385_v62 }
  0x20   : > { %304 = vst.msk [vmem:[#allocation2 + $0xf0] sm:$0xff] %vm272_vm0, %v4675_v21 }
  0x21   : > { %540 = vrot.lane.b32.xlu1 %v469_v6, %s4674_s27  ;;  %538 = vrot.lane.b32.xlu0 %v468_v7, %s4674_s27  ;;  %305 = vst.msk [vmem:[#allocation2 + $0xf8] sm:$0xff] %vm272_vm0, %v4675_v21 }
  0x22   : > { %542 = vrot.lane.b32.xlu2 %v470_v8, %s4674_s27  ;;  %307 = vst.msk [vmem:[#allocation2 + $0x108] sm:$0xff] %vm272_vm0, %v4675_v21  ;;  %v402_v8 = vmul.f32 0.75, %v386_v2 }
  0x23   : > { %308 = vst.msk [vmem:[#allocation2 + $0x110] sm:$0xff] %vm272_vm0, %v4675_v21 }
  0x24   : > { %310 = vst.msk [vmem:[#allocation2 + $0x120] sm:$0xff] %vm272_vm0, %v4675_v21 }
  0x25   : > { %311 = vst.msk [vmem:[#allocation2 + $0x128] sm:$0xff] %vm272_vm0, %v4675_v21 }
  0x26   : > { %313 = vst.msk [vmem:[#allocation2 + $0x138] sm:$0xff] %vm272_vm0, %v4675_v21 }
  0x27   : > { %314 = vst.msk [vmem:[#allocation2 + $0x140] sm:$0xff] %vm272_vm0, %v4675_v21 }
  0x28   : > { %316 = vst.msk [vmem:[#allocation2 + $0x150] sm:$0xff] %vm272_vm0, %v4675_v21 }
  0x29   : > { %546 = vrot.lane.b32.xlu1 %v472_v9, %s4674_s27  ;;  %544 = vrot.lane.b32.xlu0 %v471_v10, %s4674_s27  ;;  %317 = vst.msk [vmem:[#allocation2 + $0x158] sm:$0xff] %vm272_vm0, %v4675_v21  ;;  %v389_v9 = vld [vmem:[%s4867_s7 + $0x38] sm:$0xff]  ;;  %v431_v10 = vadd.f32 %v415_v1, %v401_v0 }
  0x2a   : > { %548 = vrot.lane.b32.xlu2 %v473_v11, %s4674_s27  ;;  %319 = vst.msk [vmem:[#allocation2 + $0x168] sm:$0xff] %vm272_vm0, %v4675_v21  ;;  %v419_v11 = vmul.f32 0.25, %v387_v5  ;;  %v405_v33 = vmul.f32 0.75, %v389_v9 }
  0x2b   : > { %320 = vst.msk [vmem:[#allocation2 + $0x170] sm:$0xff] %vm272_vm0, %v4675_v21 }
  0x2c   : > { %322 = vst.msk [vmem:[#allocation2 + $0x180] sm:$0xff] %vm272_vm0, %v4675_v21 }
  0x2d   : > { %323 = vst.msk [vmem:[#allocation2 + $0x188] sm:$0xff] %vm272_vm0, %v4675_v21 }
  0x2e   : > { %325 = vst.msk [vmem:[#allocation2 + $0x198] sm:$0xff] %vm272_vm0, %v4675_v21 }
  0x2f   : > { %326 = vst.msk [vmem:[#allocation2 + $0x1a0] sm:$0xff] %vm272_vm0, %v4675_v21 }
  0x30   : > { %328 = vst.msk [vmem:[#allocation3] sm:$0xff] %vm272_vm0, %v4675_v21 }
  0x31   : > { %552 = vrot.lane.b32.xlu1 %v475_v12, %s4674_s27  ;;  %550 = vrot.lane.b32.xlu0 %v474_v13, %s4674_s27  ;;  %329 = vst.msk [vmem:[#allocation3 + $0x8] sm:$0xff] %vm272_vm0, %v4675_v21  ;;  %v388_v12 = vld [vmem:[%s4867_s7 + $0x30] sm:$0xff]  ;;  %v447_v13 = vadd.f32 %v417_v4, %v399_v3 }
  0x32   : > { %554 = vrot.lane.b32.xlu2 %v476_v14, %s4674_s27  ;;  %331 = vst.msk [vmem:[#allocation3 + $0x18] sm:$0xff] %vm272_vm0, %v4675_v21  ;;  %v418_v14 = vmul.f32 0.25, %v386_v2 }
  0x33   : > { %332 = vst.msk [vmem:[#allocation3 + $0x20] sm:$0xff] %vm272_vm0, %v4675_v21 }
  0x34   : > { %334 = vst.msk [vmem:[#allocation3 + $0x30] sm:$0xff] %vm272_vm0, %v4675_v21 }
  0x35   : > { %335 = vst.msk [vmem:[#allocation3 + $0x38] sm:$0xff] %vm272_vm0, %v4675_v21 }
  0x36   : > { %337 = vst.msk [vmem:[#allocation3 + $0x48] sm:$0xff] %vm272_vm0, %v4675_v21 }
  0x37   : > { %338 = vst.msk [vmem:[#allocation3 + $0x50] sm:$0xff] %vm272_vm0, %v4675_v21 }
  0x38   : > { %340 = vst.msk [vmem:[#allocation3 + $0x60] sm:$0xff] %vm272_vm0, %v4675_v21 }
  0x39   : > { %558 = vrot.lane.b32.xlu1 %v478_v15, %s4674_s27  ;;  %556 = vrot.lane.b32.xlu0 %v477_v16, %s4674_s27  ;;  %341 = vst.msk [vmem:[#allocation3 + $0x68] sm:$0xff] %vm272_vm0, %v4675_v21  ;;  %v429_v16 = vadd.f32 %v415_v1, %v399_v3 }
  0x3a   : > { %560 = vrot.lane.b32.xlu2 %v479_v17, %s4674_s27  ;;  %343 = vst.msk [vmem:[#allocation3 + $0x78] sm:$0xff] %vm272_vm0, %v4675_v21  ;;  %v403_v17 = vmul.f32 0.75, %v387_v5 }
  0x3b   : > { %344 = vst.msk [vmem:[#allocation3 + $0x80] sm:$0xff] %vm272_vm0, %v4675_v21 }
  0x3c   : > { %346 = vst.msk [vmem:[#allocation3 + $0x90] sm:$0xff] %vm272_vm0, %v4675_v21 }
  0x3d   : > { %347 = vst.msk [vmem:[#allocation3 + $0x98] sm:$0xff] %vm272_vm0, %v4675_v21 }
  0x3e   : > { %349 = vst.msk [vmem:[#allocation3 + $0xa8] sm:$0xff] %vm272_vm0, %v4675_v21 }
  0x3f   : > { %350 = vst.msk [vmem:[#allocation3 + $0xb0] sm:$0xff] %vm272_vm0, %v4675_v21 }
  0x40   : > { %352 = vst.msk [vmem:[#allocation3 + $0xc0] sm:$0xff] %vm272_vm0, %v4675_v21 }
  0x41   : > { %564 = vrot.lane.b32.xlu1 %v481_v18, %s4674_s27  ;;  %562 = vrot.lane.b32.xlu0 %v480_v19, %s4674_s27  ;;  %353 = vst.msk [vmem:[#allocation3 + $0xc8] sm:$0xff] %vm272_vm0, %v4675_v21  ;;  %v421_v18 = vmul.f32 0.25, %v389_v9  ;;  %v390_v19 = vld [vmem:[%s4867_s7 + $0x40] sm:$0xff]  ;;  %v395_v9 = vld [vmem:[%s4867_s7 + $0x68] sm:$0xff] }
  0x42   : > { %566 = vrot.lane.b32.xlu2 %v482_v20, %s4674_s27  ;;  %355 = vst.msk [vmem:[#allocation3 + $0xd8] sm:$0xff] %vm272_vm0, %v4675_v21  ;;  %v432_v20 = vadd.f32 %v4938_v41, %v402_v8  ;;  %v406_v41 = vmul.f32 0.75, %v390_v19 }
  0x43   : > { %356 = vst.msk [vmem:[#allocation3 + $0xe0] sm:$0xff] %vm272_vm0, %v4675_v21  ;;  %v451_v32 = vadd.f32 %v421_v18, %v403_v17 }
  0x44   : > { %358 = vst.msk [vmem:[#allocation3 + $0xf0] sm:$0xff] %vm272_vm0, %v4675_v21 }
  0x45   : > { %359 = vst.msk [vmem:[#allocation3 + $0xf8] sm:$0xff] %vm272_vm0, %v4675_v21 }
  0x46   : > { %361 = vst.msk [vmem:[#allocation3 + $0x108] sm:$0xff] %vm272_vm0, %v4675_v21 }
  0x47   : > { %362 = vst.msk [vmem:[#allocation3 + $0x110] sm:$0xff] %vm272_vm0, %v4675_v21 }
  0x48   : > { %364 = vst.msk [vmem:[#allocation3 + $0x120] sm:$0xff] %vm272_vm0, %v4675_v21 }
  0x49   : > { %570 = vrot.lane.b32.xlu1 %v484_v22, %s4674_s27  ;;  %568 = vrot.lane.b32.xlu0 %v483_v23, %s4674_s27  ;;  %365 = vst.msk [vmem:[#allocation3 + $0x128] sm:$0xff] %vm272_vm0, %v4675_v21  ;;  %v420_v22 = vmul.f32 0.25, %v388_v12 }
  0x4a   : > { %572 = vrot.lane.b32.xlu2 %v485_v24, %s4674_s27  ;;  %367 = vst.msk [vmem:[#allocation3 + $0x138] sm:$0xff] %vm272_vm0, %v4675_v21  ;;  %v449_v24 = vadd.f32 %v419_v11, %v401_v0 }
  0x4b   : > { %368 = vst.msk [vmem:[#allocation3 + $0x140] sm:$0xff] %vm272_vm0, %v4675_v21 }
  0x4c   : > { %370 = vst.msk [vmem:[#allocation3 + $0x150] sm:$0xff] %vm272_vm0, %v4675_v21 }
  0x4d   : > { %371 = vst.msk [vmem:[#allocation3 + $0x158] sm:$0xff] %vm272_vm0, %v4675_v21 }
  0x4e   : > { %373 = vst.msk [vmem:[#allocation3 + $0x168] sm:$0xff] %vm272_vm0, %v4675_v21 }
  0x4f   : > { %374 = vst.msk [vmem:[#allocation3 + $0x170] sm:$0xff] %vm272_vm0, %v4675_v21 }
  0x50   : > { %376 = vst.msk [vmem:[#allocation3 + $0x180] sm:$0xff] %vm272_vm0, %v4675_v21 }
  0x51   : > { %576 = vrot.lane.b32.xlu1 %v487_v25, %s4674_s27  ;;  %574 = vrot.lane.b32.xlu0 %v486_v26, %s4674_s27  ;;  %377 = vst.msk [vmem:[#allocation3 + $0x188] sm:$0xff] %vm272_vm0, %v4675_v21  ;;  %v448_v26 = vadd.f32 %v418_v14, %v4879_v34 }
  0x52   : > { %578 = vrot.lane.b32.xlu2 %v488_v27, %s4674_s27  ;;  %379 = vst.msk [vmem:[#allocation3 + $0x198] sm:$0xff] %vm272_vm0, %v4675_v21  ;;  %v404_v27 = vmul.f32 0.75, %v388_v12 }
  0x53   : > { %380 = vst.msk [vmem:[#allocation3 + $0x1a0] sm:$0xff] %vm272_vm0, %v4675_v21 }
  0x54   : > { %276 = vst.msk [vmem:[#allocation2 + $0x10] sm:$0x3] %vm275_vm2, %v4675_v21 }
  0x55   : > { %279 = vst.msk [vmem:[#allocation2 + $0x28] sm:$0x3] %vm275_vm2, %v4675_v21 }
  0x56   : > { %282 = vst.msk [vmem:[#allocation2 + $0x40] sm:$0x3] %vm275_vm2, %v4675_v21 }
  0x57   : > { %285 = vst.msk [vmem:[#allocation2 + $0x58] sm:$0x3] %vm275_vm2, %v4675_v21 }
  0x58   : > { %288 = vst.msk [vmem:[#allocation2 + $0x70] sm:$0x3] %vm275_vm2, %v4675_v21 }
  0x59   : > { %580 = vrot.lane.b32.xlu0 %v489_v28, %s4674_s27  ;;  %582 = vrot.lane.b32.xlu1 %v490_v29, %s4674_s27  ;;  %291 = vst.msk [vmem:[#allocation2 + $0x88] sm:$0x3] %vm275_vm2, %v4675_v21  ;;  %v422_v28 = vmul.f32 0.25, %v390_v19  ;;  %v391_v29 = vld [vmem:[%s4867_s7 + $0x48] sm:$0xff] }
  0x5a   : > { %584 = vrot.lane.b32.xlu2 %v491_v30, %s4674_s27  ;;  %294 = vst.msk [vmem:[#allocation2 + $0xa0] sm:$0x3] %vm275_vm2, %v4675_v21 }
  0x5b   : > { %v721_v54 = vld [vmem:[#allocation2 + $0x9] sm:$0xff]  ;;  %297 = vst.msk [vmem:[#allocation2 + $0xb8] sm:$0x3] %vm275_vm2, %v4675_v21  ;;  %v452_v40 = vadd.f32 %v422_v28, %v404_v27 }
  0x5c   : > { %300 = vst.msk [vmem:[#allocation2 + $0xd0] sm:$0x3] %vm275_vm2, %v4675_v21 }
  0x5d   : > { %303 = vst.msk [vmem:[#allocation2 + $0xe8] sm:$0x3] %vm275_vm2, %v4675_v21 }
  0x5e   : > { %306 = vst.msk [vmem:[#allocation2 + $0x100] sm:$0x3] %vm275_vm2, %v4675_v21 }
  0x5f   : > { %309 = vst.msk [vmem:[#allocation2 + $0x118] sm:$0x3] %vm275_vm2, %v4675_v21 }
  0x60   : > { %312 = vst.msk [vmem:[#allocation2 + $0x130] sm:$0x3] %vm275_vm2, %v4675_v21 }
  0x61   : > { %586 = vrot.lane.b32.xlu0 %v492_v31, %s4674_s27  ;;  %588 = vrot.lane.b32.xlu1 %v493_v37, %s4674_s27  ;;  %315 = vst.msk [vmem:[#allocation2 + $0x148] sm:$0x3] %vm275_vm2, %v4675_v21 }
  0x62   : > { %1009 = vrot.lane.b32.xlu2 %v720_v51, %s4676_s8  ;;  %318 = vst.msk [vmem:[#allocation2 + $0x160] sm:$0x3] %vm275_vm2, %v4675_v21 }
  0x63   : > { %321 = vst.msk [vmem:[#allocation2 + $0x178] sm:$0x3] %vm275_vm2, %v4675_v21 }
  0x64   : > { %324 = vst.msk [vmem:[#allocation2 + $0x190] sm:$0x3] %vm275_vm2, %v4675_v21 }
  0x65   : > { %327 = vst.msk [vmem:[#allocation2 + $0x1a8] sm:$0x3] %vm275_vm2, %v4675_v21 }
  0x66   : > { %330 = vst.msk [vmem:[#allocation3 + $0x10] sm:$0x3] %vm275_vm2, %v4675_v21 }
  0x67   : > { %333 = vst.msk [vmem:[#allocation3 + $0x28] sm:$0x3] %vm275_vm2, %v4675_v21 }
  0x68   : > { %336 = vst.msk [vmem:[#allocation3 + $0x40] sm:$0x3] %vm275_vm2, %v4675_v21 }
  0x69   : > { %1011 = vrot.lane.b32.xlu0 %v721_v54, %s4676_s8  ;;  %339 = vst.msk [vmem:[#allocation3 + $0x58] sm:$0x3] %vm275_vm2, %v4675_v21 }
  0x6a   : > { %342 = vst.msk [vmem:[#allocation3 + $0x70] sm:$0x3] %vm275_vm2, %v4675_v21 }
  0x6b   : > { %345 = vst.msk [vmem:[#allocation3 + $0x88] sm:$0x3] %vm275_vm2, %v4675_v21 }
  0x6c   : > { %v535_v38 = vpop.permute.xlu2 %534  ;;  %348 = vst.msk [vmem:[#allocation3 + $0xa0] sm:$0x3] %vm275_vm2, %v4675_v21 }
  0x6d   : > { %v627_v39 = vsel %vm622_vm1, %v430_v36, %v535_v38  ;;  %351 = vst.msk [vmem:[#allocation3 + $0xb8] sm:$0x3] %vm275_vm2, %v4675_v21  ;;  %v450_v36 = vadd.f32 %v420_v22, %v402_v8  ;;  %v407_v38 = vmul.f32 0.75, %v391_v29 }
  0x6e   : > { %660 = vst.msk [vmem:[#allocation2 + $0x49] sm:$0xff] %vm272_vm0, %v627_v39 }
  0x6f   : > { %354 = vst.msk [vmem:[#allocation3 + $0xd0] sm:$0x3] %vm275_vm2, %v4675_v21 }
  0x70   : > { %357 = vst.msk [vmem:[#allocation3 + $0xe8] sm:$0x3] %vm275_vm2, %v4675_v21 }
  0x71   : > { %360 = vst.msk [vmem:[#allocation3 + $0x100] sm:$0x3] %vm275_vm2, %v4675_v21 }
  0x72   : > { %363 = vst.msk [vmem:[#allocation3 + $0x118] sm:$0x3] %vm275_vm2, %v4675_v21 }
  0x73   : > { %366 = vst.msk [vmem:[#allocation3 + $0x130] sm:$0x3] %vm275_vm2, %v4675_v21 }
  0x74   : > { %v4961_v48 = vpop.permute.xlu2 %536  ;;  %369 = vst.msk [vmem:[#allocation3 + $0x148] sm:$0x3] %vm275_vm2, %v4675_v21 }
  0x75   : > { %372 = vst.msk [vmem:[#allocation3 + $0x160] sm:$0x3] %vm275_vm2, %v4675_v21  ;;  %v628_v23 = vsel %vm622_vm1, %v431_v10, %v4961_v48 }
  0x76   : > { %375 = vst.msk [vmem:[#allocation3 + $0x178] sm:$0x3] %vm275_vm2, %v4675_v21 }
  0x77   : > { %378 = vst.msk [vmem:[#allocation3 + $0x190] sm:$0x3] %vm275_vm2, %v4675_v21 }
  0x78   : > { %381 = vst.msk [vmem:[#allocation3 + $0x1a8] sm:$0x3] %vm275_vm2, %v4675_v21  ;;  %v433_v21 = vadd.f32 %v417_v4, %v403_v17 }
  0x79   : > { %661 = vst.msk [vmem:[#allocation2 + $0x51] sm:$0xff] %vm272_vm0, %v628_v23 }
  0x7c   : > { %v4988_v53 = vpop.permute.xlu2 %542 }
  0x7d   : > { %v631_v34 = vsel %vm622_vm1, %v432_v20, %v4988_v53  ;;  %v437_v53 = vadd.f32 %v421_v18, %v407_v38 }
  0x7e   : > { %664 = vst.msk [vmem:[#allocation2 + $0x79] sm:$0xff] %vm272_vm0, %v631_v34 }
  0x80   : > { %v5114_v62 = vld [vmem:[#allocation2 + $0x51] sm:$0xff] }
  0x83   : > { %v531_v43 = vpop.permute.xlu1 %530  ;;  %v527_v45 = vpop.permute.xlu0 %526 }
  0x84   : > { %v625_v46 = vsel %vm622_vm1, %v446_v42, %v531_v43  ;;  %v623_v47 = vsel %vm622_vm1, %v428_v44, %v527_v45  ;;  %v5015_v58 = vpop.permute.xlu2 %548  ;;  %v392_v43 = vld [vmem:[%s4867_s7 + $0x50] sm:$0xff]  ;;  %v393_v44 = vld [vmem:[%s4867_s7 + $0x58] sm:$0xff] }
  0x85   : > { %658 = vst.msk [vmem:[#allocation2 + $0x31] sm:$0xff] %vm272_vm0, %v625_v46  ;;  %v634_v45 = vsel %vm622_vm1, %v451_v32, %v5015_v58  ;;  %v435_v46 = vadd.f32 %v419_v11, %v405_v33  ;;  %v5109_v54 = vmul.f32 0.25, %v393_v44  ;;  %v424_v61 = vmul.f32 0.25, %v392_v43  ;;  %v394_v11 = vld [vmem:[%s4867_s7 + $0x60] sm:$0xff] }
  0x86   : > { %656 = vst.msk [vmem:[#allocation2 + $0x19] sm:$0xff] %vm272_vm0, %v623_v47  ;;  %v423_v47 = vmul.f32 0.25, %v391_v29  ;;  %v409_v10 = vmul.f32 0.75, %v393_v44  ;;  %v410_v32 = vmul.f32 0.75, %v394_v11 }
  0x87   : > { %667 = vst.msk [vmem:[#allocation2 + $0x99] sm:$0xff] %vm272_vm0, %v634_v45  ;;  %v455_v5 = vadd.f32 %v5109_v54, %v407_v38  ;;  %v397_v45 = vld [vmem:[%s4867_s7 + $0x78] sm:$0xff] }
  0x88   : > { %v453_v0 = vadd.f32 %v423_v47, %v405_v33  ;;  %v439_v20 = vadd.f32 %v423_v47, %v409_v10  ;;  %v411_v33 = vmul.f32 0.75, %v395_v9  ;;  %v445_v47 = vmul.f32 0.25, %v397_v45 }
  0x8a   : > { %v441_v34 = vadd.f32 %v5109_v54, %v411_v33 }
  0x8b   : > { %v4973_v49 = vpop.permute.xlu1 %532  ;;  %v4977_v50 = vpop.permute.xlu0 %528 }
  0x8c   : > { %v5011_v57 = vld [vmem:[#allocation2 + $0x31] sm:$0xff]  ;;  %v5041_v63 = vpop.permute.xlu2 %554  ;;  %v626_v25 = vsel %vm622_vm1, %v447_v13, %v4973_v49  ;;  %v624_v31 = vsel %vm622_vm1, %v429_v16, %v4977_v50  ;;  %v434_v49 = vadd.f32 %v418_v14, %v404_v27  ;;  %v408_v50 = vmul.f32 0.75, %v392_v43  ;;  %v5146_v16 = vld [vmem:[#allocation2 + $0x79] sm:$0xff] }
  0x8d   : > { %v4986_v52 = vld [vmem:[#allocation2 + $0x19] sm:$0xff]  ;;  %1017 = vrot.lane.b32.xlu0 %v5011_v57, %s4676_s8  ;;  %659 = vst.msk [vmem:[#allocation2 + $0x39] sm:$0xff] %vm272_vm0, %v626_v25  ;;  %v427_v13 = vmul.f32 0.25, %v395_v9  ;;  %v5142_v14 = vmul.f32 0.25, %v394_v11 }
  0x8e   : > { %1013 = vrot.lane.b32.xlu1 %v4986_v52, %s4676_s8  ;;  %657 = vst.msk [vmem:[#allocation2 + $0x21] sm:$0xff] %vm272_vm0, %v624_v31  ;;  %v438_v2 = vadd.f32 %v422_v28, %v408_v50  ;;  %v5161_v28 = vld [vmem:[#allocation2 + $0x49] sm:$0xff] }
  0x8f   : > { %v457_v18 = vadd.f32 %v427_v13, %v409_v10  ;;  %v456_v19 = vadd.f32 %v5142_v14, %v408_v50  ;;  %v396_v31 = vld [vmem:[%s4867_s7 + $0x70] sm:$0xff] }
  0x93   : > { %v5001_v55 = vpop.permute.xlu1 %540  ;;  %v5005_v56 = vpop.permute.xlu0 %538 }
  0x94   : > { %v5067_v15 = vpop.permute.xlu2 %560  ;;  %v630_v37 = vsel %vm622_vm1, %v449_v24, %v5001_v55  ;;  %v629_v39 = vsel %vm622_vm1, %v448_v26, %v5005_v56  ;;  %v637_v55 = vsel %vm622_vm1, %v452_v40, %v5041_v63  ;;  %v436_v56 = vadd.f32 %v420_v22, %v406_v41  ;;  %v5121_v1 = vld [vmem:[#allocation2 + $0x39] sm:$0xff] }
  0x95   : > { %663 = vst.msk [vmem:[#allocation2 + $0x69] sm:$0xff] %vm272_vm0, %v630_v37  ;;  %1023 = vrot.lane.b32.xlu0 %v5114_v62, %s4676_s8  ;;  %v5126_v3 = vld [vmem:[#allocation2 + $0x21] sm:$0xff]  ;;  %v640_v4 = vsel %vm622_vm1, %v437_v53, %v5067_v15  ;;  %v5176_v37 = vld [vmem:[#allocation2 + $0x99] sm:$0xff] }
  0x96   : > { %662 = vst.msk [vmem:[#allocation2 + $0x61] sm:$0xff] %vm272_vm0, %v629_v39  ;;  %1019 = vrot.lane.b32.xlu1 %v5121_v1, %s4676_s8  ;;  %1015 = vrot.lane.b32.xlu2 %v5126_v3, %s4676_s8 }
  0x97   : > { %670 = vst.msk [vmem:[#allocation2 + $0xc1] sm:$0xff] %vm272_vm0, %v637_v55 }
  0x98   : > { %673 = vst.msk [vmem:[#allocation2 + $0xe1] sm:$0xff] %vm272_vm0, %v640_v4 }
  0x9b   : > { %v5027_v59 = vpop.permute.xlu1 %546  ;;  %v5031_v60 = vpop.permute.xlu0 %544 }
  0x9c   : > { %v567_v42 = vpop.permute.xlu2 %566  ;;  %v633_v48 = vsel %vm622_vm1, %v450_v36, %v5027_v59  ;;  %v632_v51 = vsel %vm622_vm1, %v433_v21, %v5031_v60  ;;  %v440_v36 = vadd.f32 %v424_v61, %v410_v32  ;;  %v5181_v40 = vld [vmem:[#allocation2 + $0x69] sm:$0xff] }
  0x9d   : > { %666 = vst.msk [vmem:[#allocation2 + $0x91] sm:$0xff] %vm272_vm0, %v633_v48  ;;  %v643_v15 = vsel %vm622_vm1, %v438_v2, %v567_v42  ;;  %v5151_v22 = vld [vmem:[#allocation2 + $0x61] sm:$0xff]  ;;  %1029 = vrot.lane.b32.xlu0 %v5146_v16, %s4676_s8 }
  0x9e   : > { %665 = vst.msk [vmem:[#allocation2 + $0x81] sm:$0xff] %vm272_vm0, %v632_v51  ;;  %1025 = vrot.lane.b32.xlu1 %v5151_v22, %s4676_s8  ;;  %1021 = vrot.lane.b32.xlu2 %v5161_v28, %s4676_s8  ;;  %v459_v51 = vadd.f32 %v445_v47, %v411_v33 }
  0x9f   : > { %676 = vst.msk [vmem:[#allocation2 + $0x109] sm:$0xff] %vm272_vm0, %v643_v15 }
  0xa3   : > { %v5053_v6 = vpop.permute.xlu1 %552  ;;  %v5057_v7 = vpop.permute.xlu0 %550 }
  0xa4   : > { %v636_v59 = vsel %vm622_vm1, %v435_v46, %v5053_v6  ;;  %v635_v63 = vsel %vm622_vm1, %v434_v49, %v5057_v7  ;;  %v454_v7 = vadd.f32 %v424_v61, %v406_v41  ;;  %v573_v8 = vpop.permute.xlu2 %572  ;;  %v413_v46 = vmul.f32 0.75, %v397_v45  ;;  %v5196_v49 = vld [vmem:[#allocation2 + $0xc1] sm:$0xff]  ;;  %v5200_v54 = vld [vmem:[#allocation2 + $0x91] sm:$0xff] }
  0xa5   : > { %669 = vst.msk [vmem:[#allocation2 + $0xb1] sm:$0xff] %vm272_vm0, %v636_v59  ;;  %v646_v25 = vsel %vm622_vm1, %v457_v18, %v573_v8  ;;  %v5179_v38 = vld [vmem:[#allocation2 + $0x81] sm:$0xff]  ;;  %1035 = vrot.lane.b32.xlu0 %v5176_v37, %s4676_s8  ;;  %v412_v61 = vmul.f32 0.75, %v396_v31 }
  0xa6   : > { %668 = vst.msk [vmem:[#allocation2 + $0xa9] sm:$0xff] %vm272_vm0, %v635_v63  ;;  %1031 = vrot.lane.b32.xlu1 %v5179_v38, %s4676_s8  ;;  %1027 = vrot.lane.b32.xlu2 %v5181_v40, %s4676_s8  ;;  %v443_v50 = vadd.f32 %v427_v13, %v413_v46 }
  0xa7   : > { %679 = vst.msk [vmem:[#allocation2 + $0x129] sm:$0xff] %vm272_vm0, %v646_v25 }
  0xab   : > { %v559_v30 = vpop.permute.xlu1 %558  ;;  %v557_v35 = vpop.permute.xlu0 %556 }
  0xac   : > { %v639_v6 = vsel %vm622_vm1, %v436_v56, %v559_v30  ;;  %v638_v12 = vsel %vm622_vm1, %v453_v0, %v557_v35  ;;  %v579_v30 = vpop.permute.xlu2 %578  ;;  %v5172_v35 = vmul.f32 0.25, %v396_v31  ;;  %v442_v0 = vadd.f32 %v5142_v14, %v412_v61  ;;  %v5218_v4 = vld [vmem:[#allocation2 + $0xb1] sm:$0xff]  ;;  %v5289_v31 = vld [vmem:[#allocation2 + $0x3a] sm:$0xff] }
  0xad   : > { %672 = vst.msk [vmem:[#allocation2 + $0xd9] sm:$0xff] %vm272_vm0, %v639_v6  ;;  %v5198_v53 = vld [vmem:[#allocation2 + $0xa9] sm:$0xff]  ;;  %1041 = vrot.lane.b32.xlu0 %v5196_v49, %s4676_s8 }
  0xae   : > { %671 = vst.msk [vmem:[#allocation2 + $0xc9] sm:$0xff] %vm272_vm0, %v638_v12  ;;  %v458_v21 = vadd.f32 %v5172_v35, %v410_v32  ;;  %1037 = vrot.lane.b32.xlu1 %v5198_v53, %s4676_s8  ;;  %1033 = vrot.lane.b32.xlu2 %v5200_v54, %s4676_s8  ;;  %v5239_v8 = vld [vmem:[#allocation2 + $0x129] sm:$0xff]  ;;  %v460_v14 = vadd.f32 %v5172_v35, %v412_v61 }
  0xaf   : > { %v5293_v32 = vld [vmem:[#allocation2 + $0x22] sm:$0xff]  ;;  %v5330_v45 = vld [vmem:[#allocation2 + $0xaa] sm:$0xff] }
  0xb0   : > { %v649_v41 = vsel %vm622_vm1, %v458_v21, %v579_v30  ;;  %v753_v30 = vld [vmem:[#allocation2 + $0xa] sm:$0xff]  ;;  %v5300_v35 = vld [vmem:[#allocation2 + $0x62] sm:$0xff] }
  0xb1   : > { %682 = vst.msk [vmem:[#allocation2 + $0x151] sm:$0xff] %vm272_vm0, %v649_v41  ;;  %v5316_v41 = vld [vmem:[#allocation2 + $0x82] sm:$0xff] }
  0xb3   : > { %v565_v58 = vpop.permute.xlu1 %564  ;;  %v563_v60 = vpop.permute.xlu0 %562 }
  0xb4   : > { %v642_v17 = vsel %vm622_vm1, %v455_v5, %v565_v58  ;;  %v641_v23 = vsel %vm622_vm1, %v454_v7, %v563_v60  ;;  %v585_v48 = vpop.permute.xlu2 %584  ;;  %v5213_v60 = vld [vmem:[#allocation2 + $0xe1] sm:$0xff]  ;;  %v5227_v5 = vld [vmem:[#allocation2 + $0x109] sm:$0xff]  ;;  %v5231_v7 = vld [vmem:[#allocation2 + $0xd9] sm:$0xff] }
  0xb5   : > { %675 = vst.msk [vmem:[#allocation2 + $0xf9] sm:$0xff] %vm272_vm0, %v642_v17  ;;  %v652_v55 = vsel %vm622_vm1, %v443_v50, %v585_v48  ;;  %v5215_v63 = vld [vmem:[#allocation2 + $0xc9] sm:$0xff]  ;;  %1047 = vrot.lane.b32.xlu0 %v5213_v60, %s4676_s8  ;;  %v5338_v48 = vld [vmem:[#allocation2 + $0x7a] sm:$0xff] }
  0xb6   : > { %674 = vst.msk [vmem:[#allocation2 + $0xf1] sm:$0xff] %vm272_vm0, %v641_v23  ;;  %1043 = vrot.lane.b32.xlu1 %v5215_v63, %s4676_s8  ;;  %1039 = vrot.lane.b32.xlu2 %v5218_v4, %s4676_s8 }
  0xb7   : > { %685 = vst.msk [vmem:[#allocation2 + $0x171] sm:$0xff] %vm272_vm0, %v652_v55  ;;  %v5348_v55 = vld [vmem:[#allocation2 + $0xca] sm:$0xff] }
  0xb8   : > { %v5251_v11 = vld [vmem:[#allocation2 + $0x151] sm:$0xff] }
  0xbb   : > { %v571_v24 = vpop.permute.xlu1 %570  ;;  %v569_v26 = vpop.permute.xlu0 %568 }
  0xbc   : > { %v645_v27 = vsel %vm622_vm1, %v456_v19, %v571_v24  ;;  %v644_v29 = vsel %vm622_vm1, %v439_v20, %v569_v26  ;;  %v5243_v10 = vld [vmem:[#allocation2 + $0xf9] sm:$0xff]  ;;  %v461_v24 = vadd.f32 %v445_v47, %v413_v46  ;;  %v752_v26 = vld [vmem:[#allocation2 + $0x2] sm:$0xff]  ;;  %v5298_v33 = vpop.permute.xlu2 %1009 }
  0xbd   : > { %678 = vst.msk [vmem:[#allocation2 + $0x121] sm:$0xff] %vm272_vm0, %v645_v27  ;;  %v5229_v6 = vld [vmem:[#allocation2 + $0xf1] sm:$0xff]  ;;  %1053 = vrot.lane.b32.xlu0 %v5227_v5, %s4676_s8 }
  0xbe   : > { %677 = vst.msk [vmem:[#allocation2 + $0x111] sm:$0xff] %vm272_vm0, %v644_v29  ;;  %1049 = vrot.lane.b32.xlu1 %v5229_v6, %s4676_s8  ;;  %1045 = vrot.lane.b32.xlu2 %v5231_v7, %s4676_s8  ;;  %v5265_v18 = vld [vmem:[#allocation2 + $0x171] sm:$0xff]  ;;  %v5282_v29 = vld [vmem:[#allocation2 + $0x1a] sm:$0xff] }
  0xbf   : > { %8446 = vst [vmem:[#allocation4_spill] sm:$0xff] %v5298_v33  ;;  %v5334_v46 = vld [vmem:[#allocation2 + $0x92] sm:$0xff] }
  0xc3   : > { %v577_v39 = vpop.permute.xlu1 %576  ;;  %v575_v43 = vpop.permute.xlu0 %574 }
  0xc4   : > { %v648_v42 = vsel %vm622_vm1, %v441_v34, %v577_v39  ;;  %v647_v44 = vsel %vm622_vm1, %v440_v36, %v575_v43  ;;  %v5255_v13 = vld [vmem:[#allocation2 + $0x121] sm:$0xff]  ;;  %v5304_v34 = vld [vmem:[#allocation2 + $0x4a] sm:$0xff]  ;;  %v5306_v36 = vld [vmem:[#allocation2 + $0x32] sm:$0xff] }
  0xc5   : > { %681 = vst.msk [vmem:[#allocation2 + $0x141] sm:$0xff] %vm272_vm0, %v648_v42  ;;  %v5241_v9 = vld [vmem:[#allocation2 + $0x111] sm:$0xff]  ;;  %1059 = vrot.lane.b32.xlu0 %v5239_v8, %s4676_s8 }
  0xc6   : > { %680 = vst.msk [vmem:[#allocation2 + $0x139] sm:$0xff] %vm272_vm0, %v647_v44  ;;  %1055 = vrot.lane.b32.xlu1 %v5241_v9, %s4676_s8  ;;  %1051 = vrot.lane.b32.xlu2 %v5243_v10, %s4676_s8  ;;  %v5320_v42 = vld [vmem:[#allocation2 + $0x6a] sm:$0xff]  ;;  %v5322_v43 = vld [vmem:[#allocation2 + $0x52] sm:$0xff] }
  0xcb   : > { %v581_v56 = vpop.permute.xlu0 %580  ;;  %v583_v59 = vpop.permute.xlu1 %582 }
  0xcc   : > { %v650_v58 = vsel %vm622_vm1, %v459_v51, %v581_v56  ;;  %v651_v2 = vsel %vm622_vm1, %v442_v0, %v583_v59  ;;  %v5270_v20 = vld [vmem:[#allocation2 + $0x141] sm:$0xff]  ;;  %v5352_v56 = vld [vmem:[#allocation2 + $0xb2] sm:$0xff] }
  0xcd   : > { %683 = vst.msk [vmem:[#allocation2 + $0x159] sm:$0xff] %vm272_vm0, %v650_v58  ;;  %v5253_v12 = vld [vmem:[#allocation2 + $0x139] sm:$0xff]  ;;  %1065 = vrot.lane.b32.xlu0 %v5251_v11, %s4676_s8 }
  0xce   : > { %684 = vst.msk [vmem:[#allocation2 + $0x169] sm:$0xff] %vm272_vm0, %v651_v2  ;;  %1061 = vrot.lane.b32.xlu1 %v5253_v12, %s4676_s8  ;;  %1057 = vrot.lane.b32.xlu2 %v5255_v13, %s4676_s8  ;;  %v5354_v58 = vld [vmem:[#allocation2 + $0x9a] sm:$0xff]  ;;  %v5366_v2 = vld [vmem:[#allocation2 + $0xf2] sm:$0xff] }
  0xd3   : > { %v587_v15 = vpop.permute.xlu0 %586  ;;  %v589_v23 = vpop.permute.xlu1 %588 }
  0xd4   : > { %v653_v17 = vsel %vm622_vm1, %v460_v14, %v587_v15  ;;  %v5268_v19 = vld [vmem:[#allocation2 + $0x159] sm:$0xff]  ;;  %v654_v25 = vsel %vm622_vm1, %v461_v24, %v589_v23  ;;  %v5372_v15 = vld [vmem:[#allocation2 + $0xc2] sm:$0xff] }
  0xd5   : > { %686 = vst.msk [vmem:[#allocation2 + $0x181] sm:$0xff] %vm272_vm0, %v653_v17  ;;  %1071 = vrot.lane.b32.xlu0 %v5265_v18, %s4676_s8  ;;  %v5280_v27 = vld [vmem:[#allocation2 + $0x169] sm:$0xff]  ;;  %v5370_v14 = vld [vmem:[#allocation2 + $0xda] sm:$0xff] }
  0xd6   : > { %1067 = vrot.lane.b32.xlu1 %v5268_v19, %s4676_s8  ;;  %1063 = vrot.lane.b32.xlu2 %v5270_v20, %s4676_s8  ;;  %687 = vst.msk [vmem:[#allocation2 + $0x189] sm:$0xff] %vm272_vm0, %v654_v25  ;;  %v5384_v25 = vld [vmem:[#allocation2 + $0x112] sm:$0xff] }
  0xdb   : > { %v5314_v39 = vpop.permute.xlu0 %1011 }
  0xdc   : > { %8448 = vst [vmem:[#allocation6_spill] sm:$0xff] %v5314_v39  ;;  %v5441_v39 = vld [vmem:[#allocation2 + $0x152] sm:$0xff] }
  0xdd   : > { %1141 = vrot.lane.b32.xlu0 %v5282_v29, %s4677_s9 }
  0xde   : > { %1137 = vrot.lane.b32.xlu1 %v752_v26, %s4677_s9  ;;  %1069 = vrot.lane.b32.xlu2 %v5280_v27, %s4676_s8  ;;  %v5388_v26 = vld [vmem:[#allocation2 + $0xfa] sm:$0xff] }
  0xe5   : > { %1147 = vrot.lane.b32.xlu0 %v5289_v31, %s4677_s9 }
  0xe6   : > { %1143 = vrot.lane.b32.xlu1 %v5293_v32, %s4677_s9  ;;  %1139 = vrot.lane.b32.xlu2 %v753_v30, %s4677_s9  ;;  %v5390_v30 = vld [vmem:[#allocation2 + $0xe2] sm:$0xff] }
  0xed   : > { %1153 = vrot.lane.b32.xlu0 %v5300_v35, %s4677_s9 }
  0xee   : > { %1149 = vrot.lane.b32.xlu1 %v5304_v34, %s4677_s9  ;;  %1145 = vrot.lane.b32.xlu2 %v5306_v36, %s4677_s9 }
  0xf0   : > { %v5312_v21 = vpop.permute.xlu2 %1015 }
  0xf1   : > { %8447 = vst [vmem:[#allocation5_spill] sm:$0xff] %v5312_v21  ;;  %v690_v21 = vld [vmem:[#allocation2 + $0x18] sm:$0xff] }
  0xf5   : > { %1159 = vrot.lane.b32.xlu0 %v5316_v41, %s4677_s9 }
  0xf6   : > { %1155 = vrot.lane.b32.xlu1 %v5320_v42, %s4677_s9  ;;  %1151 = vrot.lane.b32.xlu2 %v5322_v43, %s4677_s9 }
  0xf8   : > { %v5328_v44 = vpop.permute.xlu2 %1021 }
  0xf9   : > { %8449 = vst [vmem:[#allocation7_spill] sm:$0xff] %v5328_v44  ;;  %v5420_v44 = vld [vmem:[#allocation2 + $0x15a] sm:$0xff] }
  0xfa   : > { %8465 = vst [vmem:[#allocation23_spill] sm:$0xff] %v5420_v44 }
  0xfd   : > { %1165 = vrot.lane.b32.xlu0 %v5330_v45, %s4677_s9 }
  0xfe   : > { %1161 = vrot.lane.b32.xlu1 %v5334_v46, %s4677_s9  ;;  %1157 = vrot.lane.b32.xlu2 %v5338_v48, %s4677_s9 }
  0xff   : > { %v5336_v47 = vpop.permute.xlu0 %1017 }
 0x100   : > { %8450 = vst [vmem:[#allocation8_spill] sm:$0xff] %v5336_v47  ;;  %v5342_v50 = vpop.permute.xlu1 %1013  ;;  %v5346_v51 = vpop.permute.xlu2 %1027  ;;  %v5426_v47 = vld [vmem:[#allocation2 + $0x12a] sm:$0xff] }
 0x101   : > { %8451 = vst [vmem:[#allocation9_spill] sm:$0xff] %v5342_v50  ;;  %v5439_v50 = vld [vmem:[#allocation2 + $0x16a] sm:$0xff] }
 0x102   : > { %8452 = vst [vmem:[#allocation10_spill] sm:$0xff] %v5346_v51  ;;  %v5402_v51 = vld [vmem:[#allocation2 + $0x13a] sm:$0xff] }
 0x103   : > { %8470 = vst [vmem:[#allocation28_spill] sm:$0xff] %v5439_v50 }
 0x105   : > { %1171 = vrot.lane.b32.xlu0 %v5348_v55, %s4677_s9 }
 0x106   : > { %1167 = vrot.lane.b32.xlu1 %v5352_v56, %s4677_s9  ;;  %1163 = vrot.lane.b32.xlu2 %v5354_v58, %s4677_s9 }
 0x107   : > { %v5360_v61 = vpop.permute.xlu0 %1023 }
 0x108   : > { %8453 = vst [vmem:[#allocation11_spill] sm:$0xff] %v5360_v61  ;;  %v5362_v59 = vpop.permute.xlu1 %1019  ;;  %v5364_v0 = vpop.permute.xlu2 %1033  ;;  %v5408_v61 = vld [vmem:[#allocation2 + $0x10a] sm:$0xff] }
 0x109   : > { %8454 = vst [vmem:[#allocation12_spill] sm:$0xff] %v5362_v59  ;;  %v5424_v59 = vld [vmem:[#allocation2 + $0x142] sm:$0xff] }
 0x10a   : > { %8455 = vst [vmem:[#allocation13_spill] sm:$0xff] %v5364_v0 }
 0x10b   : > { %8466 = vst [vmem:[#allocation24_spill] sm:$0xff] %v5424_v59 }
 0x10d   : > { %1177 = vrot.lane.b32.xlu0 %v5366_v2, %s4677_s9 }
 0x10e   : > { %1173 = vrot.lane.b32.xlu1 %v5370_v14, %s4677_s9  ;;  %1169 = vrot.lane.b32.xlu2 %v5372_v15, %s4677_s9 }
 0x10f   : > { %v5378_v17 = vpop.permute.xlu0 %1029 }
 0x110   : > { %8456 = vst [vmem:[#allocation14_spill] sm:$0xff] %v5378_v17  ;;  %v5380_v23 = vpop.permute.xlu1 %1025  ;;  %v5382_v24 = vpop.permute.xlu2 %1039 }
 0x111   : > { %8457 = vst [vmem:[#allocation15_spill] sm:$0xff] %v5380_v23  ;;  %v5406_v23 = vld [vmem:[#allocation2 + $0x122] sm:$0xff] }
 0x112   : > { %8458 = vst [vmem:[#allocation16_spill] sm:$0xff] %v5382_v24 }
 0x115   : > { %1183 = vrot.lane.b32.xlu0 %v5384_v25, %s4677_s9 }
 0x116   : > { %1179 = vrot.lane.b32.xlu1 %v5388_v26, %s4677_s9  ;;  %1175 = vrot.lane.b32.xlu2 %v5390_v30, %s4677_s9 }
 0x117   : > { %v5396_v0 = vpop.permute.xlu0 %1035 }
 0x118   : > { %8459 = vst [vmem:[#allocation17_spill] sm:$0xff] %v5396_v0  ;;  %v5398_v17 = vpop.permute.xlu1 %1031  ;;  %v5400_v24 = vpop.permute.xlu2 %1045 }
 0x119   : > { %8460 = vst [vmem:[#allocation18_spill] sm:$0xff] %v5398_v17 }
 0x11a   : > { %8461 = vst [vmem:[#allocation19_spill] sm:$0xff] %v5400_v24 }
 0x11d   : > { %1189 = vrot.lane.b32.xlu0 %v5402_v51, %s4677_s9 }
 0x11e   : > { %1185 = vrot.lane.b32.xlu1 %v5406_v23, %s4677_s9  ;;  %1181 = vrot.lane.b32.xlu2 %v5408_v61, %s4677_s9 }
 0x11f   : > { %v5414_v0 = vpop.permute.xlu0 %1041 }
 0x120   : > { %8462 = vst [vmem:[#allocation20_spill] sm:$0xff] %v5414_v0  ;;  %v5416_v17 = vpop.permute.xlu1 %1037  ;;  %v5418_v24 = vpop.permute.xlu2 %1051 }
 0x121   : > { %8463 = vst [vmem:[#allocation21_spill] sm:$0xff] %v5416_v17 }
 0x122   : > { %8464 = vst [vmem:[#allocation22_spill] sm:$0xff] %v5418_v24 }
 0x125   : > { %1195 = vrot.lane.b32.xlu0 %v5420_v44, %s4677_s9  ;;  %v694_v44 = vld [vmem:[#allocation2 + $0x48] sm:$0xff] }
 0x126   : > { %1191 = vrot.lane.b32.xlu1 %v5424_v59, %s4677_s9  ;;  %1187 = vrot.lane.b32.xlu2 %v5426_v47, %s4677_s9  ;;  %v691_v59 = vld [vmem:[#allocation2 + $0x20] sm:$0xff] }
 0x127   : > { %v5432_v0 = vpop.permute.xlu0 %1047 }
 0x128   : > { %8467 = vst [vmem:[#allocation25_spill] sm:$0xff] %v5432_v0  ;;  %v5434_v17 = vpop.permute.xlu1 %1043  ;;  %v5436_v24 = vpop.permute.xlu2 %1057 }
 0x129   : > { %8468 = vst [vmem:[#allocation26_spill] sm:$0xff] %v5434_v17 }
 0x12a   : > { %8469 = vst [vmem:[#allocation27_spill] sm:$0xff] %v5436_v24  ;;  %v5453_v24 = vld [vmem:[#allocation2 + $0x38] sm:$0xff] }
 0x12b   : > { %8474 = vst [vmem:[#allocation32_spill] sm:$0xff] %v5453_v24 }
 0x12d   : > { %1265 = vrot.lane.b32.xlu0 %v690_v21, %s4678_s10  ;;  %v5457_v21 = vld [vmem:[#allocation2 + $0x172] sm:$0xff] }
 0x12e   : > { %1197 = vrot.lane.b32.xlu1 %v5439_v50, %s4677_s9  ;;  %1193 = vrot.lane.b32.xlu2 %v5441_v39, %s4677_s9  ;;  %8475 = vst [vmem:[#allocation33_spill] sm:$0xff] %v5457_v21 }
 0x12f   : > { %v5447_v33 = vpop.permute.xlu0 %1053 }
 0x130   : > { %8471 = vst [vmem:[#allocation29_spill] sm:$0xff] %v5447_v33  ;;  %v5449_v0 = vpop.permute.xlu1 %1049  ;;  %v5451_v17 = vpop.permute.xlu2 %1063 }
 0x131   : > { %8472 = vst [vmem:[#allocation30_spill] sm:$0xff] %v5449_v0 }
 0x132   : > { %8473 = vst [vmem:[#allocation31_spill] sm:$0xff] %v5451_v17  ;;  %v5468_v17 = vld [vmem:[#allocation2 + $0x60] sm:$0xff] }
 0x133   : > { %8479 = vst [vmem:[#allocation37_spill] sm:$0xff] %v5468_v17 }
 0x135   : > { %1271 = vrot.lane.b32.xlu0 %v5453_v24, %s4678_s10  ;;  %v5472_v24 = vld [vmem:[#allocation2 + $0x30] sm:$0xff] }
 0x136   : > { %1267 = vrot.lane.b32.xlu1 %v691_v59, %s4678_s10  ;;  %1199 = vrot.lane.b32.xlu2 %v5457_v21, %s4677_s9  ;;  %8480 = vst [vmem:[#allocation38_spill] sm:$0xff] %v5472_v24  ;;  %v697_v21 = vld [vmem:[#allocation2 + $0x68] sm:$0xff] }
 0x137   : > { %v5462_v50 = vpop.permute.xlu0 %1059 }
 0x138   : > { %8476 = vst [vmem:[#allocation34_spill] sm:$0xff] %v5462_v50  ;;  %v5464_v33 = vpop.permute.xlu1 %1055  ;;  %v5466_v0 = vpop.permute.xlu2 %1069 }
 0x139   : > { %8477 = vst [vmem:[#allocation35_spill] sm:$0xff] %v5464_v33 }
 0x13a   : > { %8478 = vst [vmem:[#allocation36_spill] sm:$0xff] %v5466_v0  ;;  %v5483_v0 = vld [vmem:[#allocation2 + $0x80] sm:$0xff] }
 0x13b   : > { %8484 = vst [vmem:[#allocation42_spill] sm:$0xff] %v5483_v0 }
 0x13d   : > { %1277 = vrot.lane.b32.xlu0 %v5468_v17, %s4678_s10  ;;  %v5487_v17 = vld [vmem:[#allocation2 + $0x50] sm:$0xff] }
 0x13e   : > { %1273 = vrot.lane.b32.xlu1 %v694_v44, %s4678_s10  ;;  %1269 = vrot.lane.b32.xlu2 %v5472_v24, %s4678_s10  ;;  %8485 = vst [vmem:[#allocation43_spill] sm:$0xff] %v5487_v17  ;;  %v700_v24 = vld [vmem:[#allocation2 + $0x90] sm:$0xff] }
 0x13f   : > { %v5477_v59 = vpop.permute.xlu0 %1065 }
 0x140   : > { %8481 = vst [vmem:[#allocation39_spill] sm:$0xff] %v5477_v59  ;;  %v5479_v50 = vpop.permute.xlu1 %1061  ;;  %v5481_v33 = vpop.permute.xlu2 %1139 }
 0x141   : > { %8482 = vst [vmem:[#allocation40_spill] sm:$0xff] %v5479_v50 }
 0x142   : > { %8483 = vst [vmem:[#allocation41_spill] sm:$0xff] %v5481_v33  ;;  %v5498_v33 = vld [vmem:[#allocation2 + $0xa8] sm:$0xff] }
 0x143   : > { %8489 = vst [vmem:[#allocation47_spill] sm:$0xff] %v5498_v33 }
 0x145   : > { %1283 = vrot.lane.b32.xlu0 %v5483_v0, %s4678_s10  ;;  %v5502_v0 = vld [vmem:[#allocation2 + $0x78] sm:$0xff] }
 0x146   : > { %1279 = vrot.lane.b32.xlu1 %v697_v21, %s4678_s10  ;;  %1275 = vrot.lane.b32.xlu2 %v5487_v17, %s4678_s10  ;;  %8490 = vst [vmem:[#allocation48_spill] sm:$0xff] %v5502_v0  ;;  %v703_v17 = vld [vmem:[#allocation2 + $0xb0] sm:$0xff] }
 0x147   : > { %v5492_v44 = vpop.permute.xlu0 %1071 }
 0x148   : > { %8486 = vst [vmem:[#allocation44_spill] sm:$0xff] %v5492_v44  ;;  %v5494_v59 = vpop.permute.xlu1 %1067  ;;  %v5496_v50 = vpop.permute.xlu2 %1145 }
 0x149   : > { %8487 = vst [vmem:[#allocation45_spill] sm:$0xff] %v5494_v59 }
 0x14a   : > { %8488 = vst [vmem:[#allocation46_spill] sm:$0xff] %v5496_v50  ;;  %v5513_v50 = vld [vmem:[#allocation2 + $0xc8] sm:$0xff] }
 0x14b   : > { %8494 = vst [vmem:[#allocation52_spill] sm:$0xff] %v5513_v50 }
 0x14d   : > { %1289 = vrot.lane.b32.xlu0 %v5498_v33, %s4678_s10  ;;  %v5517_v33 = vld [vmem:[#allocation2 + $0x98] sm:$0xff] }
 0x14e   : > { %1285 = vrot.lane.b32.xlu1 %v700_v24, %s4678_s10  ;;  %1281 = vrot.lane.b32.xlu2 %v5502_v0, %s4678_s10  ;;  %8495 = vst [vmem:[#allocation53_spill] sm:$0xff] %v5517_v33  ;;  %v706_v0 = vld [vmem:[#allocation2 + $0xd8] sm:$0xff] }
 0x14f   : > { %v5507_v21 = vpop.permute.xlu0 %1141 }
 0x150   : > { %8491 = vst [vmem:[#allocation49_spill] sm:$0xff] %v5507_v21  ;;  %v5509_v44 = vpop.permute.xlu1 %1137  ;;  %v5511_v59 = vpop.permute.xlu2 %1151 }
 0x151   : > { %8492 = vst [vmem:[#allocation50_spill] sm:$0xff] %v5509_v44 }
 0x152   : > { %8493 = vst [vmem:[#allocation51_spill] sm:$0xff] %v5511_v59  ;;  %v5528_v59 = vld [vmem:[#allocation2 + $0xf0] sm:$0xff] }
 0x153   : > { %8499 = vst [vmem:[#allocation57_spill] sm:$0xff] %v5528_v59 }
 0x155   : > { %1295 = vrot.lane.b32.xlu0 %v5513_v50, %s4678_s10  ;;  %v5532_v50 = vld [vmem:[#allocation2 + $0xc0] sm:$0xff] }
 0x156   : > { %1291 = vrot.lane.b32.xlu1 %v703_v17, %s4678_s10  ;;  %1287 = vrot.lane.b32.xlu2 %v5517_v33, %s4678_s10  ;;  %8500 = vst [vmem:[#allocation58_spill] sm:$0xff] %v5532_v50  ;;  %v5545_v33 = vld [vmem:[#allocation2 + $0xf8] sm:$0xff] }
 0x157   : > { %v5522_v24 = vpop.permute.xlu0 %1147  ;;  %8505 = vst [vmem:[#allocation63_spill] sm:$0xff] %v5545_v33 }
 0x158   : > { %8496 = vst [vmem:[#allocation54_spill] sm:$0xff] %v5522_v24  ;;  %v5524_v21 = vpop.permute.xlu1 %1143  ;;  %v5526_v44 = vpop.permute.xlu2 %1157 }
 0x159   : > { %8497 = vst [vmem:[#allocation55_spill] sm:$0xff] %v5524_v21 }
 0x15a   : > { %8498 = vst [vmem:[#allocation56_spill] sm:$0xff] %v5526_v44  ;;  %v5543_v44 = vld [vmem:[#allocation2 + $0x110] sm:$0xff] }
 0x15b   : > { %8504 = vst [vmem:[#allocation62_spill] sm:$0xff] %v5543_v44 }
 0x15d   : > { %1301 = vrot.lane.b32.xlu0 %v5528_v59, %s4678_s10  ;;  %v5549_v59 = vld [vmem:[#allocation2 + $0xe0] sm:$0xff] }
 0x15e   : > { %1297 = vrot.lane.b32.xlu1 %v706_v0, %s4678_s10  ;;  %1293 = vrot.lane.b32.xlu2 %v5532_v50, %s4678_s10  ;;  %8506 = vst [vmem:[#allocation64_spill] sm:$0xff] %v5549_v59  ;;  %v5563_v50 = vld [vmem:[#allocation2 + $0x120] sm:$0xff] }
 0x15f   : > { %v5537_v17 = vpop.permute.xlu0 %1153  ;;  %8511 = vst [vmem:[#allocation69_spill] sm:$0xff] %v5563_v50 }
 0x160   : > { %8501 = vst [vmem:[#allocation59_spill] sm:$0xff] %v5537_v17  ;;  %v5539_v24 = vpop.permute.xlu1 %1149  ;;  %v5541_v21 = vpop.permute.xlu2 %1163 }
 0x161   : > { %8502 = vst [vmem:[#allocation60_spill] sm:$0xff] %v5539_v24  ;;  %v5561_v24 = vld [vmem:[#allocation2 + $0x138] sm:$0xff] }
 0x162   : > { %8503 = vst [vmem:[#allocation61_spill] sm:$0xff] %v5541_v21 }
 0x163   : > { %8510 = vst [vmem:[#allocation68_spill] sm:$0xff] %v5561_v24 }
 0x165   : > { %1307 = vrot.lane.b32.xlu0 %v5543_v44, %s4678_s10  ;;  %v5567_v44 = vld [vmem:[#allocation2 + $0x108] sm:$0xff] }
 0x166   : > { %1303 = vrot.lane.b32.xlu1 %v5545_v33, %s4678_s10  ;;  %1299 = vrot.lane.b32.xlu2 %v5549_v59, %s4678_s10  ;;  %8512 = vst [vmem:[#allocation70_spill] sm:$0xff] %v5567_v44  ;;  %v5579_v33 = vld [vmem:[#allocation2 + $0x158] sm:$0xff]  ;;  %v5581_v59 = vld [vmem:[#allocation2 + $0x140] sm:$0xff] }
 0x167   : > { %v5555_v0 = vpop.permute.xlu0 %1159  ;;  %8516 = vst [vmem:[#allocation74_spill] sm:$0xff] %v5579_v33 }
 0x168   : > { %8507 = vst [vmem:[#allocation65_spill] sm:$0xff] %v5555_v0  ;;  %v5557_v17 = vpop.permute.xlu1 %1155  ;;  %v5559_v21 = vpop.permute.xlu2 %1169 }
 0x169   : > { %8508 = vst [vmem:[#allocation66_spill] sm:$0xff] %v5557_v17 }
 0x16a   : > { %8509 = vst [vmem:[#allocation67_spill] sm:$0xff] %v5559_v21 }
 0x16b   : > { %8517 = vst [vmem:[#allocation75_spill] sm:$0xff] %v5581_v59 }
 0x16d   : > { %1313 = vrot.lane.b32.xlu0 %v5561_v24, %s4678_s10  ;;  %v5585_v24 = vld [vmem:[#allocation2 + $0x128] sm:$0xff] }
 0x16e   : > { %1309 = vrot.lane.b32.xlu1 %v5563_v50, %s4678_s10  ;;  %1305 = vrot.lane.b32.xlu2 %v5567_v44, %s4678_s10  ;;  %v5597_v50 = vld [vmem:[#allocation2 + $0x180] sm:$0xff]  ;;  %v5599_v44 = vld [vmem:[#allocation2 + $0x168] sm:$0xff] }
 0x16f   : > { %v5573_v0 = vpop.permute.xlu0 %1165  ;;  %8521 = vst [vmem:[#allocation79_spill] sm:$0xff] %v5597_v50 }
 0x170   : > { %8513 = vst [vmem:[#allocation71_spill] sm:$0xff] %v5573_v0  ;;  %v5575_v17 = vpop.permute.xlu1 %1161  ;;  %v5577_v21 = vpop.permute.xlu2 %1175 }
 0x171   : > { %8514 = vst [vmem:[#allocation72_spill] sm:$0xff] %v5575_v17 }
 0x172   : > { %8515 = vst [vmem:[#allocation73_spill] sm:$0xff] %v5577_v21 }
 0x173   : > { %8522 = vst [vmem:[#allocation80_spill] sm:$0xff] %v5599_v44 }
 0x175   : > { %1319 = vrot.lane.b32.xlu0 %v5579_v33, %s4678_s10  ;;  %v5603_v33 = vld [vmem:[#allocation2 + $0x150] sm:$0xff] }
 0x176   : > { %1315 = vrot.lane.b32.xlu1 %v5581_v59, %s4678_s10  ;;  %1311 = vrot.lane.b32.xlu2 %v5585_v24, %s4678_s10  ;;  %v5617_v59 = vld [vmem:[#allocation2 + $0x188] sm:$0xff] }
 0x177   : > { %v5591_v0 = vpop.permute.xlu0 %1171  ;;  %8526 = vst [vmem:[#allocation84_spill] sm:$0xff] %v5617_v59 }
 0x178   : > { %8518 = vst [vmem:[#allocation76_spill] sm:$0xff] %v5591_v0  ;;  %v5593_v17 = vpop.permute.xlu1 %1167  ;;  %v5595_v21 = vpop.permute.xlu2 %1181 }
 0x179   : > { %8519 = vst [vmem:[#allocation77_spill] sm:$0xff] %v5593_v17 }
 0x17a   : > { %8520 = vst [vmem:[#allocation78_spill] sm:$0xff] %v5595_v21 }
 0x17d   : > { %1325 = vrot.lane.b32.xlu0 %v5597_v50, %s4678_s10  ;;  %v5619_v50 = vld [vmem:[#allocation2 + $0x170] sm:$0xff] }
 0x17e   : > { %1321 = vrot.lane.b32.xlu1 %v5599_v44, %s4678_s10  ;;  %1317 = vrot.lane.b32.xlu2 %v5603_v33, %s4678_s10 }
 0x17f   : > { %v5609_v0 = vpop.permute.xlu0 %1177 }
 0x180   : > { %8523 = vst [vmem:[#allocation81_spill] sm:$0xff] %v5609_v0  ;;  %v5611_v17 = vpop.permute.xlu1 %1173  ;;  %v5613_v21 = vpop.permute.xlu2 %1187 }
 0x181   : > { %8524 = vst [vmem:[#allocation82_spill] sm:$0xff] %v5611_v17 }
 0x182   : > { %8525 = vst [vmem:[#allocation83_spill] sm:$0xff] %v5613_v21 }
 0x185   : > { %1395 = vrot.lane.b32.xlu0 %v5126_v3, %s4679_s11 }
 0x186   : > { %1327 = vrot.lane.b32.xlu1 %v5617_v59, %s4678_s10  ;;  %1323 = vrot.lane.b32.xlu2 %v5619_v50, %s4678_s10 }
 0x187   : > { %v5625_v44 = vpop.permute.xlu0 %1183 }
 0x188   : > { %8527 = vst [vmem:[#allocation85_spill] sm:$0xff] %v5625_v44  ;;  %v5627_v0 = vpop.permute.xlu1 %1179  ;;  %v5629_v17 = vpop.permute.xlu2 %1193  ;;  %v912_v44 = vld [vmem:[#allocation2 + $0x1a0] sm:$0xff] }
 0x189   : > { %8528 = vst [vmem:[#allocation86_spill] sm:$0xff] %v5627_v0  ;;  %v936_v0 = vld [vmem:[#allocation2 + $0x141] sm:$0xff] }
 0x18a   : > { %8529 = vst [vmem:[#allocation87_spill] sm:$0xff] %v5629_v17 }
 0x18d   : > { %1401 = vrot.lane.b32.xlu0 %v5161_v28, %s4679_s11 }
 0x18e   : > { %1397 = vrot.lane.b32.xlu1 %v5011_v57, %s4679_s11  ;;  %1393 = vrot.lane.b32.xlu2 %v4986_v52, %s4679_s11 }
 0x18f   : > { %v5637_v3 = vpop.permute.xlu0 %1189 }
 0x190   : > { %8530 = vst [vmem:[#allocation88_spill] sm:$0xff] %v5637_v3  ;;  %v5639_v21 = vpop.permute.xlu1 %1185  ;;  %v5641_v59 = vpop.permute.xlu2 %1199 }
 0x191   : > { %8531 = vst [vmem:[#allocation89_spill] sm:$0xff] %v5639_v21  ;;  %v8599_v21 = vld [vmem:[#allocation62_spill] sm:$0xff] }
 0x192   : > { %8532 = vst [vmem:[#allocation90_spill] sm:$0xff] %v5641_v59  ;;  %v5739_v59 = vld [vmem:[#allocation2 + $0x189] sm:$0xff] }
 0x195   : > { %1407 = vrot.lane.b32.xlu0 %v5181_v40, %s4679_s11 }
 0x196   : > { %1403 = vrot.lane.b32.xlu1 %v5114_v62, %s4679_s11  ;;  %1399 = vrot.lane.b32.xlu2 %v5121_v1, %s4679_s11 }
 0x197   : > { %v5649_v28 = vpop.permute.xlu0 %1195 }
 0x198   : > { %8533 = vst [vmem:[#allocation91_spill] sm:$0xff] %v5649_v28  ;;  %v5651_v57 = vpop.permute.xlu1 %1191  ;;  %v5653_v52 = vpop.permute.xlu2 %1269 }
 0x199   : > { %8534 = vst [vmem:[#allocation92_spill] sm:$0xff] %v5651_v57  ;;  %v5891_v57 = vld [vmem:[#allocation2 + $0x18a] sm:$0xff] }
 0x19d   : > { %1413 = vrot.lane.b32.xlu0 %v5200_v54, %s4679_s11 }
 0x19e   : > { %1409 = vrot.lane.b32.xlu1 %v5146_v16, %s4679_s11  ;;  %1405 = vrot.lane.b32.xlu2 %v5151_v22, %s4679_s11 }
 0x19f   : > { %v5661_v40 = vpop.permute.xlu0 %1265 }
 0x1a0   : > { %v5663_v62 = vpop.permute.xlu1 %1197  ;;  %v5665_v1 = vpop.permute.xlu2 %1275 }
 0x1a1   : > { %8535 = vst [vmem:[#allocation93_spill] sm:$0xff] %v5663_v62  ;;  %v5755_v62 = vld [vmem:[#allocation2 + $0x181] sm:$0xff] }
 0x1a5   : > { %1419 = vrot.lane.b32.xlu0 %v5218_v4, %s4679_s11 }
 0x1a6   : > { %1415 = vrot.lane.b32.xlu1 %v5176_v37, %s4679_s11  ;;  %1411 = vrot.lane.b32.xlu2 %v5179_v38, %s4679_s11 }
 0x1a7   : > { %v5673_v54 = vpop.permute.xlu0 %1271 }
 0x1a8   : > { %v5675_v16 = vpop.permute.xlu1 %1267  ;;  %v5677_v22 = vpop.permute.xlu2 %1281 }
 0x1a9   : > { %8536 = vst [vmem:[#allocation94_spill] sm:$0xff] %v5677_v22  ;;  %v965_v22 = vld [vmem:[#allocation2 + $0x122] sm:$0xff] }
 0x1ad   : > { %1425 = vrot.lane.b32.xlu0 %v5231_v7, %s4679_s11 }
 0x1ae   : > { %1421 = vrot.lane.b32.xlu1 %v5196_v49, %s4679_s11  ;;  %1417 = vrot.lane.b32.xlu2 %v5198_v53, %s4679_s11 }
 0x1af   : > { %v5685_v4 = vpop.permute.xlu0 %1277 }
 0x1b0   : > { %v5687_v37 = vpop.permute.xlu1 %1273  ;;  %v5689_v38 = vpop.permute.xlu2 %1287 }
 0x1b1   : > { %8537 = vst [vmem:[#allocation95_spill] sm:$0xff] %v5689_v38 }
 0x1b5   : > { %1431 = vrot.lane.b32.xlu0 %v5243_v10, %s4679_s11 }
 0x1b6   : > { %1427 = vrot.lane.b32.xlu1 %v5213_v60, %s4679_s11  ;;  %1423 = vrot.lane.b32.xlu2 %v5215_v63, %s4679_s11 }
 0x1b7   : > { %v5697_v7 = vpop.permute.xlu0 %1283 }
 0x1b8   : > { %8538 = vst [vmem:[#allocation96_spill] sm:$0xff] %v5697_v7  ;;  %v5699_v49 = vpop.permute.xlu1 %1279  ;;  %v5701_v53 = vpop.permute.xlu2 %1293  ;;  %v933_v7 = vld [vmem:[#allocation2 + $0x121] sm:$0xff] }
 0x1b9   : > { %8539 = vst [vmem:[#allocation97_spill] sm:$0xff] %v5701_v53  ;;  %v8581_v53 = vld [vmem:[#allocation48_spill] sm:$0xff] }
 0x1bd   : > { %1437 = vrot.lane.b32.xlu0 %v5255_v13, %s4679_s11 }
 0x1be   : > { %1433 = vrot.lane.b32.xlu1 %v5227_v5, %s4679_s11  ;;  %1429 = vrot.lane.b32.xlu2 %v5229_v6, %s4679_s11 }
 0x1bf   : > { %v5709_v10 = vpop.permute.xlu0 %1289 }
 0x1c0   : > { %8540 = vst [vmem:[#allocation98_spill] sm:$0xff] %v5709_v10  ;;  %v5711_v60 = vpop.permute.xlu1 %1285  ;;  %v5713_v63 = vpop.permute.xlu2 %1299  ;;  %v8596_v10 = vld [vmem:[#allocation57_spill] sm:$0xff] }
 0x1c1   : > { %8541 = vst [vmem:[#allocation99_spill] sm:$0xff] %v5711_v60  ;;  %v929_v60 = vld [vmem:[#allocation2 + $0xf1] sm:$0xff] }
 0x1c5   : > { %1443 = vrot.lane.b32.xlu0 %v5270_v20, %s4679_s11 }
 0x1c6   : > { %1439 = vrot.lane.b32.xlu1 %v5239_v8, %s4679_s11  ;;  %1435 = vrot.lane.b32.xlu2 %v5241_v9, %s4679_s11 }
 0x1c7   : > { %v5721_v13 = vpop.permute.xlu0 %1295 }
 0x1c8   : > { %8542 = vst [vmem:[#allocation100_spill] sm:$0xff] %v5721_v13  ;;  %v5723_v5 = vpop.permute.xlu1 %1291  ;;  %v5725_v6 = vpop.permute.xlu2 %1305  ;;  %v8576_v13 = vld [vmem:[#allocation43_spill] sm:$0xff] }
 0x1c9   : > { %8543 = vst [vmem:[#allocation101_spill] sm:$0xff] %v5723_v5  ;;  %v8590_v5 = vld [vmem:[#allocation47_spill] sm:$0xff] }
 0x1ca   : > { %8544 = vst [vmem:[#allocation102_spill] sm:$0xff] %v5725_v6  ;;  %v958_v6 = vld [vmem:[#allocation2 + $0xca] sm:$0xff] }
 0x1cd   : > { %1449 = vrot.lane.b32.xlu0 %v5280_v27, %s4679_s11 }
 0x1ce   : > { %1445 = vrot.lane.b32.xlu1 %v5251_v11, %s4679_s11  ;;  %1441 = vrot.lane.b32.xlu2 %v5253_v12, %s4679_s11 }
 0x1cf   : > { %v5733_v20 = vpop.permute.xlu0 %1301 }
 0x1d0   : > { %v5735_v8 = vpop.permute.xlu1 %1297  ;;  %v5737_v9 = vpop.permute.xlu2 %1311 }
 0x1d1   : > { %8545 = vst [vmem:[#allocation103_spill] sm:$0xff] %v5737_v9 }
 0x1d5   : > { %1455 = vrot.lane.b32.xlu0 %v5739_v59, %s4679_s11 }
 0x1d6   : > { %1451 = vrot.lane.b32.xlu1 %v5265_v18, %s4679_s11  ;;  %1447 = vrot.lane.b32.xlu2 %v5268_v19, %s4679_s11 }
 0x1d7   : > { %v5747_v11 = vpop.permute.xlu0 %1307 }
 0x1d8   : > { %8546 = vst [vmem:[#allocation104_spill] sm:$0xff] %v5747_v11  ;;  %v5749_v12 = vpop.permute.xlu1 %1303  ;;  %v5751_v27 = vpop.permute.xlu2 %1317  ;;  %v935_v11 = vld [vmem:[#allocation2 + $0x139] sm:$0xff] }
 0x1d9   : > { %8547 = vst [vmem:[#allocation105_spill] sm:$0xff] %v5751_v27 }
 0x1dd   : > { %1525 = vrot.lane.b32.xlu0 %v5306_v36, %s4680_s12 }
 0x1de   : > { %1521 = vrot.lane.b32.xlu1 %v5282_v29, %s4680_s12  ;;  %1453 = vrot.lane.b32.xlu2 %v5755_v62, %s4679_s11 }
 0x1df   : > { %v5761_v18 = vpop.permute.xlu0 %1313 }
 0x1e0   : > { %8548 = vst [vmem:[#allocation106_spill] sm:$0xff] %v5761_v18  ;;  %v5763_v19 = vpop.permute.xlu1 %1309  ;;  %v5765_v28 = vpop.permute.xlu2 %1323  ;;  %v895_v18 = vld [vmem:[#allocation2 + $0xd8] sm:$0xff] }
 0x1e1   : > { %8549 = vst [vmem:[#allocation107_spill] sm:$0xff] %v5763_v19  ;;  %v922_v19 = vld [vmem:[#allocation2 + $0x99] sm:$0xff] }
 0x1e2   : > { %8550 = vst [vmem:[#allocation108_spill] sm:$0xff] %v5765_v28 }
 0x1e5   : > { %1531 = vrot.lane.b32.xlu0 %v5322_v43, %s4680_s12 }
 0x1e6   : > { %1527 = vrot.lane.b32.xlu1 %v5289_v31, %s4680_s12  ;;  %1523 = vrot.lane.b32.xlu2 %v5293_v32, %s4680_s12 }
 0x1e7   : > { %v5773_v36 = vpop.permute.xlu0 %1319 }
 0x1e8   : > { %8551 = vst [vmem:[#allocation109_spill] sm:$0xff] %v5773_v36  ;;  %v5775_v29 = vpop.permute.xlu1 %1315  ;;  %v5777_v17 = vpop.permute.xlu2 %1393 }
 0x1e9   : > { %8552 = vst [vmem:[#allocation110_spill] sm:$0xff] %v5775_v29  ;;  %v886_v29 = vld [vmem:[#allocation2 + $0x68] sm:$0xff] }
 0x1ed   : > { %1537 = vrot.lane.b32.xlu0 %v5338_v48, %s4680_s12 }
 0x1ee   : > { %1533 = vrot.lane.b32.xlu1 %v5300_v35, %s4680_s12  ;;  %1529 = vrot.lane.b32.xlu2 %v5304_v34, %s4680_s12 }
 0x1ef   : > { %v5785_v43 = vpop.permute.xlu0 %1325 }
 0x1f0   : > { %8553 = vst [vmem:[#allocation111_spill] sm:$0xff] %v5785_v43  ;;  %v5787_v31 = vpop.permute.xlu1 %1321  ;;  %v5789_v32 = vpop.permute.xlu2 %1399  ;;  %v8567_v43 = vld [vmem:[#allocation23_spill] sm:$0xff] }
 0x1f1   : > { %8554 = vst [vmem:[#allocation112_spill] sm:$0xff] %v5787_v31  ;;  %v8571_v31 = vld [vmem:[#allocation38_spill] sm:$0xff] }
 0x1f5   : > { %1543 = vrot.lane.b32.xlu0 %v5354_v58, %s4680_s12 }
 0x1f6   : > { %1539 = vrot.lane.b32.xlu1 %v5316_v41, %s4680_s12  ;;  %1535 = vrot.lane.b32.xlu2 %v5320_v42, %s4680_s12 }
 0x1f7   : > { %v5797_v48 = vpop.permute.xlu0 %1395 }
 0x1f8   : > { %v5799_v35 = vpop.permute.xlu1 %1327  ;;  %v5801_v34 = vpop.permute.xlu2 %1405 }
 0x1f9   : > { %8555 = vst [vmem:[#allocation113_spill] sm:$0xff] %v5799_v35  ;;  %v8566_v35 = vld [vmem:[#allocation33_spill] sm:$0xff] }
 0x1fd   : > { %1549 = vrot.lane.b32.xlu0 %v5372_v15, %s4680_s12 }
 0x1fe   : > { %1545 = vrot.lane.b32.xlu1 %v5330_v45, %s4680_s12  ;;  %1541 = vrot.lane.b32.xlu2 %v5334_v46, %s4680_s12 }
 0x1ff   : > { %v5809_v58 = vpop.permute.xlu0 %1401 }
 0x200   : > { %v5811_v41 = vpop.permute.xlu1 %1397  ;;  %v5813_v42 = vpop.permute.xlu2 %1411 }
 0x201   : > { %8556 = vst [vmem:[#allocation114_spill] sm:$0xff] %v5813_v42  ;;  %v928_v42 = vld [vmem:[#allocation2 + $0xe1] sm:$0xff] }
 0x205   : > { %1555 = vrot.lane.b32.xlu0 %v5390_v30, %s4680_s12 }
 0x206   : > { %1551 = vrot.lane.b32.xlu1 %v5348_v55, %s4680_s12  ;;  %1547 = vrot.lane.b32.xlu2 %v5352_v56, %s4680_s12 }
 0x207   : > { %v5821_v15 = vpop.permute.xlu0 %1407 }
 0x208   : > { %8557 = vst [vmem:[#allocation115_spill] sm:$0xff] %v5821_v15  ;;  %v5823_v45 = vpop.permute.xlu1 %1403  ;;  %v5825_v46 = vpop.permute.xlu2 %1417  ;;  %v8669_v15 = vld [vmem:[#allocation4_spill] sm:$0xff] }
 0x209   : > { %8558 = vst [vmem:[#allocation116_spill] sm:$0xff] %v5825_v46  ;;  %v8595_v46 = vld [vmem:[#allocation70_spill] sm:$0xff] }
 0x20d   : > { %1561 = vrot.lane.b32.xlu0 %v5408_v61, %s4680_s12 }
 0x20e   : > { %1557 = vrot.lane.b32.xlu1 %v5366_v2, %s4680_s12  ;;  %1553 = vrot.lane.b32.xlu2 %v5370_v14, %s4680_s12 }
 0x20f   : > { %v5833_v30 = vpop.permute.xlu0 %1413 }
 0x210   : > { %8559 = vst [vmem:[#allocation117_spill] sm:$0xff] %v5833_v30  ;;  %v5835_v55 = vpop.permute.xlu1 %1409  ;;  %v5837_v56 = vpop.permute.xlu2 %1423  ;;  %v918_v30 = vld [vmem:[#allocation2 + $0x69] sm:$0xff] }
 0x211   : > { %8560 = vst [vmem:[#allocation118_spill] sm:$0xff] %v5835_v55  ;;  %v962_v55 = vld [vmem:[#allocation2 + $0xfa] sm:$0xff] }
 0x212   : > { %8561 = vst [vmem:[#allocation119_spill] sm:$0xff] %v5837_v56  ;;  %v5877_v56 = vld [vmem:[#allocation2 + $0x182] sm:$0xff] }
 0x215   : > { %1567 = vrot.lane.b32.xlu0 %v5426_v47, %s4680_s12 }
 0x216   : > { %1563 = vrot.lane.b32.xlu1 %v5384_v25, %s4680_s12  ;;  %1559 = vrot.lane.b32.xlu2 %v5388_v26, %s4680_s12 }
 0x217   : > { %v5845_v61 = vpop.permute.xlu0 %1419 }
 0x218   : > { %8562 = vst [vmem:[#allocation120_spill] sm:$0xff] %v5845_v61  ;;  %v5847_v2 = vpop.permute.xlu1 %1415  ;;  %v5849_v14 = vpop.permute.xlu2 %1429 }
 0x219   : > { %8563 = vst [vmem:[#allocation121_spill] sm:$0xff] %v5847_v2 }
 0x21d   : > { %1573 = vrot.lane.b32.xlu0 %v5441_v39, %s4680_s12  ;;  %v8568_v39 = vld [vmem:[#allocation24_spill] sm:$0xff] }
 0x21e   : > { %1569 = vrot.lane.b32.xlu1 %v5402_v51, %s4680_s12  ;;  %1565 = vrot.lane.b32.xlu2 %v5406_v23, %s4680_s12 }
 0x21f   : > { %v5857_v47 = vpop.permute.xlu0 %1425 }
 0x220   : > { %v5859_v25 = vpop.permute.xlu1 %1421  ;;  %v5861_v26 = vpop.permute.xlu2 %1435 }
 0x221   : > { %8564 = vst [vmem:[#allocation122_spill] sm:$0xff] %v5859_v25 }
 0x222   : > { %8565 = vst [vmem:[#allocation123_spill] sm:$0xff] %v5861_v26  ;;  %v930_v26 = vld [vmem:[#allocation2 + $0xf9] sm:$0xff] }
 0x225   : > { %1579 = vrot.lane.b32.xlu0 %v8566_v35, %s4680_s12 }
 0x226   : > { %1575 = vrot.lane.b32.xlu1 %v8567_v43, %s4680_s12  ;;  %1571 = vrot.lane.b32.xlu2 %v8568_v39, %s4680_s12  ;;  %v8572_v43 = vld [vmem:[#allocation28_spill] sm:$0xff] }
 0x227   : > { %v5869_v28 = vpop.permute.xlu0 %1431 }
 0x228   : > { %8569 = vst [vmem:[#allocation33_spill] sm:$0xff] %v5869_v28  ;;  %v5871_v51 = vpop.permute.xlu1 %1427  ;;  %v5873_v23 = vpop.permute.xlu2 %1441 }
 0x229   : > { %8570 = vst [vmem:[#allocation23_spill] sm:$0xff] %v5873_v23  ;;  %v8593_v23 = vld [vmem:[#allocation52_spill] sm:$0xff] }
 0x22d   : > { %1649 = vrot.lane.b32.xlu0 %v8571_v31, %s4681_s13  ;;  %v8577_v31 = vld [vmem:[#allocation32_spill] sm:$0xff] }
 0x22e   : > { %1581 = vrot.lane.b32.xlu1 %v5877_v56, %s4680_s12  ;;  %1577 = vrot.lane.b32.xlu2 %v8572_v43, %s4680_s12 }
 0x22f   : > { %v5883_v35 = vpop.permute.xlu0 %1437 }
 0x230   : > { %8573 = vst [vmem:[#allocation24_spill] sm:$0xff] %v5883_v35  ;;  %v5885_v39 = vpop.permute.xlu1 %1433  ;;  %v5887_v36 = vpop.permute.xlu2 %1447  ;;  %v913_v35 = vld [vmem:[#allocation2 + $0x31] sm:$0xff] }
 0x231   : > { %8574 = vst [vmem:[#allocation38_spill] sm:$0xff] %v5885_v39  ;;  %v955_v39 = vld [vmem:[#allocation2 + $0xaa] sm:$0xff] }
 0x232   : > { %8575 = vst [vmem:[#allocation28_spill] sm:$0xff] %v5887_v36  ;;  %v883_v36 = vld [vmem:[#allocation2 + $0x48] sm:$0xff] }
 0x235   : > { %1655 = vrot.lane.b32.xlu0 %v8576_v13, %s4681_s13  ;;  %v8582_v13 = vld [vmem:[#allocation37_spill] sm:$0xff] }
 0x236   : > { %1651 = vrot.lane.b32.xlu1 %v8577_v31, %s4681_s13  ;;  %1583 = vrot.lane.b32.xlu2 %v5891_v57, %s4680_s12 }
 0x237   : > { %v5897_v25 = vpop.permute.xlu0 %1443 }
 0x238   : > { %8578 = vst [vmem:[#allocation43_spill] sm:$0xff] %v5897_v25  ;;  %v5899_v43 = vpop.permute.xlu1 %1439  ;;  %v5901_v27 = vpop.permute.xlu2 %1453  ;;  %v8585_v25 = vld [vmem:[#allocation53_spill] sm:$0xff] }
 0x239   : > { %8579 = vst [vmem:[#allocation32_spill] sm:$0xff] %v5899_v43 }
 0x23a   : > { %8580 = vst [vmem:[#allocation124_spill] sm:$0xff] %v5901_v27  ;;  %v8586_v27 = vld [vmem:[#allocation42_spill] sm:$0xff] }
 0x23d   : > { %1661 = vrot.lane.b32.xlu0 %v8581_v53, %s4681_s13 }
 0x23e   : > { %1657 = vrot.lane.b32.xlu1 %v8582_v13, %s4681_s13  ;;  %1653 = vrot.lane.b32.xlu2 %v883_v36, %s4681_s13 }
 0x23f   : > { %v5908_v3 = vpop.permute.xlu0 %1449 }
 0x240   : > { %8583 = vst [vmem:[#allocation48_spill] sm:$0xff] %v5908_v3  ;;  %v5910_v31 = vpop.permute.xlu1 %1445  ;;  %v5912_v61 = vpop.permute.xlu2 %1523  ;;  %v8589_v3 = vld [vmem:[#allocation58_spill] sm:$0xff] }
 0x241   : > { %8584 = vst [vmem:[#allocation37_spill] sm:$0xff] %v5910_v31  ;;  %v889_v31 = vld [vmem:[#allocation2 + $0x90] sm:$0xff] }
 0x245   : > { %1667 = vrot.lane.b32.xlu0 %v8585_v25, %s4681_s13 }
 0x246   : > { %1663 = vrot.lane.b32.xlu1 %v8586_v27, %s4681_s13  ;;  %1659 = vrot.lane.b32.xlu2 %v886_v29, %s4681_s13 }
 0x247   : > { %v5919_v53 = vpop.permute.xlu0 %1455 }
 0x248   : > { %8587 = vst [vmem:[#allocation53_spill] sm:$0xff] %v5919_v53  ;;  %v5921_v13 = vpop.permute.xlu1 %1451  ;;  %v5923_v36 = vpop.permute.xlu2 %1529  ;;  %v8592_v53 = vld [vmem:[#allocation64_spill] sm:$0xff] }
 0x249   : > { %8588 = vst [vmem:[#allocation42_spill] sm:$0xff] %v5921_v13  ;;  %v892_v13 = vld [vmem:[#allocation2 + $0xb0] sm:$0xff] }
 0x24d   : > { %1673 = vrot.lane.b32.xlu0 %v8589_v3, %s4681_s13 }
 0x24e   : > { %1669 = vrot.lane.b32.xlu1 %v8590_v5, %s4681_s13  ;;  %1665 = vrot.lane.b32.xlu2 %v889_v31, %s4681_s13 }
 0x24f   : > { %v5930_v25 = vpop.permute.xlu0 %1525 }
 0x250   : > { %v5932_v27 = vpop.permute.xlu1 %1521  ;;  %v5934_v29 = vpop.permute.xlu2 %1535 }
 0x251   : > { %8591 = vst [vmem:[#allocation58_spill] sm:$0xff] %v5934_v29  ;;  %v688_v29 = vld [vmem:[#allocation2] sm:$0xff] }
 0x255   : > { %1679 = vrot.lane.b32.xlu0 %v8592_v53, %s4681_s13 }
 0x256   : > { %1675 = vrot.lane.b32.xlu1 %v8593_v23, %s4681_s13  ;;  %1671 = vrot.lane.b32.xlu2 %v892_v13, %s4681_s13 }
 0x257   : > { %v5941_v3 = vpop.permute.xlu0 %1531 }
 0x258   : > { %v5943_v5 = vpop.permute.xlu1 %1527  ;;  %v5945_v31 = vpop.permute.xlu2 %1541 }
 0x259   : > { %8594 = vst [vmem:[#allocation47_spill] sm:$0xff] %v5945_v31  ;;  %v914_v31 = vld [vmem:[#allocation2 + $0x39] sm:$0xff] }
 0x25d   : > { %1685 = vrot.lane.b32.xlu0 %v8595_v46, %s4681_s13  ;;  %v8600_v46 = vld [vmem:[#allocation63_spill] sm:$0xff] }
 0x25e   : > { %1681 = vrot.lane.b32.xlu1 %v8596_v10, %s4681_s13  ;;  %1677 = vrot.lane.b32.xlu2 %v895_v18, %s4681_s13 }
 0x25f   : > { %v5952_v53 = vpop.permute.xlu0 %1537 }
 0x260   : > { %8597 = vst [vmem:[#allocation64_spill] sm:$0xff] %v5952_v53  ;;  %v5954_v23 = vpop.permute.xlu1 %1533  ;;  %v5956_v13 = vpop.permute.xlu2 %1547  ;;  %v952_v53 = vld [vmem:[#allocation2 + $0x82] sm:$0xff] }
 0x261   : > { %8598 = vst [vmem:[#allocation52_spill] sm:$0xff] %v5956_v13  ;;  %v8603_v13 = vld [vmem:[#allocation68_spill] sm:$0xff] }
 0x265   : > { %1691 = vrot.lane.b32.xlu0 %v5585_v24, %s4681_s13  ;;  %v8604_v24 = vld [vmem:[#allocation69_spill] sm:$0xff] }
 0x266   : > { %1687 = vrot.lane.b32.xlu1 %v8599_v21, %s4681_s13  ;;  %1683 = vrot.lane.b32.xlu2 %v8600_v46, %s4681_s13 }
 0x267   : > { %v5964_v43 = vpop.permute.xlu0 %1543 }
 0x268   : > { %8601 = vst [vmem:[#allocation70_spill] sm:$0xff] %v5964_v43  ;;  %v5966_v10 = vpop.permute.xlu1 %1539  ;;  %v5968_v18 = vpop.permute.xlu2 %1553  ;;  %v8608_v43 = vld [vmem:[#allocation74_spill] sm:$0xff] }
 0x269   : > { %8602 = vst [vmem:[#allocation57_spill] sm:$0xff] %v5966_v10  ;;  %v932_v10 = vld [vmem:[#allocation2 + $0x111] sm:$0xff] }
 0x26d   : > { %1697 = vrot.lane.b32.xlu0 %v5603_v33, %s4681_s13  ;;  %v8609_v33 = vld [vmem:[#allocation75_spill] sm:$0xff] }
 0x26e   : > { %1693 = vrot.lane.b32.xlu1 %v8603_v13, %s4681_s13  ;;  %1689 = vrot.lane.b32.xlu2 %v8604_v24, %s4681_s13 }
 0x26f   : > { %v5976_v2 = vpop.permute.xlu0 %1549 }
 0x270   : > { %8605 = vst [vmem:[#allocation62_spill] sm:$0xff] %v5976_v2  ;;  %v5978_v21 = vpop.permute.xlu1 %1545  ;;  %v5980_v46 = vpop.permute.xlu2 %1559  ;;  %v911_v2 = vld [vmem:[#allocation2 + $0x198] sm:$0xff] }
 0x271   : > { %8606 = vst [vmem:[#allocation63_spill] sm:$0xff] %v5978_v21  ;;  %v8612_v21 = vld [vmem:[#allocation79_spill] sm:$0xff] }
 0x272   : > { %8607 = vst [vmem:[#allocation68_spill] sm:$0xff] %v5980_v46  ;;  %v2267_v46 = vld [vmem:[%s8385_s2 + $0x18] sm:$0xff] }
 0x275   : > { %1703 = vrot.lane.b32.xlu0 %v5619_v50, %s4681_s13  ;;  %v8613_v50 = vld [vmem:[#allocation80_spill] sm:$0xff] }
 0x276   : > { %1699 = vrot.lane.b32.xlu1 %v8608_v43, %s4681_s13  ;;  %1695 = vrot.lane.b32.xlu2 %v8609_v33, %s4681_s13 }
 0x277   : > { %v5988_v9 = vpop.permute.xlu0 %1555 }
 0x278   : > { %v5990_v13 = vpop.permute.xlu1 %1551  ;;  %v5992_v24 = vpop.permute.xlu2 %1565 }
 0x279   : > { %8610 = vst [vmem:[#allocation69_spill] sm:$0xff] %v5990_v13 }
 0x27a   : > { %8611 = vst [vmem:[#allocation74_spill] sm:$0xff] %v5992_v24  ;;  %v917_v24 = vld [vmem:[#allocation2 + $0x61] sm:$0xff] }
 0x27d   : > { %1709 = vrot.lane.b32.xlu0 %v911_v2, %s4681_s13  ;;  %v8616_v2 = vld [vmem:[#allocation84_spill] sm:$0xff] }
 0x27e   : > { %1705 = vrot.lane.b32.xlu1 %v8612_v21, %s4681_s13  ;;  %1701 = vrot.lane.b32.xlu2 %v8613_v50, %s4681_s13 }
 0x27f   : > { %v5999_v38 = vpop.permute.xlu0 %1561 }
 0x280   : > { %8614 = vst [vmem:[#allocation75_spill] sm:$0xff] %v5999_v38  ;;  %v6001_v43 = vpop.permute.xlu1 %1557  ;;  %v6003_v33 = vpop.permute.xlu2 %1571  ;;  %v946_v38 = vld [vmem:[#allocation2 + $0x3a] sm:$0xff] }
 0x281   : > { %8615 = vst [vmem:[#allocation79_spill] sm:$0xff] %v6003_v33  ;;  %v915_v33 = vld [vmem:[#allocation2 + $0x49] sm:$0xff] }
 0x285   : > { %1779 = vrot.lane.b32.xlu0 %v914_v31, %s4682_s14 }
 0x286   : > { %1711 = vrot.lane.b32.xlu1 %v912_v44, %s4681_s13  ;;  %1707 = vrot.lane.b32.xlu2 %v8616_v2, %s4681_s13 }
 0x287   : > { %v6009_v21 = vpop.permute.xlu0 %1567 }
 0x288   : > { %8617 = vst [vmem:[#allocation80_spill] sm:$0xff] %v6009_v21  ;;  %v6011_v13 = vpop.permute.xlu1 %1563  ;;  %v6013_v50 = vpop.permute.xlu2 %1577  ;;  %v920_v21 = vld [vmem:[#allocation2 + $0x81] sm:$0xff] }
 0x289   : > { %8618 = vst [vmem:[#allocation84_spill] sm:$0xff] %v6011_v13  ;;  %v925_v13 = vld [vmem:[#allocation2 + $0xc1] sm:$0xff] }
 0x28a   : > { %8619 = vst [vmem:[#allocation125_spill] sm:$0xff] %v6013_v50  ;;  %v916_v50 = vld [vmem:[#allocation2 + $0x51] sm:$0xff] }
 0x28d   : > { %1785 = vrot.lane.b32.xlu0 %v917_v24, %s4682_s14 }
 0x28e   : > { %1781 = vrot.lane.b32.xlu1 %v915_v33, %s4682_s14  ;;  %1777 = vrot.lane.b32.xlu2 %v913_v35, %s4682_s14 }
 0x28f   : > { %v6018_v31 = vpop.permute.xlu0 %1573 }
 0x290   : > { %8620 = vst [vmem:[#allocation126_spill] sm:$0xff] %v6018_v31  ;;  %v6020_v44 = vpop.permute.xlu1 %1569  ;;  %v6022_v2 = vpop.permute.xlu2 %1583  ;;  %v923_v31 = vld [vmem:[#allocation2 + $0xa9] sm:$0xff] }
 0x291   : > { %8621 = vst [vmem:[#allocation127_spill] sm:$0xff] %v6020_v44  ;;  %v921_v44 = vld [vmem:[#allocation2 + $0x91] sm:$0xff] }
 0x292   : > { %8622 = vst [vmem:[#allocation128_spill] sm:$0xff] %v6022_v2  ;;  %v919_v2 = vld [vmem:[#allocation2 + $0x79] sm:$0xff] }
 0x295   : > { %1791 = vrot.lane.b32.xlu0 %v920_v21, %s4682_s14 }
 0x296   : > { %1787 = vrot.lane.b32.xlu1 %v918_v30, %s4682_s14  ;;  %1783 = vrot.lane.b32.xlu2 %v916_v50, %s4682_s14 }
 0x297   : > { %v6027_v24 = vpop.permute.xlu0 %1579 }
 0x298   : > { %8623 = vst [vmem:[#allocation129_spill] sm:$0xff] %v6027_v24  ;;  %v6029_v33 = vpop.permute.xlu1 %1575  ;;  %v6031_v35 = vpop.permute.xlu2 %1653  ;;  %v926_v24 = vld [vmem:[#allocation2 + $0xc9] sm:$0xff] }
 0x299   : > { %8624 = vst [vmem:[#allocation130_spill] sm:$0xff] %v6029_v33  ;;  %v924_v33 = vld [vmem:[#allocation2 + $0xb1] sm:$0xff] }
 0x29d   : > { %1797 = vrot.lane.b32.xlu0 %v923_v31, %s4682_s14 }
 0x29e   : > { %1793 = vrot.lane.b32.xlu1 %v921_v44, %s4682_s14  ;;  %1789 = vrot.lane.b32.xlu2 %v919_v2, %s4682_s14 }
 0x29f   : > { %v6036_v21 = vpop.permute.xlu0 %1649 }
 0x2a0   : > { %v6038_v30 = vpop.permute.xlu1 %1581  ;;  %v6040_v50 = vpop.permute.xlu2 %1659 }
 0x2a1   : > { %8625 = vst [vmem:[#allocation131_spill] sm:$0xff] %v6038_v30  ;;  %v927_v30 = vld [vmem:[#allocation2 + $0xd9] sm:$0xff] }
 0x2a5   : > { %1803 = vrot.lane.b32.xlu0 %v926_v24, %s4682_s14 }
 0x2a6   : > { %1799 = vrot.lane.b32.xlu1 %v924_v33, %s4682_s14  ;;  %1795 = vrot.lane.b32.xlu2 %v922_v19, %s4682_s14 }
 0x2a7   : > { %v6045_v31 = vpop.permute.xlu0 %1655 }
 0x2a8   : > { %v6047_v44 = vpop.permute.xlu1 %1651  ;;  %v6049_v2 = vpop.permute.xlu2 %1665 }
 0x2a9   : > { %8626 = vst [vmem:[#allocation132_spill] sm:$0xff] %v6049_v2  ;;  %v947_v2 = vld [vmem:[#allocation2 + $0x4a] sm:$0xff] }
 0x2ad   : > { %1809 = vrot.lane.b32.xlu0 %v929_v60, %s4682_s14 }
 0x2ae   : > { %1805 = vrot.lane.b32.xlu1 %v927_v30, %s4682_s14  ;;  %1801 = vrot.lane.b32.xlu2 %v925_v13, %s4682_s14 }
 0x2af   : > { %v6054_v24 = vpop.permute.xlu0 %1661 }
 0x2b0   : > { %v6056_v33 = vpop.permute.xlu1 %1657  ;;  %v6058_v19 = vpop.permute.xlu2 %1671 }
 0x2b1   : > { %8627 = vst [vmem:[#allocation133_spill] sm:$0xff] %v6058_v19  ;;  %v931_v19 = vld [vmem:[#allocation2 + $0x109] sm:$0xff] }
 0x2b5   : > { %1815 = vrot.lane.b32.xlu0 %v932_v10, %s4682_s14 }
 0x2b6   : > { %1811 = vrot.lane.b32.xlu1 %v930_v26, %s4682_s14  ;;  %1807 = vrot.lane.b32.xlu2 %v928_v42, %s4682_s14 }
 0x2b7   : > { %v6063_v60 = vpop.permute.xlu0 %1667 }
 0x2b8   : > { %8628 = vst [vmem:[#allocation134_spill] sm:$0xff] %v6063_v60  ;;  %v6065_v30 = vpop.permute.xlu1 %1663  ;;  %v6067_v13 = vpop.permute.xlu2 %1677  ;;  %v938_v60 = vld [vmem:[#allocation2 + $0x159] sm:$0xff] }
 0x2b9   : > { %8629 = vst [vmem:[#allocation135_spill] sm:$0xff] %v6065_v30  ;;  %v966_v30 = vld [vmem:[#allocation2 + $0x12a] sm:$0xff] }
 0x2ba   : > { %8630 = vst [vmem:[#allocation136_spill] sm:$0xff] %v6067_v13  ;;  %v934_v13 = vld [vmem:[#allocation2 + $0x129] sm:$0xff] }
 0x2bd   : > { %1821 = vrot.lane.b32.xlu0 %v935_v11, %s4682_s14 }
 0x2be   : > { %1817 = vrot.lane.b32.xlu1 %v933_v7, %s4682_s14  ;;  %1813 = vrot.lane.b32.xlu2 %v931_v19, %s4682_s14 }
 0x2bf   : > { %v6072_v10 = vpop.permute.xlu0 %1673 }
 0x2c0   : > { %8631 = vst [vmem:[#allocation137_spill] sm:$0xff] %v6072_v10  ;;  %v6074_v26 = vpop.permute.xlu1 %1669  ;;  %v6076_v42 = vpop.permute.xlu2 %1683  ;;  %v939_v10 = vld [vmem:[#allocation2 + $0x169] sm:$0xff] }
 0x2c1   : > { %8632 = vst [vmem:[#allocation138_spill] sm:$0xff] %v6074_v26  ;;  %v937_v26 = vld [vmem:[#allocation2 + $0x151] sm:$0xff] }
 0x2c5   : > { %1827 = vrot.lane.b32.xlu0 %v938_v60, %s4682_s14 }
 0x2c6   : > { %1823 = vrot.lane.b32.xlu1 %v936_v0, %s4682_s14  ;;  %1819 = vrot.lane.b32.xlu2 %v934_v13, %s4682_s14 }
 0x2c7   : > { %v6081_v11 = vpop.permute.xlu0 %1679 }
 0x2c8   : > { %8633 = vst [vmem:[#allocation139_spill] sm:$0xff] %v6081_v11  ;;  %v6083_v7 = vpop.permute.xlu1 %1675  ;;  %v6085_v19 = vpop.permute.xlu2 %1689  ;;  %v944_v11 = vld [vmem:[#allocation2 + $0x1a1] sm:$0xff] }
 0x2c9   : > { %8634 = vst [vmem:[#allocation140_spill] sm:$0xff] %v6083_v7  ;;  %v940_v7 = vld [vmem:[#allocation2 + $0x171] sm:$0xff] }
 0x2ca   : > { %8635 = vst [vmem:[#allocation141_spill] sm:$0xff] %v6085_v19  ;;  %v943_v19 = vld [vmem:[#allocation2 + $0x199] sm:$0xff] }
 0x2cd   : > { %1833 = vrot.lane.b32.xlu0 %v5755_v62, %s4682_s14 }
 0x2ce   : > { %1829 = vrot.lane.b32.xlu1 %v939_v10, %s4682_s14  ;;  %1825 = vrot.lane.b32.xlu2 %v937_v26, %s4682_s14 }
 0x2cf   : > { %v6091_v60 = vpop.permute.xlu0 %1685 }
 0x2d0   : > { %v6093_v0 = vpop.permute.xlu1 %1681  ;;  %v6095_v13 = vpop.permute.xlu2 %1695 }
 0x2d1   : > { %8636 = vst [vmem:[#allocation142_spill] sm:$0xff] %v6095_v13  ;;  %v945_v13 = vld [vmem:[#allocation2 + $0x32] sm:$0xff] }
 0x2d5   : > { %1839 = vrot.lane.b32.xlu0 %v944_v11, %s4682_s14 }
 0x2d6   : > { %1835 = vrot.lane.b32.xlu1 %v5739_v59, %s4682_s14  ;;  %1831 = vrot.lane.b32.xlu2 %v940_v7, %s4682_s14 }
 0x2d7   : > { %v6101_v62 = vpop.permute.xlu0 %1691 }
 0x2d8   : > { %8637 = vst [vmem:[#allocation143_spill] sm:$0xff] %v6101_v62  ;;  %v6103_v10 = vpop.permute.xlu1 %1687  ;;  %v6105_v26 = vpop.permute.xlu2 %1701  ;;  %v950_v62 = vld [vmem:[#allocation2 + $0x6a] sm:$0xff] }
 0x2d9   : > { %8638 = vst [vmem:[#allocation144_spill] sm:$0xff] %v6103_v10  ;;  %v963_v10 = vld [vmem:[#allocation2 + $0x10a] sm:$0xff] }
 0x2da   : > { %8639 = vst [vmem:[#allocation145_spill] sm:$0xff] %v6105_v26  ;;  %v948_v26 = vld [vmem:[#allocation2 + $0x52] sm:$0xff] }
 0x2dd   : > { %1909 = vrot.lane.b32.xlu0 %v947_v2, %s4683_s15 }
 0x2de   : > { %1905 = vrot.lane.b32.xlu1 %v945_v13, %s4683_s15  ;;  %1837 = vrot.lane.b32.xlu2 %v943_v19, %s4682_s14 }
 0x2df   : > { %v6110_v11 = vpop.permute.xlu0 %1697 }
 0x2e0   : > { %8640 = vst [vmem:[#allocation146_spill] sm:$0xff] %v6110_v11  ;;  %v6112_v59 = vpop.permute.xlu1 %1693  ;;  %v6114_v7 = vpop.permute.xlu2 %1707  ;;  %v953_v11 = vld [vmem:[#allocation2 + $0x92] sm:$0xff] }
 0x2e1   : > { %8641 = vst [vmem:[#allocation147_spill] sm:$0xff] %v6112_v59  ;;  %v951_v59 = vld [vmem:[#allocation2 + $0x7a] sm:$0xff] }
 0x2e2   : > { %8642 = vst [vmem:[#allocation148_spill] sm:$0xff] %v6114_v7  ;;  %v949_v7 = vld [vmem:[#allocation2 + $0x62] sm:$0xff] }
 0x2e5   : > { %1915 = vrot.lane.b32.xlu0 %v950_v62, %s4683_s15 }
 0x2e6   : > { %1911 = vrot.lane.b32.xlu1 %v948_v26, %s4683_s15  ;;  %1907 = vrot.lane.b32.xlu2 %v946_v38, %s4683_s15 }
 0x2e7   : > { %v6119_v2 = vpop.permute.xlu0 %1703 }
 0x2e8   : > { %8643 = vst [vmem:[#allocation149_spill] sm:$0xff] %v6119_v2  ;;  %v6121_v13 = vpop.permute.xlu1 %1699  ;;  %v6123_v19 = vpop.permute.xlu2 %1777  ;;  %v956_v2 = vld [vmem:[#allocation2 + $0xb2] sm:$0xff] }
 0x2e9   : > { %8644 = vst [vmem:[#allocation150_spill] sm:$0xff] %v6121_v13  ;;  %v954_v13 = vld [vmem:[#allocation2 + $0x9a] sm:$0xff] }
 0x2ed   : > { %1921 = vrot.lane.b32.xlu0 %v953_v11, %s4683_s15 }
 0x2ee   : > { %1917 = vrot.lane.b32.xlu1 %v951_v59, %s4683_s15  ;;  %1913 = vrot.lane.b32.xlu2 %v949_v7, %s4683_s15 }
 0x2ef   : > { %v6128_v62 = vpop.permute.xlu0 %1709 }
 0x2f0   : > { %8645 = vst [vmem:[#allocation151_spill] sm:$0xff] %v6128_v62  ;;  %v6130_v26 = vpop.permute.xlu1 %1705  ;;  %v6132_v38 = vpop.permute.xlu2 %1783  ;;  %v959_v62 = vld [vmem:[#allocation2 + $0xda] sm:$0xff] }
 0x2f1   : > { %8646 = vst [vmem:[#allocation152_spill] sm:$0xff] %v6130_v26  ;;  %v957_v26 = vld [vmem:[#allocation2 + $0xc2] sm:$0xff] }
 0x2f5   : > { %1927 = vrot.lane.b32.xlu0 %v956_v2, %s4683_s15 }
 0x2f6   : > { %1923 = vrot.lane.b32.xlu1 %v954_v13, %s4683_s15  ;;  %1919 = vrot.lane.b32.xlu2 %v952_v53, %s4683_s15 }
 0x2f7   : > { %v6137_v11 = vpop.permute.xlu0 %1779 }
 0x2f8   : > { %v6139_v59 = vpop.permute.xlu1 %1711  ;;  %v6141_v7 = vpop.permute.xlu2 %1789 }
 0x2f9   : > { %8647 = vst [vmem:[#allocation153_spill] sm:$0xff] %v6139_v59  ;;  %v960_v59 = vld [vmem:[#allocation2 + $0xe2] sm:$0xff] }
 0x2fd   : > { %1933 = vrot.lane.b32.xlu0 %v959_v62, %s4683_s15 }
 0x2fe   : > { %1929 = vrot.lane.b32.xlu1 %v957_v26, %s4683_s15  ;;  %1925 = vrot.lane.b32.xlu2 %v955_v39, %s4683_s15 }
 0x2ff   : > { %v6146_v2 = vpop.permute.xlu0 %1785 }
 0x300   : > { %v6148_v13 = vpop.permute.xlu1 %1781  ;;  %v6150_v53 = vpop.permute.xlu2 %1795 }
 0x301   : > { %8648 = vst [vmem:[#allocation154_spill] sm:$0xff] %v6150_v53  ;;  %v961_v53 = vld [vmem:[#allocation2 + $0xf2] sm:$0xff] }
 0x305   : > { %1939 = vrot.lane.b32.xlu0 %v962_v55, %s4683_s15 }
 0x306   : > { %1935 = vrot.lane.b32.xlu1 %v960_v59, %s4683_s15  ;;  %1931 = vrot.lane.b32.xlu2 %v958_v6, %s4683_s15 }
 0x307   : > { %v6155_v62 = vpop.permute.xlu0 %1791 }
 0x308   : > { %8649 = vst [vmem:[#allocation155_spill] sm:$0xff] %v6155_v62  ;;  %v6157_v26 = vpop.permute.xlu1 %1787  ;;  %v6159_v39 = vpop.permute.xlu2 %1801  ;;  %v968_v62 = vld [vmem:[#allocation2 + $0x142] sm:$0xff] }
 0x309   : > { %8650 = vst [vmem:[#allocation156_spill] sm:$0xff] %v6159_v39  ;;  %v964_v39 = vld [vmem:[#allocation2 + $0x112] sm:$0xff] }
 0x30d   : > { %1945 = vrot.lane.b32.xlu0 %v965_v22, %s4683_s15 }
 0x30e   : > { %1941 = vrot.lane.b32.xlu1 %v963_v10, %s4683_s15  ;;  %1937 = vrot.lane.b32.xlu2 %v961_v53, %s4683_s15 }
 0x30f   : > { %v6164_v55 = vpop.permute.xlu0 %1797 }
 0x310   : > { %8651 = vst [vmem:[#allocation157_spill] sm:$0xff] %v6164_v55  ;;  %v6166_v59 = vpop.permute.xlu1 %1793  ;;  %v6168_v6 = vpop.permute.xlu2 %1807  ;;  %v971_v55 = vld [vmem:[#allocation2 + $0x16a] sm:$0xff] }
 0x311   : > { %8652 = vst [vmem:[#allocation158_spill] sm:$0xff] %v6166_v59  ;;  %v969_v59 = vld [vmem:[#allocation2 + $0x152] sm:$0xff] }
 0x312   : > { %8653 = vst [vmem:[#allocation159_spill] sm:$0xff] %v6168_v6  ;;  %v967_v6 = vld [vmem:[#allocation2 + $0x13a] sm:$0xff] }
 0x315   : > { %1951 = vrot.lane.b32.xlu0 %v968_v62, %s4683_s15 }
 0x316   : > { %1947 = vrot.lane.b32.xlu1 %v966_v30, %s4683_s15  ;;  %1943 = vrot.lane.b32.xlu2 %v964_v39, %s4683_s15 }
 0x317   : > { %v6173_v22 = vpop.permute.xlu0 %1803 }
 0x318   : > { %8654 = vst [vmem:[#allocation160_spill] sm:$0xff] %v6173_v22  ;;  %v6175_v10 = vpop.permute.xlu1 %1799  ;;  %v6177_v53 = vpop.permute.xlu2 %1813  ;;  %v2272_v22 = vld [vmem:[%s8385_s2 + $0x40] sm:$0xff] }
 0x319   : > { %8655 = vst [vmem:[#allocation161_spill] sm:$0xff] %v6175_v10  ;;  %2381 = vmatpush.msra.mxu0 %v2272_v22  ;;  %4586 = vmatpush.msra.mxu2 %v2272_v22  ;;  %v970_v10 = vld [vmem:[#allocation2 + $0x15a] sm:$0xff] }
 0x31d   : > { %1957 = vrot.lane.b32.xlu0 %v971_v55, %s4683_s15  ;;  %v2271_v55 = vld [vmem:[%s8385_s2 + $0x38] sm:$0xff] }
 0x31e   : > { %1953 = vrot.lane.b32.xlu1 %v969_v59, %s4683_s15  ;;  %1949 = vrot.lane.b32.xlu2 %v967_v6, %s4683_s15  ;;  %v2270_v59 = vld [vmem:[%s8385_s2 + $0x30] sm:$0xff] }
 0x31f   : > { %v6182_v62 = vpop.permute.xlu0 %1809  ;;  %2382 = vmatpush.msra.mxu0 %v2271_v55  ;;  %4587 = vmatpush.msra.mxu2 %v2271_v55  ;;  %v972_v6 = vld [vmem:[#allocation2 + $0x172] sm:$0xff] }
 0x320   : > { %v6184_v30 = vpop.permute.xlu1 %1805  ;;  %v6186_v39 = vpop.permute.xlu2 %1819 }
 0x321   : > { %8656 = vst [vmem:[#allocation162_spill] sm:$0xff] %v6184_v30  ;;  %v2269_v30 = vld [vmem:[%s8385_s2 + $0x28] sm:$0xff]  ;;  %2383 = vmatpush.msra.mxu0 %v2270_v59  ;;  %4588 = vmatpush.msra.mxu2 %v2270_v59 }
 0x322   : > { %8657 = vst [vmem:[#allocation163_spill] sm:$0xff] %v6186_v39  ;;  %v2265_v59 = vld [vmem:[%s8385_s2 + $0x8] sm:$0xff] }
 0x323   : > { %2384 = vmatpush.msra.mxu0 %v2269_v30  ;;  %4589 = vmatpush.msra.mxu2 %v2269_v30 }
 0x325   : > { %1963 = vrot.lane.b32.xlu0 %v5891_v57, %s4683_s15  ;;  %v2268_v57 = vld [vmem:[%s8385_s2 + $0x20] sm:$0xff] }
 0x326   : > { %1959 = vrot.lane.b32.xlu1 %v972_v6, %s4683_s15  ;;  %1955 = vrot.lane.b32.xlu2 %v970_v10, %s4683_s15  ;;  %v975_v6 = vld [vmem:[#allocation2 + $0x19a] sm:$0xff]  ;;  %v2266_v10 = vld [vmem:[%s8385_s2 + $0x10] sm:$0xff] }
 0x327   : > { %v6204_v22 = vpop.permute.xlu0 %1815  ;;  %2385 = vmatpush.msra.mxu0 %v2268_v57  ;;  %4590 = vmatpush.msra.mxu2 %v2268_v57  ;;  %v2264_v57 = vld [vmem:[%s8385_s2] sm:$0xff] }
 0x328   : > { %8658 = vst [vmem:[#allocation164_spill] sm:$0xff] %v6204_v22  ;;  %v6206_v39 = vpop.permute.xlu1 %1811  ;;  %v6208_v55 = vpop.permute.xlu2 %1825 }
 0x329   : > { %8659 = vst [vmem:[#allocation165_spill] sm:$0xff] %v6208_v55  ;;  %2386 = vmatpush.msra.mxu0 %v2267_v46  ;;  %4591 = vmatpush.msra.mxu2 %v2267_v46  ;;  %v976_v46 = vld [vmem:[#allocation2 + $0x1a2] sm:$0xff] }
 0x32b   : > { %2387 = vmatpush.msra.mxu0 %v2266_v10  ;;  %4592 = vmatpush.msra.mxu2 %v2266_v10 }
 0x32d   : > { %2388 = vmatpush.msra.mxu0 %v2265_v59  ;;  %4593 = vmatpush.msra.mxu2 %v2265_v59 }
 0x32e   : > { %1965 = vrot.lane.b32.xlu1 %v975_v6, %s4683_s15  ;;  %1961 = vrot.lane.b32.xlu2 %v5877_v56, %s4683_s15 }
 0x32f   : > { %v6225_v30 = vpop.permute.xlu0 %1821  ;;  %2389 = vmatpush.msra.mxu0 %v2264_v57  ;;  %4594 = vmatpush.msra.mxu2 %v2264_v57 }
 0x330   : > { %8660 = vst [vmem:[#allocation166_spill] sm:$0xff] %v6225_v30  ;;  %v6227_v55 = vpop.permute.xlu1 %1817  ;;  %v6229_v22 = vpop.permute.xlu2 %1831 }
 0x331   : > { %8661 = vst [vmem:[#allocation167_spill] sm:$0xff] %v6227_v55 }
 0x332   : > { %8662 = vst [vmem:[#allocation168_spill] sm:$0xff] %v6229_v22 }
 0x336   : > { %1967 = vrot.lane.b32.xlu2 %v976_v46, %s4683_s15  ;;  %v2001_v46 = vsel %vm272_vm0, %v688_v29, %v8669_v15 }
 0x337   : > { %v6235_v6 = vpop.permute.xlu0 %1827 }
 0x338   : > { %8663 = vst [vmem:[#allocation169_spill] sm:$0xff] %v6235_v6  ;;  %v6237_v56 = vpop.permute.xlu1 %1823  ;;  %v6239_v10 = vpop.permute.xlu2 %1837  ;;  %v8670_v6 = vld [vmem:[#allocation50_spill] sm:$0xff] }
 0x339   : > { %8664 = vst [vmem:[#allocation170_spill] sm:$0xff] %v6239_v10  ;;  %v2034_v10 = vsel %vm2033_vm3, %v2001_v46, %v8670_v6 }
 0x33f   : > { %v6241_v30 = vpop.permute.xlu0 %1833 }
 0x340   : > { %8665 = vst [vmem:[#allocation171_spill] sm:$0xff] %v6241_v30  ;;  %v6243_v55 = vpop.permute.xlu1 %1829  ;;  %v1908_v22 = vpop.permute.xlu2 %1907  ;;  %v2067_v30 = vsel %vm2066_vm5, %v2034_v10, %v5661_v40 }
 0x341   : > { %8666 = vst [vmem:[#allocation172_spill] sm:$0xff] %v6243_v55  ;;  %v2100_v55 = vsel %vm2099_vm4, %v2067_v30, %v5777_v17  ;;  %v8671_v30 = vld [vmem:[#allocation6_spill] sm:$0xff] }
 0x347   : > { %v6245_v28 = vpop.permute.xlu0 %1839 }
 0x348   : > { %8667 = vst [vmem:[#allocation173_spill] sm:$0xff] %v6245_v28  ;;  %v6247_v59 = vpop.permute.xlu1 %1835  ;;  %v6249_v57 = vpop.permute.xlu2 %1913  ;;  %v2133_v28 = vsel %vm2132_vm6, %v2100_v55, %v5932_v27  ;;  %v8672_v27 = vld [vmem:[#allocation41_spill] sm:$0xff] }
 0x349   : > { %8668 = vst [vmem:[#allocation174_spill] sm:$0xff] %v6247_v59  ;;  %v689_v59 = vld [vmem:[#allocation2 + $0x8] sm:$0xff]  ;;  %v2166_v15 = vsel %vm2165_vm8, %v2133_v28, %v6036_v21 }
 0x34a   : > { %v2199_v6 = vsel %vm2198_vm7, %v2166_v15, %v6123_v19  ;;  %v2002_v10 = vsel %vm272_vm0, %v689_v59, %v8671_v30 }
 0x34b   : > { %v2035_v55 = vsel %vm2033_vm3, %v2002_v10, %v8672_v27  ;;  %v8673_v10 = vld [vmem:[#allocation9_spill] sm:$0xff] }
 0x34c   : > { %v2068_v28 = vsel %vm2066_vm5, %v2035_v55, %v5675_v16  ;;  %v4624_v16 = vld [vmem:[#allocation2 + $0x18] sm:$0xff] }
 0x34d   : > { %v2101_v21 = vsel %vm2099_vm4, %v2068_v28, %v5797_v48  ;;  %v2003_v48 = vsel %vm272_vm0, %v4624_v16, %v8673_v10  ;;  %v8676_v16 = vld [vmem:[#allocation20_spill] sm:$0xff]  ;;  %v8677_v10 = vld [vmem:[#allocation55_spill] sm:$0xff] }
 0x34e   : > { %v2134_v19 = vsel %vm2132_vm6, %v2101_v21, %v5912_v61  ;;  %v8674_v61 = vld [vmem:[#allocation49_spill] sm:$0xff] }
 0x34f   : > { %v1910_v29 = vpop.permute.xlu0 %1909  ;;  %v2167_v15 = vsel %vm2165_vm8, %v2134_v19, %v6047_v44  ;;  %v2036_v27 = vsel %vm2033_vm3, %v2003_v48, %v8674_v61 }
 0x350   : > { %v1906_v46 = vpop.permute.xlu1 %1905  ;;  %v6265_v40 = vpop.permute.xlu2 %1919  ;;  %v2200_v59 = vsel %vm2198_vm7, %v2167_v15, %v6137_v11  ;;  %v2069_v44 = vsel %vm2066_vm5, %v2036_v27, %v5653_v52 }
 0x351   : > { %v2232_v17 = vsel %vm2231_vm10, %v2199_v6, %v1906_v46  ;;  %v2233_v30 = vsel %vm2231_vm10, %v2200_v59, %v1908_v22  ;;  %v2102_v11 = vsel %vm2099_vm4, %v2069_v44, %v5811_v41  ;;  %v4625_v59 = vld [vmem:[#allocation2 + $0x20] sm:$0xff] }
 0x352   : > { %4517 = vmatmul.msk.f32.vlgmr.msra.gmra.mxu0 %vm2277_vm9, %v2232_v17  ;;  %v2135_v55 = vsel %vm2132_vm6, %v2102_v11, %v5930_v25  ;;  %v4626_v25 = vld [vmem:[#allocation2 + $0xc0] sm:$0xff] }
 0x353   : > { %v2168_v22 = vsel %vm2165_vm8, %v2135_v55, %v6031_v35  ;;  %v2017_v35 = vsel %vm272_vm0, %v4626_v25, %v8676_v16 }
 0x354   : > { %v2201_v21 = vsel %vm2198_vm7, %v2168_v22, %v6148_v13  ;;  %v8678_v13 = vld [vmem:[#allocation67_spill] sm:$0xff] }
 0x355   : > { %v2234_v52 = vsel %vm2231_vm10, %v2201_v21, %v1910_v29  ;;  %v2050_v61 = vsel %vm2033_vm3, %v2017_v35, %v8678_v13  ;;  %v4628_v13 = vld [vmem:[#allocation2 + $0xc8] sm:$0xff] }
 0x356   : > { %v2083_v29 = vsel %vm2066_vm5, %v2050_v61, %v5735_v8  ;;  %v8681_v61 = vld [vmem:[#allocation26_spill] sm:$0xff] }
 0x357   : > { %v6281_v6 = vpop.permute.xlu0 %1915  ;;  %v2116_v11 = vsel %vm2099_vm4, %v2083_v29, %v5857_v47  ;;  %v8682_v29 = vld [vmem:[#allocation12_spill] sm:$0xff] }
 0x358   : > { %v1912_v46 = vpop.permute.xlu1 %1911  ;;  %v6285_v17 = vpop.permute.xlu2 %1925  ;;  %v2149_v22 = vsel %vm2132_vm6, %v2116_v11, %v5968_v18  ;;  %v4627_v18 = vld [vmem:[#allocation2 + $0x30] sm:$0xff] }
 0x359   : > { %v8684_v11 = vld [vmem:[#allocation54_spill] sm:$0xff] }
 0x35a   : > { %4518 = vmatmul.msk.f32.gmra.mxu0 %vm2277_vm9, %v2233_v30  ;;  %v8675_v30 = vld [vmem:[#allocation5_spill] sm:$0xff] }
 0x35b   : > { %v2004_v41 = vsel %vm272_vm0, %v4625_v59, %v8675_v30  ;;  %v8679_v30 = vld [vmem:[#allocation8_spill] sm:$0xff] }
 0x35c   : > { %v2037_v48 = vsel %vm2033_vm3, %v2004_v41, %v8677_v10 }
 0x35d   : > { %v2070_v27 = vsel %vm2066_vm5, %v2037_v48, %v5673_v54  ;;  %v2182_v54 = vsel %vm2165_vm8, %v2149_v22, %v6093_v0  ;;  %v8680_v0 = vld [vmem:[#allocation46_spill] sm:$0xff] }
 0x35e   : > { %v2103_v44 = vsel %vm2099_vm4, %v2070_v27, %v5789_v32  ;;  %v2215_v47 = vsel %vm2198_vm7, %v2182_v54, %v6182_v62  ;;  %v4629_v27 = vld [vmem:[#allocation2 + $0x38] sm:$0xff] }
 0x35f   : > { %v6301_v28 = vpop.permute.xlu0 %1921  ;;  %v2136_v55 = vsel %vm2132_vm6, %v2103_v44, %v5943_v5  ;;  %v8683_v44 = vld [vmem:[#allocation76_spill] sm:$0xff] }
 0x360   : > { %v6305_v19 = vpop.permute.xlu1 %1917  ;;  %v6307_v15 = vpop.permute.xlu2 %1931  ;;  %v2169_v21 = vsel %vm2165_vm8, %v2136_v55, %v6045_v31  ;;  %v2005_v31 = vsel %vm272_vm0, %v4627_v18, %v8679_v30  ;;  %v4631_v18 = vld [vmem:[#allocation2 + $0xd8] sm:$0xff] }
 0x361   : > { %v2202_v8 = vsel %vm2198_vm7, %v2169_v21, %v6132_v38  ;;  %v2038_v25 = vsel %vm2033_vm3, %v2005_v31, %v8680_v0  ;;  %v8686_v30 = vld [vmem:[#allocation19_spill] sm:$0xff] }
 0x362   : > { %4519 = vmatmul.msk.f32.gmra.mxu0 %vm2277_vm9, %v2234_v52  ;;  %v2235_v59 = vsel %vm2231_vm10, %v2202_v8, %v1912_v46  ;;  %v2071_v38 = vsel %vm2066_vm5, %v2038_v25, %v5687_v37  ;;  %v2018_v37 = vsel %vm272_vm0, %v4628_v13, %v8681_v61  ;;  %v4632_v61 = vld [vmem:[#allocation2 + $0x50] sm:$0xff] }
 0x363   : > { %v2104_v62 = vsel %vm2099_vm4, %v2071_v38, %v5809_v58 }
 0x364   : > { %v2137_v46 = vsel %vm2132_vm6, %v2104_v62, %v5923_v36  ;;  %v2006_v36 = vsel %vm272_vm0, %v4629_v27, %v8682_v29  ;;  %v8692_v27 = vld [vmem:[#allocation73_spill] sm:$0xff] }
 0x365   : > { %v2170_v16 = vsel %vm2165_vm8, %v2137_v46, %v6056_v33  ;;  %v2051_v33 = vsel %vm2033_vm3, %v2018_v37, %v8683_v44  ;;  %v8693_v44 = vld [vmem:[#allocation115_spill] sm:$0xff] }
 0x366   : > { %v2203_v10 = vsel %vm2198_vm7, %v2170_v16, %v6146_v2  ;;  %v2039_v2 = vsel %vm2033_vm3, %v2006_v36, %v8684_v11  ;;  %v2084_v55 = vsel %vm2066_vm5, %v2051_v33, %v5713_v63  ;;  %v8694_v11 = vld [vmem:[#allocation33_spill] sm:$0xff] }
 0x367   : > { %v6333_v52 = vpop.permute.xlu0 %1927  ;;  %v2236_v58 = vsel %vm2231_vm10, %v2203_v10, %v6249_v57  ;;  %v2072_v22 = vsel %vm2066_vm5, %v2039_v2, %v5665_v1  ;;  %v2117_v57 = vsel %vm2099_vm4, %v2084_v55, %v5871_v51  ;;  %v8695_v55 = vld [vmem:[#allocation58_spill] sm:$0xff] }
 0x368   : > { %v6339_v32 = vpop.permute.xlu1 %1923  ;;  %v1938_v5 = vpop.permute.xlu2 %1937  ;;  %v2105_v21 = vsel %vm2099_vm4, %v2072_v22, %v5823_v45  ;;  %v2150_v54 = vsel %vm2132_vm6, %v2117_v57, %v5988_v9  ;;  %v8696_v57 = vld [vmem:[#allocation68_spill] sm:$0xff] }
 0x369   : > { %v2248_v41 = vsel %vm2231_vm10, %v2215_v47, %v1938_v5  ;;  %v2138_v8 = vsel %vm2132_vm6, %v2105_v21, %v5941_v3  ;;  %v2183_v47 = vsel %vm2165_vm8, %v2150_v54, %v6076_v42  ;;  %v4630_v42 = vld [vmem:[#allocation2 + $0x48] sm:$0xff] }
 0x36a   : > { %4520 = vmatmul.msk.f32.gmra.mxu0 %vm2277_vm9, %v2235_v59  ;;  %4533 = vmatmul.msk.f32.vlgmr.msra.gmra.mxu2 %vm2277_vm9, %v2248_v41  ;;  %v2171_v63 = vsel %vm2165_vm8, %v2138_v8, %v6040_v50  ;;  %v2216_v1 = vsel %vm2198_vm7, %v2183_v47, %v6206_v39  ;;  %v8685_v59 = vld [vmem:[#allocation7_spill] sm:$0xff]  ;;  %v2019_v39 = vsel %vm272_vm0, %v4631_v18, %v8686_v30  ;;  %v8688_v41 = vld [vmem:[#allocation82_spill] sm:$0xff] }
 0x36b   : > { %v2204_v51 = vsel %vm2198_vm7, %v2171_v63, %v6157_v26  ;;  %v2007_v50 = vsel %vm272_vm0, %v4630_v42, %v8685_v59  ;;  %v8687_v26 = vld [vmem:[#allocation60_spill] sm:$0xff]  ;;  %v2052_v0 = vsel %vm2033_vm3, %v2019_v39, %v8688_v41  ;;  %v8697_v8 = vld [vmem:[#allocation135_spill] sm:$0xff]  ;;  %v4635_v18 = vld [vmem:[#allocation2 + $0xf0] sm:$0xff] }
 0x36c   : > { %v2237_v3 = vsel %vm2231_vm10, %v2204_v51, %v6281_v6  ;;  %v2040_v31 = vsel %vm2033_vm3, %v2007_v50, %v8687_v26  ;;  %v2085_v25 = vsel %vm2066_vm5, %v2052_v0, %v5733_v20  ;;  %v4634_v42 = vld [vmem:[#allocation2 + $0x60] sm:$0xff]  ;;  %v8701_v59 = vld [vmem:[#allocation15_spill] sm:$0xff]  ;;  %v8702_v30 = vld [vmem:[#allocation30_spill] sm:$0xff] }
 0x36d   : > { %v2073_v6 = vsel %vm2066_vm5, %v2040_v31, %v5685_v4  ;;  %v2118_v62 = vsel %vm2099_vm4, %v2085_v25, %v5849_v14  ;;  %v2009_v50 = vsel %vm272_vm0, %v4634_v42, %v8701_v59  ;;  %v2021_v39 = vsel %vm272_vm0, %v4635_v18, %v8702_v30  ;;  %v8703_v26 = vld [vmem:[#allocation59_spill] sm:$0xff]  ;;  %v8704_v41 = vld [vmem:[#allocation81_spill] sm:$0xff]  ;;  %v8705_v0 = vld [vmem:[#allocation94_spill] sm:$0xff] }
 0x36e   : > { %v2106_v38 = vsel %vm2099_vm4, %v2073_v6, %v5801_v34  ;;  %v2151_v16 = vsel %vm2132_vm6, %v2118_v62, %v6001_v43  ;;  %v8689_v43 = vld [vmem:[#allocation11_spill] sm:$0xff]  ;;  %v2042_v31 = vsel %vm2033_vm3, %v2009_v50, %v8703_v26  ;;  %v8706_v25 = vld [vmem:[#allocation102_spill] sm:$0xff] }
 0x36f   : > { %v6359_v35 = vpop.permute.xlu0 %1933  ;;  %v2139_v46 = vsel %vm2132_vm6, %v2106_v38, %v5954_v23  ;;  %v2184_v4 = vsel %vm2165_vm8, %v2151_v16, %v6091_v60  ;;  %v2008_v37 = vsel %vm272_vm0, %v4632_v61, %v8689_v43  ;;  %v2075_v6 = vsel %vm2066_vm5, %v2042_v31, %v8705_v0  ;;  %v8707_v62 = vld [vmem:[#allocation118_spill] sm:$0xff]  ;;  %v8712_v43 = vld [vmem:[#allocation141_spill] sm:$0xff]  ;;  %v8726_v50 = vld [vmem:[#allocation143_spill] sm:$0xff] }
 0x370   : > { %v6363_v48 = vpop.permute.xlu1 %1929  ;;  %v2172_v10 = vsel %vm2165_vm8, %v2139_v46, %v6054_v24  ;;  %v2217_v34 = vsel %vm2198_vm7, %v2184_v4, %v6177_v53  ;;  %v4633_v24 = vld [vmem:[#allocation2 + $0xe0] sm:$0xff]  ;;  %v1944_v54 = vpop.permute.xlu2 %1943  ;;  %v2108_v46 = vsel %vm2099_vm4, %v2075_v6, %v8707_v62  ;;  %v8708_v16 = vld [vmem:[#allocation38_spill] sm:$0xff]  ;;  %v8728_v26 = vld [vmem:[#allocation163_spill] sm:$0xff] }
 0x371   : > { %v2205_v20 = vsel %vm2198_vm7, %v2172_v10, %v6141_v7  ;;  %v8691_v7 = vld [vmem:[#allocation51_spill] sm:$0xff]  ;;  %v8709_v4 = vld [vmem:[#allocation64_spill] sm:$0xff]  ;;  %v8725_v42 = vld [vmem:[#allocation134_spill] sm:$0xff] }
 0x372   : > { %4521 = vmatmul.msk.f32.gmra.mxu0 %vm2277_vm9, %v2236_v58  ;;  %v2238_v14 = vsel %vm2231_vm10, %v2205_v20, %v6305_v19  ;;  %v8690_v58 = vld [vmem:[#allocation25_spill] sm:$0xff]  ;;  %v2041_v53 = vsel %vm2033_vm3, %v2008_v37, %v8691_v7  ;;  %v2141_v20 = vsel %vm2132_vm6, %v2108_v46, %v8709_v4  ;;  %v8727_v30 = vld [vmem:[#allocation154_spill] sm:$0xff]  ;;  %v4638_v0 = vld [vmem:[#allocation2 + $0x78] sm:$0xff] }
 0x373   : > { %v2020_v60 = vsel %vm272_vm0, %v4633_v24, %v8690_v58  ;;  %v2074_v29 = vsel %vm2066_vm5, %v2041_v53, %v5699_v49  ;;  %v8698_v49 = vld [vmem:[#allocation144_spill] sm:$0xff]  ;;  %v8713_v24 = vld [vmem:[#allocation158_spill] sm:$0xff]  ;;  %v8730_v62 = vld [vmem:[#allocation29_spill] sm:$0xff] }
 0x374   : > { %v2053_v19 = vsel %vm2033_vm3, %v2020_v60, %v8692_v27  ;;  %v2107_v33 = vsel %vm2099_vm4, %v2074_v29, %v8693_v44  ;;  %v8714_v60 = vld [vmem:[#allocation167_spill] sm:$0xff]  ;;  %v8715_v29 = vld [vmem:[#allocation10_spill] sm:$0xff] }
 0x375   : > { %v2086_v36 = vsel %vm2066_vm5, %v2053_v19, %v5749_v12  ;;  %v2140_v22 = vsel %vm2132_vm6, %v2107_v33, %v8695_v55  ;;  %v8699_v12 = vld [vmem:[#allocation155_spill] sm:$0xff]  ;;  %v4636_v19 = vld [vmem:[#allocation2 + $0x68] sm:$0xff]  ;;  %v8716_v33 = vld [vmem:[#allocation22_spill] sm:$0xff] }
 0x376   : > { %v2119_v2 = vsel %vm2099_vm4, %v2086_v36, %v8694_v11  ;;  %v2173_v47 = vsel %vm2165_vm8, %v2140_v22, %v8697_v8  ;;  %v2010_v36 = vsel %vm272_vm0, %v4636_v19, %v8715_v29  ;;  %v4637_v44 = vld [vmem:[#allocation2 + $0xf8] sm:$0xff]  ;;  %v8718_v22 = vld [vmem:[#allocation86_spill] sm:$0xff] }
 0x377   : > { %v1940_v5 = vpop.permute.xlu0 %1939  ;;  %v2152_v21 = vsel %vm2132_vm6, %v2119_v2, %v8696_v57  ;;  %v2022_v11 = vsel %vm272_vm0, %v4637_v44, %v8716_v33  ;;  %v8717_v2 = vld [vmem:[#allocation66_spill] sm:$0xff]  ;;  %v8719_v57 = vld [vmem:[#allocation96_spill] sm:$0xff]  ;;  %v8740_v29 = vld [vmem:[#allocation147_spill] sm:$0xff] }
 0x378   : > { %v6396_v45 = vpop.permute.xlu1 %1935  ;;  %v2249_v9 = vsel %vm2231_vm10, %v2216_v1, %v1940_v5  ;;  %v2185_v63 = vsel %vm2165_vm8, %v2152_v21, %v8698_v49  ;;  %v2206_v1 = vsel %vm2198_vm7, %v2173_v47, %v8699_v12  ;;  %v8700_v5 = vld [vmem:[#allocation164_spill] sm:$0xff]  ;;  %v2043_v55 = vsel %vm2033_vm3, %v2010_v36, %v8717_v2  ;;  %v8721_v47 = vld [vmem:[#allocation114_spill] sm:$0xff]  ;;  %v8741_v44 = vld [vmem:[#allocation157_spill] sm:$0xff] }
 0x379   : > { %4534 = vmatmul.msk.f32.gmra.mxu2 %vm2277_vm9, %v2249_v9  ;;  %v2218_v51 = vsel %vm2198_vm7, %v2185_v63, %v8700_v5  ;;  %v2239_v9 = vsel %vm2231_vm10, %v2206_v1, %v6265_v40  ;;  %v2054_v40 = vsel %vm2033_vm3, %v2021_v39, %v8704_v41  ;;  %v2076_v21 = vsel %vm2066_vm5, %v2043_v55, %v8719_v57  ;;  %v8722_v63 = vld [vmem:[#allocation123_spill] sm:$0xff]  ;;  %v8723_v1 = vld [vmem:[#allocation57_spill] sm:$0xff]  ;;  %v8729_v6 = vld [vmem:[#allocation14_spill] sm:$0xff] }
 0x37a   : > { %4522 = vmatmul.msk.f32.gmra.mxu0 %vm2277_vm9, %v2237_v3  ;;  %v2251_v3 = vsel %vm2231_vm10, %v2218_v51, %v1944_v54  ;;  %v2087_v38 = vsel %vm2066_vm5, %v2054_v40, %v8706_v25  ;;  %v8720_v54 = vld [vmem:[#allocation104_spill] sm:$0xff]  ;;  %v2109_v49 = vsel %vm2099_vm4, %v2076_v21, %v8721_v47  ;;  %v2011_v25 = vsel %vm272_vm0, %v4638_v0, %v8729_v6  ;;  %v8732_v4 = vld [vmem:[#allocation78_spill] sm:$0xff] }
 0x37b   : > { %v2120_v10 = vsel %vm2099_vm4, %v2087_v38, %v8708_v16  ;;  %v2142_v5 = vsel %vm2132_vm6, %v2109_v49, %v8723_v1  ;;  %v8724_v51 = vld [vmem:[#allocation84_spill] sm:$0xff]  ;;  %v4639_v38 = vld [vmem:[#allocation2 + $0x108] sm:$0xff]  ;;  %v8743_v57 = vld [vmem:[#allocation18_spill] sm:$0xff] }
 0x37c   : > { %v2175_v59 = vsel %vm2165_vm8, %v2142_v5, %v8725_v42  ;;  %v2023_v46 = vsel %vm272_vm0, %v4639_v38, %v8730_v62  ;;  %v8731_v16 = vld [vmem:[#allocation56_spill] sm:$0xff]  ;;  %v8745_v49 = vld [vmem:[#allocation65_spill] sm:$0xff]  ;;  %v8747_v1 = vld [vmem:[#allocation95_spill] sm:$0xff] }
 0x37d   : > { %v2208_v39 = vsel %vm2198_vm7, %v2175_v59, %v8727_v30  ;;  %v8750_v59 = vld [vmem:[#allocation32_spill] sm:$0xff]  ;;  %v8754_v0 = vld [vmem:[#allocation142_spill] sm:$0xff] }
 0x37e   : > { %v2241_v41 = vsel %vm2231_vm10, %v2208_v39, %v6339_v32  ;;  %v2056_v32 = vsel %vm2033_vm3, %v2023_v46, %v8732_v4  ;;  %v8752_v39 = vld [vmem:[#allocation80_spill] sm:$0xff]  ;;  %v8756_v4 = vld [vmem:[#allocation13_spill] sm:$0xff] }
 0x380   : > { %v1942_v13 = vpop.permute.xlu1 %1941 }
 0x381   : > { %v2250_v23 = vsel %vm2231_vm10, %v2217_v34, %v1942_v13  ;;  %v8710_v34 = vld [vmem:[#allocation75_spill] sm:$0xff] }
 0x382   : > { %4523 = vmatmul.msk.f32.gmra.mxu0 %vm2277_vm9, %v2238_v14  ;;  %4535 = vmatmul.msk.f32.gmra.mxu2 %vm2277_vm9, %v2250_v23  ;;  %v2153_v13 = vsel %vm2132_vm6, %v2120_v10, %v8710_v34  ;;  %v1946_v14 = vpop.permute.xlu0 %1945  ;;  %v8711_v23 = vld [vmem:[#allocation132_spill] sm:$0xff]  ;;  %v2044_v10 = vsel %vm2033_vm3, %v2011_v25, %v8731_v16  ;;  %v8755_v25 = vld [vmem:[#allocation161_spill] sm:$0xff] }
 0x383   : > { %v2174_v61 = vsel %vm2165_vm8, %v2141_v20, %v8711_v23  ;;  %v2186_v37 = vsel %vm2165_vm8, %v2153_v13, %v8712_v43  ;;  %v8733_v20 = vld [vmem:[#allocation99_spill] sm:$0xff]  ;;  %v8735_v23 = vld [vmem:[#allocation117_spill] sm:$0xff]  ;;  %v8736_v43 = vld [vmem:[#allocation24_spill] sm:$0xff] }
 0x384   : > { %v2207_v58 = vsel %vm2198_vm7, %v2174_v61, %v8713_v24  ;;  %v2219_v7 = vsel %vm2198_vm7, %v2186_v37, %v8714_v60  ;;  %v2077_v34 = vsel %vm2066_vm5, %v2044_v10, %v8733_v20  ;;  %v8734_v13 = vld [vmem:[#allocation107_spill] sm:$0xff]  ;;  %v8738_v60 = vld [vmem:[#allocation74_spill] sm:$0xff]  ;;  %v4643_v20 = vld [vmem:[#allocation2 + $0x120] sm:$0xff] }
 0x385   : > { %v2240_v53 = vsel %vm2231_vm10, %v2207_v58, %v6301_v28  ;;  %v2252_v27 = vsel %vm2231_vm10, %v2219_v7, %v1946_v14  ;;  %v2055_v28 = vsel %vm2033_vm3, %v2022_v11, %v8718_v22  ;;  %v2089_v14 = vsel %vm2066_vm5, %v2056_v32, %v8734_v13  ;;  %v8737_v24 = vld [vmem:[#allocation47_spill] sm:$0xff]  ;;  %v8742_v11 = vld [vmem:[#allocation166_spill] sm:$0xff] }
 0x386   : > { %v2088_v8 = vsel %vm2066_vm5, %v2055_v28, %v8720_v54  ;;  %v2110_v61 = vsel %vm2099_vm4, %v2077_v34, %v8735_v23  ;;  %v2122_v37 = vsel %vm2099_vm4, %v2089_v14, %v8736_v43  ;;  %v4640_v28 = vld [vmem:[#allocation2 + $0x80] sm:$0xff]  ;;  %v4641_v54 = vld [vmem:[#allocation2 + $0x110] sm:$0xff]  ;;  %v8757_v34 = vld [vmem:[#allocation27_spill] sm:$0xff] }
 0x387   : > { %v2121_v12 = vsel %vm2099_vm4, %v2088_v8, %v8722_v63  ;;  %v2143_v58 = vsel %vm2132_vm6, %v2110_v61, %v8737_v24  ;;  %v2155_v7 = vsel %vm2132_vm6, %v2122_v37, %v8738_v60  ;;  %v2012_v21 = vsel %vm272_vm0, %v4640_v28, %v8743_v57  ;;  %v8744_v8 = vld [vmem:[#allocation35_spill] sm:$0xff]  ;;  %v4642_v10 = vld [vmem:[#allocation2 + $0x90] sm:$0xff]  ;;  %v8758_v14 = vld [vmem:[#allocation72_spill] sm:$0xff] }
 0x388   : > { %v2188_v36 = vsel %vm2165_vm8, %v2155_v7, %v8740_v29  ;;  %v2024_v47 = vsel %vm272_vm0, %v4641_v54, %v8744_v8  ;;  %v2045_v63 = vsel %vm2033_vm3, %v2012_v21, %v8745_v49  ;;  %v2013_v32 = vsel %vm272_vm0, %v4642_v10, %v8756_v4  ;;  %v8759_v23 = vld [vmem:[#allocation89_spill] sm:$0xff]  ;;  %v8760_v61 = vld [vmem:[#allocation98_spill] sm:$0xff]  ;;  %v8763_v7 = vld [vmem:[#allocation23_spill] sm:$0xff] }
 0x389   : > { %v2221_v2 = vsel %vm2198_vm7, %v2188_v36, %v8742_v11  ;;  %v2078_v5 = vsel %vm2066_vm5, %v2045_v63, %v8747_v1  ;;  %v2025_v13 = vsel %vm272_vm0, %v4643_v20, %v8757_v34  ;;  %v8761_v37 = vld [vmem:[#allocation106_spill] sm:$0xff]  ;;  %v8765_v29 = vld [vmem:[#allocation127_spill] sm:$0xff]  ;;  %v8769_v57 = vld [vmem:[#allocation165_spill] sm:$0xff] }
 0x38a   : > { %4524 = vmatmul.msk.f32.gmra.mxu0 %vm2277_vm9, %v2239_v9  ;;  %4536 = vmatmul.msk.f32.gmra.mxu2 %vm2277_vm9, %v2251_v3  ;;  %v2154_v9 = vsel %vm2132_vm6, %v2121_v12, %v8724_v51  ;;  %v1948_v3 = vpop.permute.xlu1 %1947  ;;  %v8746_v12 = vld [vmem:[#allocation85_spill] sm:$0xff]  ;;  %v8748_v51 = vld [vmem:[#allocation103_spill] sm:$0xff] }
 0x38b   : > { %v2187_v18 = vsel %vm2165_vm8, %v2154_v9, %v8726_v50  ;;  %v8770_v49 = vld [vmem:[#allocation17_spill] sm:$0xff] }
 0x38c   : > { %v2220_v31 = vsel %vm2198_vm7, %v2187_v18, %v8728_v26  ;;  %v8751_v18 = vld [vmem:[#allocation70_spill] sm:$0xff]  ;;  %v8783_v4 = vld [vmem:[#allocation169_spill] sm:$0xff] }
 0x38d   : > { %v2253_v40 = vsel %vm2231_vm10, %v2220_v31, %v1948_v3  ;;  %v8749_v3 = vld [vmem:[#allocation121_spill] sm:$0xff]  ;;  %v1952_v31 = vpop.permute.xlu0 %1951 }
 0x38e   : > { %v2111_v42 = vsel %vm2099_vm4, %v2078_v5, %v8749_v3  ;;  %v8772_v5 = vld [vmem:[#allocation61_spill] sm:$0xff] }
 0x38f   : > { %v2144_v30 = vsel %vm2132_vm6, %v2111_v42, %v8751_v18  ;;  %v8774_v3 = vld [vmem:[#allocation101_spill] sm:$0xff]  ;;  %v8776_v18 = vld [vmem:[#allocation120_spill] sm:$0xff] }
 0x392   : > { %4525 = vmatmul.msk.f32.gmra.mxu0 %vm2277_vm9, %v2240_v53  ;;  %4537 = vmatmul.msk.f32.gmra.mxu2 %vm2277_vm9, %v2252_v27  ;;  %v1950_v53 = vpop.permute.xlu2 %1949  ;;  %v8739_v27 = vld [vmem:[#allocation138_spill] sm:$0xff] }
 0x393   : > { %v2176_v19 = vsel %vm2165_vm8, %v2143_v58, %v8739_v27  ;;  %v2254_v22 = vsel %vm2231_vm10, %v2221_v2, %v1950_v53  ;;  %v8762_v58 = vld [vmem:[#allocation116_spill] sm:$0xff]  ;;  %v8764_v27 = vld [vmem:[#allocation63_spill] sm:$0xff]  ;;  %v8767_v2 = vld [vmem:[#allocation146_spill] sm:$0xff] }
 0x394   : > { %v2209_v33 = vsel %vm2198_vm7, %v2176_v19, %v8741_v44  ;;  %v1954_v44 = vpop.permute.xlu1 %1953 }
 0x395   : > { %v2242_v55 = vsel %vm2231_vm10, %v2209_v33, %v6285_v17  ;;  %v2057_v17 = vsel %vm2033_vm3, %v2024_v47, %v8746_v12  ;;  %v8766_v33 = vld [vmem:[#allocation137_spill] sm:$0xff]  ;;  %v4644_v47 = vld [vmem:[#allocation2 + $0x98] sm:$0xff] }
 0x396   : > { %v2090_v9 = vsel %vm2066_vm5, %v2057_v17, %v8748_v51  ;;  %v2014_v63 = vsel %vm272_vm0, %v4644_v47, %v8770_v49  ;;  %v4645_v12 = vld [vmem:[#allocation2 + $0x128] sm:$0xff]  ;;  %v8771_v17 = vld [vmem:[#allocation34_spill] sm:$0xff]  ;;  %v8797_v49 = vld [vmem:[#allocation172_spill] sm:$0xff] }
 0x397   : > { %v2123_v50 = vsel %vm2099_vm4, %v2090_v9, %v8750_v59  ;;  %v2026_v1 = vsel %vm272_vm0, %v4645_v12, %v8771_v17  ;;  %v2047_v51 = vsel %vm2033_vm3, %v2014_v63, %v8772_v5  ;;  %v8773_v9 = vld [vmem:[#allocation83_spill] sm:$0xff]  ;;  %v8775_v59 = vld [vmem:[#allocation110_spill] sm:$0xff]  ;;  %v8798_v5 = vld [vmem:[#allocation16_spill] sm:$0xff] }
 0x398   : > { %v2156_v26 = vsel %vm2132_vm6, %v2123_v50, %v8752_v39  ;;  %v2080_v42 = vsel %vm2066_vm5, %v2047_v51, %v8774_v3  ;;  %v8777_v39 = vld [vmem:[#allocation43_spill] sm:$0xff] }
 0x399   : > { %v2189_v6 = vsel %vm2165_vm8, %v2156_v26, %v8754_v0 }
 0x39a   : > { %4526 = vmatmul.msk.f32.gmra.mxu0 %vm2277_vm9, %v2241_v41  ;;  %4538 = vmatmul.msk.f32.gmra.mxu2 %vm2277_vm9, %v2253_v40  ;;  %v8753_v41 = vld [vmem:[#allocation133_spill] sm:$0xff]  ;;  %v2222_v62 = vsel %vm2198_vm7, %v2189_v6, %v6237_v56  ;;  %v2046_v56 = vsel %vm2033_vm3, %v2013_v32, %v8758_v14  ;;  %v1956_v6 = vpop.permute.xlu2 %1955 }
 0x39b   : > { %v2177_v40 = vsel %vm2165_vm8, %v2144_v30, %v8753_v41  ;;  %v2255_v16 = vsel %vm2231_vm10, %v2222_v62, %v1952_v31  ;;  %v2079_v43 = vsel %vm2066_vm5, %v2046_v56, %v8760_v61  ;;  %v2113_v30 = vsel %vm2099_vm4, %v2080_v42, %v8776_v18  ;;  %v8778_v31 = vld [vmem:[#allocation52_spill] sm:$0xff]  ;;  %v8781_v62 = vld [vmem:[#allocation150_spill] sm:$0xff]  ;;  %v8784_v14 = vld [vmem:[#allocation21_spill] sm:$0xff] }
 0x39c   : > { %v2210_v38 = vsel %vm2198_vm7, %v2177_v40, %v8755_v25  ;;  %v2112_v60 = vsel %vm2099_vm4, %v2079_v43, %v8762_v58  ;;  %v2146_v41 = vsel %vm2132_vm6, %v2113_v30, %v8778_v31  ;;  %v8779_v40 = vld [vmem:[#allocation79_spill] sm:$0xff]  ;;  %v8780_v25 = vld [vmem:[#allocation140_spill] sm:$0xff]  ;;  %v8788_v58 = vld [vmem:[#allocation97_spill] sm:$0xff] }
 0x39d   : > { %v2243_v46 = vsel %vm2231_vm10, %v2210_v38, %v6333_v52  ;;  %v2058_v52 = vsel %vm2033_vm3, %v2025_v13, %v8759_v23  ;;  %v2145_v19 = vsel %vm2132_vm6, %v2112_v60, %v8764_v27  ;;  %v2179_v38 = vsel %vm2165_vm8, %v2146_v41, %v8780_v25  ;;  %v4646_v13 = vld [vmem:[#allocation2 + $0xa8] sm:$0xff]  ;;  %v4647_v23 = vld [vmem:[#allocation2 + $0x138] sm:$0xff]  ;;  %v8790_v27 = vld [vmem:[#allocation122_spill] sm:$0xff] }
 0x39e   : > { %v2091_v24 = vsel %vm2066_vm5, %v2058_v52, %v8761_v37  ;;  %v2178_v11 = vsel %vm2165_vm8, %v2145_v19, %v8766_v33  ;;  %v2015_v56 = vsel %vm272_vm0, %v4646_v13, %v8784_v14  ;;  %v8785_v52 = vld [vmem:[#allocation40_spill] sm:$0xff]  ;;  %v8786_v43 = vld [vmem:[#allocation71_spill] sm:$0xff]  ;;  %v8792_v33 = vld [vmem:[#allocation62_spill] sm:$0xff] }
 0x39f   : > { %v2124_v53 = vsel %vm2099_vm4, %v2091_v24, %v8763_v7  ;;  %v2027_v61 = vsel %vm272_vm0, %v4647_v23, %v8785_v52  ;;  %v2048_v37 = vsel %vm2033_vm3, %v2015_v56, %v8786_v43  ;;  %v8787_v24 = vld [vmem:[#allocation88_spill] sm:$0xff]  ;;  %v8789_v7 = vld [vmem:[#allocation105_spill] sm:$0xff]  ;;  %v8804_v31 = vld [vmem:[#allocation119_spill] sm:$0xff] }
 0x3a0   : > { %v2157_v36 = vsel %vm2132_vm6, %v2124_v53, %v8765_v29  ;;  %v2081_v60 = vsel %vm2066_vm5, %v2048_v37, %v8788_v58  ;;  %v8791_v29 = vld [vmem:[#allocation37_spill] sm:$0xff]  ;;  %v8802_v18 = vld [vmem:[#allocation100_spill] sm:$0xff]  ;;  %v8812_v43 = vld [vmem:[#allocation39_spill] sm:$0xff] }
 0x3a1   : > { %v2114_v19 = vsel %vm2099_vm4, %v2081_v60, %v8790_v27  ;;  %v8800_v42 = vld [vmem:[#allocation77_spill] sm:$0xff]  ;;  %v8811_v14 = vld [vmem:[#allocation168_spill] sm:$0xff] }
 0x3a2   : > { %4527 = vmatmul.msk.f32.gmra.mxu0 %vm2277_vm9, %v2242_v55  ;;  %4539 = vmatmul.msk.f32.gmra.mxu2 %vm2277_vm9, %v2254_v22  ;;  %v2190_v55 = vsel %vm2165_vm8, %v2157_v36, %v8767_v2  ;;  %v8768_v22 = vld [vmem:[#allocation156_spill] sm:$0xff]  ;;  %v8793_v2 = vld [vmem:[#allocation126_spill] sm:$0xff]  ;;  %v8806_v25 = vld [vmem:[#allocation69_spill] sm:$0xff] }
 0x3a3   : > { %v2211_v28 = vsel %vm2198_vm7, %v2178_v11, %v8768_v22  ;;  %v2223_v21 = vsel %vm2198_vm7, %v2190_v55, %v8769_v57  ;;  %v2147_v11 = vsel %vm2132_vm6, %v2114_v19, %v8792_v33  ;;  %v1958_v22 = vpop.permute.xlu0 %1957  ;;  %v8814_v58 = vld [vmem:[#allocation112_spill] sm:$0xff]  ;;  %v8816_v27 = vld [vmem:[#allocation125_spill] sm:$0xff] }
 0x3a4   : > { %v2244_v54 = vsel %vm2231_vm10, %v2211_v28, %v6363_v48  ;;  %v2256_v8 = vsel %vm2231_vm10, %v2223_v21, %v1954_v44  ;;  %v2059_v48 = vsel %vm2033_vm3, %v2026_v1, %v8773_v9  ;;  %v2616_v44 = vld [vmem:[#allocation3 + $0x1] sm:$0xff]  ;;  %v8794_v28 = vld [vmem:[#allocation136_spill] sm:$0xff]  ;;  %v8795_v21 = vld [vmem:[#allocation145_spill] sm:$0xff] }
 0x3a5   : > { %v2092_v50 = vsel %vm2066_vm5, %v2059_v48, %v8775_v59  ;;  %2905 = vrot.lane.b32.xlu0 %v2616_v44, %s4676_s8  ;;  %v2180_v57 = vsel %vm2165_vm8, %v2147_v11, %v8794_v28  ;;  %v4648_v1 = vld [vmem:[#allocation2 + $0xb0] sm:$0xff]  ;;  %v4649_v9 = vld [vmem:[#allocation2 + $0x140] sm:$0xff]  ;;  %v8799_v48 = vld [vmem:[#allocation31_spill] sm:$0xff] }
 0x3a6   : > { %v2125_v26 = vsel %vm2099_vm4, %v2092_v50, %v8777_v39  ;;  %v2016_v51 = vsel %vm272_vm0, %v4648_v1, %v8798_v5  ;;  %v2028_v3 = vsel %vm272_vm0, %v4649_v9, %v8799_v48  ;;  %v8801_v50 = vld [vmem:[#allocation92_spill] sm:$0xff]  ;;  %v8803_v39 = vld [vmem:[#allocation109_spill] sm:$0xff]  ;;  %v8818_v11 = vld [vmem:[#allocation171_spill] sm:$0xff] }
 0x3a7   : > { %v2158_v0 = vsel %vm2132_vm6, %v2125_v26, %v8779_v40  ;;  %v2049_v59 = vsel %vm2033_vm3, %v2016_v51, %v8800_v42  ;;  %v8805_v40 = vld [vmem:[#allocation28_spill] sm:$0xff]  ;;  %v4651_v28 = vld [vmem:[#allocation2 + $0x158] sm:$0xff]  ;;  %v8823_v5 = vld [vmem:[#allocation129_spill] sm:$0xff] }
 0x3a8   : > { %v2082_v30 = vsel %vm2066_vm5, %v2049_v59, %v8802_v18  ;;  %v8824_v48 = vld [vmem:[#allocation148_spill] sm:$0xff]  ;;  %v8825_v59 = vld [vmem:[#allocation174_spill] sm:$0xff] }
 0x3a9   : > { %v2115_v41 = vsel %vm2099_vm4, %v2082_v30, %v8804_v31  ;;  %v4652_v30 = vld [vmem:[#allocation2 + $0x168] sm:$0xff] }
 0x3aa   : > { %4528 = vmatmul.msk.f32.gmra.mxu0 %vm2277_vm9, %v2243_v46  ;;  %4540 = vmatmul.msk.f32.gmra.mxu2 %vm2277_vm9, %v2255_v16  ;;  %v2191_v46 = vsel %vm2165_vm8, %v2158_v0, %v8781_v62  ;;  %v8782_v16 = vld [vmem:[#allocation160_spill] sm:$0xff]  ;;  %v8807_v62 = vld [vmem:[#allocation130_spill] sm:$0xff] }
 0x3ab   : > { %v2212_v10 = vsel %vm2198_vm7, %v2179_v38, %v8782_v16  ;;  %v2224_v32 = vsel %vm2198_vm7, %v2191_v46, %v8783_v4  ;;  %v2148_v38 = vsel %vm2132_vm6, %v2115_v41, %v8806_v25  ;;  %v1960_v16 = vpop.permute.xlu1 %1959  ;;  %v1964_v9 = vpop.permute.xlu0 %1963  ;;  %v8827_v41 = vld [vmem:[#allocation93_spill] sm:$0xff] }
 0x3ac   : > { %v2245_v20 = vsel %vm2231_vm10, %v2212_v10, %v6307_v15  ;;  %v2257_v34 = vsel %vm2231_vm10, %v2224_v32, %v1956_v6  ;;  %v2060_v15 = vsel %vm2033_vm3, %v2027_v61, %v8787_v24  ;;  %v2617_v6 = vld [vmem:[#allocation3 + $0x9] sm:$0xff]  ;;  %v8809_v32 = vld [vmem:[#allocation149_spill] sm:$0xff]  ;;  %v4650_v61 = vld [vmem:[#allocation2 + $0x150] sm:$0xff] }
 0x3ad   : > { %v2093_v53 = vsel %vm2066_vm5, %v2060_v15, %v8789_v7  ;;  %2907 = vrot.lane.b32.xlu1 %v2617_v6, %s4676_s8  ;;  %v8808_v10 = vld [vmem:[#allocation139_spill] sm:$0xff]  ;;  %v2029_v37 = vsel %vm272_vm0, %v4650_v61, %v8812_v43  ;;  %v8815_v7 = vld [vmem:[#allocation48_spill] sm:$0xff] }
 0x3ae   : > { %v2126_v36 = vsel %vm2099_vm4, %v2093_v53, %v8791_v29  ;;  %v2181_v4 = vsel %vm2165_vm8, %v2148_v38, %v8808_v10  ;;  %v8813_v24 = vld [vmem:[#allocation87_spill] sm:$0xff]  ;;  %v1962_v29 = vpop.permute.xlu2 %1961  ;;  %v8833_v61 = vld [vmem:[#allocation44_spill] sm:$0xff] }
 0x3af   : > { %v2159_v55 = vsel %vm2132_vm6, %v2126_v36, %v8793_v2  ;;  %v2062_v15 = vsel %vm2033_vm3, %v2029_v37, %v8813_v24  ;;  %v8817_v36 = vld [vmem:[#allocation152_spill] sm:$0xff]  ;;  %v8834_v24 = vld [vmem:[#allocation90_spill] sm:$0xff] }
 0x3b0   : > { %v2095_v60 = vsel %vm2066_vm5, %v2062_v15, %v8814_v58  ;;  %v8835_v58 = vld [vmem:[#allocation113_spill] sm:$0xff] }
 0x3b1   : > { %v2128_v53 = vsel %vm2099_vm4, %v2095_v60, %v8815_v7 }
 0x3b2   : > { %4529 = vmatmul.msk.f32.gmra.mxu0 %vm2277_vm9, %v2244_v54  ;;  %4541 = vmatmul.msk.f32.gmra.mxu2 %vm2277_vm9, %v2256_v8  ;;  %v2192_v54 = vsel %vm2165_vm8, %v2159_v55, %v8795_v21  ;;  %v8796_v8 = vld [vmem:[#allocation162_spill] sm:$0xff]  ;;  %v2161_v19 = vsel %vm2132_vm6, %v2128_v53, %v8816_v27  ;;  %v8836_v27 = vld [vmem:[#allocation53_spill] sm:$0xff] }
 0x3b3   : > { %v2213_v47 = vsel %vm2198_vm7, %v2180_v57, %v8796_v8  ;;  %v2225_v63 = vsel %vm2198_vm7, %v2192_v54, %v8797_v49  ;;  %v2194_v44 = vsel %vm2165_vm8, %v2161_v19, %v8817_v36  ;;  %v8819_v57 = vld [vmem:[#allocation45_spill] sm:$0xff]  ;;  %v8820_v8 = vld [vmem:[#allocation91_spill] sm:$0xff]  ;;  %v8821_v49 = vld [vmem:[#allocation108_spill] sm:$0xff] }
 0x3b4   : > { %v2246_v12 = vsel %vm2231_vm10, %v2213_v47, %v6359_v35  ;;  %v2258_v17 = vsel %vm2231_vm10, %v2225_v63, %v1958_v22  ;;  %v2061_v35 = vsel %vm2033_vm3, %v2028_v3, %v8801_v50  ;;  %v2227_v2 = vsel %vm2198_vm7, %v2194_v44, %v8818_v11 }
 0x3b5   : > { %v2094_v26 = vsel %vm2066_vm5, %v2061_v35, %v8803_v39  ;;  %v2260_v22 = vsel %vm2231_vm10, %v2227_v2, %v1962_v29  ;;  %v2030_v21 = vsel %vm272_vm0, %v4651_v28, %v8819_v57  ;;  %v8826_v39 = vld [vmem:[#allocation36_spill] sm:$0xff] }
 0x3b6   : > { %v2127_v0 = vsel %vm2099_vm4, %v2094_v26, %v8805_v40  ;;  %v2063_v47 = vsel %vm2033_vm3, %v2030_v21, %v8820_v8  ;;  %v2031_v26 = vsel %vm272_vm0, %v4652_v30, %v8826_v39  ;;  %v8837_v29 = vld [vmem:[#allocation128_spill] sm:$0xff]  ;;  %v1968_v44 = vpop.permute.xlu2 %1967 }
 0x3b7   : > { %v2160_v46 = vsel %vm2132_vm6, %v2127_v0, %v8807_v62  ;;  %v2096_v63 = vsel %vm2066_vm5, %v2063_v47, %v8821_v49  ;;  %v2064_v40 = vsel %vm2033_vm3, %v2031_v26, %v8827_v41  ;;  %v8828_v0 = vld [vmem:[#allocation111_spill] sm:$0xff]  ;;  %v8829_v62 = vld [vmem:[#allocation124_spill] sm:$0xff] }
 0x3b8   : > { %v2097_v6 = vsel %vm2066_vm5, %v2064_v40, %v8828_v0 }
 0x3ba   : > { %4530 = vmatmul.msk.f32.gmra.mxu0 %vm2277_vm9, %v2245_v20  ;;  %4542 = vmatmul.msk.f32.gmra.mxu2 %vm2277_vm9, %v2257_v34  ;;  %v2193_v20 = vsel %vm2165_vm8, %v2160_v46, %v8809_v32  ;;  %v8810_v34 = vld [vmem:[#allocation159_spill] sm:$0xff]  ;;  %v2130_v46 = vsel %vm2099_vm4, %v2097_v6, %v8829_v62 }
 0x3bb   : > { %v2214_v13 = vsel %vm2198_vm7, %v2181_v4, %v8810_v34  ;;  %v2226_v56 = vsel %vm2198_vm7, %v2193_v20, %v8811_v14  ;;  %v1966_v4 = vpop.permute.xlu1 %1965  ;;  %v8831_v32 = vld [vmem:[#allocation151_spill] sm:$0xff] }
 0x3bc   : > { %v2247_v23 = vsel %vm2231_vm10, %v2214_v13, %v6396_v45  ;;  %v2259_v52 = vsel %vm2231_vm10, %v2226_v56, %v1960_v16  ;;  %v6744_v45 = vld [vmem:[%s8386_s3] ss:$0 sm:$0xff]  ;;  %v8830_v16 = vld [vmem:[#allocation131_spill] sm:$0xff]  ;;  %v8832_v13 = vld [vmem:[#allocation170_spill] sm:$0xff] }
 0x3bd   : > { %v2163_v10 = vsel %vm2132_vm6, %v2130_v46, %v8830_v16 }
 0x3be   : > { %v2196_v20 = vsel %vm2165_vm8, %v2163_v10, %v8831_v32 }
 0x3bf   : > { %v2229_v14 = vsel %vm2198_vm7, %v2196_v20, %v8832_v13 }
 0x3c2   : > { %4531 = vmatmul.msk.f32.gmra.mxu0 %vm2277_vm9, %v2246_v12  ;;  %4543 = vmatmul.msk.f32.gmra.mxu2 %vm2277_vm9, %v2258_v17  ;;  %v8822_v17 = vld [vmem:[#allocation42_spill] sm:$0xff] }
 0x3c3   : > { %v2129_v1 = vsel %vm2099_vm4, %v2096_v63, %v8822_v17 }
 0x3c4   : > { %v2162_v51 = vsel %vm2132_vm6, %v2129_v1, %v8823_v5 }
 0x3c5   : > { %v2195_v3 = vsel %vm2165_vm8, %v2162_v51, %v8824_v48 }
 0x3c6   : > { %v2228_v50 = vsel %vm2198_vm7, %v2195_v3, %v8825_v59 }
 0x3c7   : > { %v2261_v18 = vsel %vm2231_vm10, %v2228_v50, %v1964_v9 }
 0x3ca   : > { %4532 = vmatmul.msk.f32.gmra.mxu0 %vm2277_vm9, %v2247_v23  ;;  %4544 = vmatmul.msk.f32.gmra.mxu2 %vm2277_vm9, %v2259_v52  ;;  %v2262_v23 = vsel %vm2231_vm10, %v2229_v14, %v1966_v4  ;;  %v4653_v52 = vld [vmem:[#allocation2 + $0x170] sm:$0xff] }
 0x3cb   : > { %v2032_v43 = vsel %vm272_vm0, %v4653_v52, %v8833_v61 }
 0x3cc   : > { %v2065_v15 = vsel %vm2033_vm3, %v2032_v43, %v8834_v24 }
 0x3cd   : > { %v2098_v60 = vsel %vm2066_vm5, %v2065_v15, %v8835_v58 }
 0x3ce   : > { %v2131_v19 = vsel %vm2099_vm4, %v2098_v60, %v8836_v27 }
 0x3cf   : > { %v2391_v33 = vpop.f32.mrf.mxu0  ;;  %v2164_v36 = vsel %vm2132_vm6, %v2131_v19, %v8837_v29 }
 0x3d0   : > { %v2392_v55 = vadd.f32 %v6744_v45, %v2391_v33  ;;  %v8838_v33 = vld [vmem:[#allocation153_spill] sm:$0xff] }
 0x3d1   : > { %v2197_v11 = vsel %vm2165_vm8, %v2164_v36, %v8838_v33 }
 0x3d2   : > { %v2487_v54 = vmax.f32 %v2392_v55, 0.0  ;;  %4545 = vmatmul.msk.f32.gmra.mxu2 %vm2277_vm9, %v2260_v22  ;;  %v8839_v55 = vld [vmem:[#allocation173_spill] sm:$0xff] }
 0x3d3   : > { %v2230_v22 = vsel %vm2198_vm7, %v2197_v11, %v8839_v55 }
 0x3d4   : > { %v2519_v12 = vsel %vm622_vm1, %v2487_v54, 0.0  ;;  %v2263_v57 = vsel %vm2231_vm10, %v2230_v22, %v1968_v44 }
 0x3d5   : > { %2552 = vst.msk [vmem:[#allocation3 + $0x19] sm:$0xff] %vm272_vm0, %v2519_v12 }
 0x3d7   : > { %v2394_v42 = vpop.f32.mrf.mxu0 }
 0x3d8   : > { %v2395_v35 = vadd.f32 %v6744_v45, %v2394_v42 }
 0x3da   : > { %v2488_v31 = vmax.f32 %v2395_v35, 0.0  ;;  %4546 = vmatmul.msk.f32.gmra.mxu2 %vm2277_vm9, %v2261_v18 }
 0x3dc   : > { %v2520_v25 = vsel %vm622_vm1, %v2488_v31, 0.0  ;;  %v6783_v38 = vld [vmem:[#allocation3 + $0x19] sm:$0xff] }
 0x3dd   : > { %2553 = vst.msk [vmem:[#allocation3 + $0x21] sm:$0xff] %vm272_vm0, %v2520_v25  ;;  %2909 = vrot.lane.b32.xlu2 %v6783_v38, %s4676_s8 }
 0x3df   : > { %v2397_v34 = vpop.f32.mrf.mxu0 }
 0x3e0   : > { %v2398_v56 = vadd.f32 %v6744_v45, %v2397_v34 }
 0x3e2   : > { %v2489_v37 = vmax.f32 %v2398_v56, 0.0  ;;  %4547 = vmatmul.msk.f32.gmra.mxu2 %vm2277_vm9, %v2262_v23 }
 0x3e4   : > { %v2521_v7 = vsel %vm622_vm1, %v2489_v37, 0.0  ;;  %v6806_v53 = vld [vmem:[#allocation3 + $0x21] sm:$0xff] }
 0x3e5   : > { %2554 = vst.msk [vmem:[#allocation3 + $0x31] sm:$0xff] %vm272_vm0, %v2521_v7  ;;  %2911 = vrot.lane.b32.xlu0 %v6806_v53, %s4676_s8 }
 0x3e7   : > { %v2400_v2 = vpop.f32.mrf.mxu0 }
 0x3e8   : > { %v2401_v28 = vadd.f32 %v6744_v45, %v2400_v2 }
 0x3ea   : > { %v2490_v21 = vmax.f32 %v2401_v28, 0.0  ;;  %4548 = vmatmul.msk.f32.gmra.mxu2 %vm2277_vm9, %v2263_v57 }
 0x3ec   : > { %v2522_v54 = vsel %vm622_vm1, %v2490_v21, 0.0  ;;  %v6823_v8 = vld [vmem:[#allocation3 + $0x31] sm:$0xff] }
 0x3ed   : > { %2555 = vst.msk [vmem:[#allocation3 + $0x39] sm:$0xff] %vm272_vm0, %v2522_v54  ;;  %2913 = vrot.lane.b32.xlu1 %v6823_v8, %s4676_s8  ;;  %v2439_v47 = vpop.f32.mrf.mxu2 }
 0x3ee   : > { %v2440_v49 = vadd.f32 %v6744_v45, %v2439_v47 }
 0x3ef   : > { %v2403_v63 = vpop.f32.mrf.mxu0 }
 0x3f0   : > { %v2404_v12 = vadd.f32 %v6744_v45, %v2403_v63  ;;  %v2503_v17 = vmax.f32 %v2440_v49, 0.0 }
 0x3f2   : > { %v2491_v1 = vmax.f32 %v2404_v12, 0.0  ;;  %v2535_v5 = vsel %vm622_vm1, %v2503_v17, 0.0 }
 0x3f3   : > { %2568 = vst.msk [vmem:[#allocation3 + $0xd9] sm:$0xff] %vm272_vm0, %v2535_v5 }
 0x3f4   : > { %v2523_v51 = vsel %vm622_vm1, %v2491_v1, 0.0  ;;  %v6833_v9 = vld [vmem:[#allocation3 + $0x39] sm:$0xff] }
 0x3f5   : > { %2556 = vst.msk [vmem:[#allocation3 + $0x49] sm:$0xff] %vm272_vm0, %v2523_v51  ;;  %2915 = vrot.lane.b32.xlu2 %v6833_v9, %s4676_s8 }
 0x3f7   : > { %v2406_v48 = vpop.f32.mrf.mxu0 }
 0x3f8   : > { %v2407_v3 = vadd.f32 %v6744_v45, %v2406_v48 }
 0x3fa   : > { %v2492_v42 = vmax.f32 %v2407_v3, 0.0 }
 0x3fc   : > { %v2524_v59 = vsel %vm622_vm1, %v2492_v42, 0.0  ;;  %v2442_v50 = vpop.f32.mrf.mxu2  ;;  %v6840_v35 = vld [vmem:[#allocation3 + $0x49] sm:$0xff] }
 0x3fd   : > { %2557 = vst.msk [vmem:[#allocation3 + $0x51] sm:$0xff] %vm272_vm0, %v2524_v59  ;;  %v2443_v18 = vadd.f32 %v6744_v45, %v2442_v50  ;;  %2917 = vrot.lane.b32.xlu0 %v6840_v35, %s4676_s8 }
 0x3ff   : > { %v2504_v30 = vmax.f32 %v2443_v18, 0.0  ;;  %v2409_v39 = vpop.f32.mrf.mxu0 }
 0x400   : > { %v2410_v26 = vadd.f32 %v6744_v45, %v2409_v39 }
 0x401   : > { %v2536_v31 = vsel %vm622_vm1, %v2504_v30, 0.0 }
 0x402   : > { %2569 = vst.msk [vmem:[#allocation3 + $0xe1] sm:$0xff] %vm272_vm0, %v2536_v31  ;;  %v2493_v41 = vmax.f32 %v2410_v26, 0.0 }
 0x404   : > { %v2525_v40 = vsel %vm622_vm1, %v2493_v41, 0.0  ;;  %v6850_v0 = vld [vmem:[#allocation3 + $0x51] sm:$0xff] }
 0x405   : > { %2558 = vst.msk [vmem:[#allocation3 + $0x61] sm:$0xff] %vm272_vm0, %v2525_v40  ;;  %v2445_v6 = vpop.f32.mrf.mxu2  ;;  %2919 = vrot.lane.b32.xlu1 %v6850_v0, %s4676_s8 }
 0x406   : > { %v2446_v25 = vadd.f32 %v6744_v45, %v2445_v6 }
 0x407   : > { %v2412_v62 = vpop.f32.mrf.mxu0 }
 0x408   : > { %v2505_v46 = vmax.f32 %v2446_v25, 0.0  ;;  %v2413_v16 = vadd.f32 %v6744_v45, %v2412_v62 }
 0x40a   : > { %v2537_v10 = vsel %vm622_vm1, %v2505_v46, 0.0  ;;  %v2494_v4 = vmax.f32 %v2413_v16, 0.0 }
 0x40b   : > { %2570 = vst.msk [vmem:[#allocation3 + $0xf1] sm:$0xff] %vm272_vm0, %v2537_v10 }
 0x40c   : > { %v2526_v32 = vsel %vm622_vm1, %v2494_v4, 0.0  ;;  %v6860_v20 = vld [vmem:[#allocation3 + $0x61] sm:$0xff] }
 0x40d   : > { %2559 = vst.msk [vmem:[#allocation3 + $0x69] sm:$0xff] %vm272_vm0, %v2526_v32  ;;  %v2448_v34 = vpop.f32.mrf.mxu2  ;;  %2921 = vrot.lane.b32.xlu2 %v6860_v20, %s4676_s8 }
 0x40e   : > { %v2449_v13 = vadd.f32 %v6744_v45, %v2448_v34 }
 0x40f   : > { %v2415_v14 = vpop.f32.mrf.mxu0 }
 0x410   : > { %v2506_v56 = vmax.f32 %v2449_v13, 0.0  ;;  %v2416_v23 = vadd.f32 %v6744_v45, %v2415_v14 }
 0x412   : > { %v2538_v52 = vsel %vm622_vm1, %v2506_v56, 0.0  ;;  %v2495_v61 = vmax.f32 %v2416_v23, 0.0 }
 0x413   : > { %2571 = vst.msk [vmem:[#allocation3 + $0xf9] sm:$0xff] %vm272_vm0, %v2538_v52 }
 0x414   : > { %v2527_v43 = vsel %vm622_vm1, %v2495_v61, 0.0  ;;  %v6870_v37 = vld [vmem:[#allocation3 + $0x69] sm:$0xff] }
 0x415   : > { %2560 = vst.msk [vmem:[#allocation3 + $0x79] sm:$0xff] %vm272_vm0, %v2527_v43  ;;  %v2451_v24 = vpop.f32.mrf.mxu2  ;;  %2923 = vrot.lane.b32.xlu0 %v6870_v37, %s4676_s8 }
 0x416   : > { %v2452_v15 = vadd.f32 %v6744_v45, %v2451_v24 }
 0x417   : > { %v2418_v58 = vpop.f32.mrf.mxu0 }
 0x418   : > { %v2507_v60 = vmax.f32 %v2452_v15, 0.0  ;;  %v2419_v7 = vadd.f32 %v6744_v45, %v2418_v58 }
 0x41a   : > { %v2539_v27 = vsel %vm622_vm1, %v2507_v60, 0.0  ;;  %v2496_v19 = vmax.f32 %v2419_v7, 0.0 }
 0x41b   : > { %2572 = vst.msk [vmem:[#allocation3 + $0x109] sm:$0xff] %vm272_vm0, %v2539_v27 }
 0x41c   : > { %v2528_v29 = vsel %vm622_vm1, %v2496_v19, 0.0  ;;  %v6880_v36 = vld [vmem:[#allocation3 + $0x79] sm:$0xff] }
 0x41d   : > { %2561 = vst.msk [vmem:[#allocation3 + $0x81] sm:$0xff] %vm272_vm0, %v2528_v29  ;;  %v2454_v44 = vpop.f32.mrf.mxu2  ;;  %2925 = vrot.lane.b32.xlu1 %v6880_v36, %s4676_s8  ;;  %v6940_v29 = vld [vmem:[#allocation3 + $0xd9] sm:$0xff] }
 0x41e   : > { %v2455_v33 = vadd.f32 %v6744_v45, %v2454_v44 }
 0x41f   : > { %v2421_v11 = vpop.f32.mrf.mxu0 }
 0x420   : > { %v2508_v2 = vmax.f32 %v2455_v33, 0.0  ;;  %v2422_v55 = vadd.f32 %v6744_v45, %v2421_v11 }
 0x422   : > { %v2540_v22 = vsel %vm622_vm1, %v2508_v2, 0.0  ;;  %v2497_v28 = vmax.f32 %v2422_v55, 0.0 }
 0x423   : > { %2573 = vst.msk [vmem:[#allocation3 + $0x111] sm:$0xff] %vm272_vm0, %v2540_v22  ;;  %v6952_v22 = vld [vmem:[#allocation3 + $0xf9] sm:$0xff] }
 0x424   : > { %v2529_v57 = vsel %vm622_vm1, %v2497_v28, 0.0  ;;  %v6890_v21 = vld [vmem:[#allocation3 + $0x81] sm:$0xff] }
 0x425   : > { %2562 = vst.msk [vmem:[#allocation3 + $0x91] sm:$0xff] %vm272_vm0, %v2529_v57  ;;  %v2457_v54 = vpop.f32.mrf.mxu2  ;;  %2927 = vrot.lane.b32.xlu2 %v6890_v21, %s4676_s8 }
 0x426   : > { %v2458_v47 = vadd.f32 %v6744_v45, %v2457_v54  ;;  %v6960_v54 = vld [vmem:[#allocation3 + $0xe1] sm:$0xff] }
 0x427   : > { %v2424_v49 = vpop.f32.mrf.mxu0 }
 0x428   : > { %v2509_v63 = vmax.f32 %v2458_v47, 0.0  ;;  %v2425_v12 = vadd.f32 %v6744_v45, %v2424_v49 }
 0x42a   : > { %v2541_v17 = vsel %vm622_vm1, %v2509_v63, 0.0  ;;  %v2498_v1 = vmax.f32 %v2425_v12, 0.0 }
 0x42b   : > { %2574 = vst.msk [vmem:[#allocation3 + $0x121] sm:$0xff] %vm272_vm0, %v2541_v17  ;;  %v6969_v17 = vld [vmem:[#allocation3 + $0xf1] sm:$0xff] }
 0x42c   : > { %v2530_v5 = vsel %vm622_vm1, %v2498_v1, 0.0  ;;  %v6900_v51 = vld [vmem:[#allocation3 + $0x91] sm:$0xff] }
 0x42d   : > { %2563 = vst.msk [vmem:[#allocation3 + $0x99] sm:$0xff] %vm272_vm0, %v2530_v5  ;;  %v2460_v48 = vpop.f32.mrf.mxu2  ;;  %2929 = vrot.lane.b32.xlu0 %v6900_v51, %s4676_s8  ;;  %v6975_v5 = vld [vmem:[#allocation3 + $0x109] sm:$0xff] }
 0x42e   : > { %v2461_v3 = vadd.f32 %v6744_v45, %v2460_v48 }
 0x42f   : > { %v2427_v42 = vpop.f32.mrf.mxu0 }
 0x430   : > { %v2510_v59 = vmax.f32 %v2461_v3, 0.0  ;;  %v2428_v50 = vadd.f32 %v6744_v45, %v2427_v42 }
 0x432   : > { %v2542_v18 = vsel %vm622_vm1, %v2510_v59, 0.0  ;;  %v2499_v30 = vmax.f32 %v2428_v50, 0.0  ;;  %v6967_v12 = vld [vmem:[#allocation3 + $0x121] sm:$0xff]  ;;  %v6984_v50 = vld [vmem:[#allocation3 + $0x111] sm:$0xff] }
 0x433   : > { %2575 = vst.msk [vmem:[#allocation3 + $0x129] sm:$0xff] %vm272_vm0, %v2542_v18 }
 0x434   : > { %v2531_v39 = vsel %vm622_vm1, %v2499_v30, 0.0  ;;  %v6910_v26 = vld [vmem:[#allocation3 + $0x99] sm:$0xff] }
 0x435   : > { %2564 = vst.msk [vmem:[#allocation3 + $0xa9] sm:$0xff] %vm272_vm0, %v2531_v39  ;;  %v2463_v31 = vpop.f32.mrf.mxu2  ;;  %2931 = vrot.lane.b32.xlu1 %v6910_v26, %s4676_s8 }
 0x436   : > { %v2464_v41 = vadd.f32 %v6744_v45, %v2463_v31 }
 0x437   : > { %v2430_v40 = vpop.f32.mrf.mxu0 }
 0x438   : > { %v2511_v6 = vmax.f32 %v2464_v41, 0.0  ;;  %v2431_v25 = vadd.f32 %v6744_v45, %v2430_v40 }
 0x43a   : > { %v2543_v62 = vsel %vm622_vm1, %v2511_v6, 0.0  ;;  %v2500_v46 = vmax.f32 %v2431_v25, 0.0  ;;  %v6990_v30 = vld [vmem:[#allocation3 + $0x129] sm:$0xff] }
 0x43b   : > { %2576 = vst.msk [vmem:[#allocation3 + $0x139] sm:$0xff] %vm272_vm0, %v2543_v62 }
 0x43c   : > { %v2532_v16 = vsel %vm622_vm1, %v2500_v46, 0.0  ;;  %v6920_v10 = vld [vmem:[#allocation3 + $0xa9] sm:$0xff] }
 0x43d   : > { %2565 = vst.msk [vmem:[#allocation3 + $0xb1] sm:$0xff] %vm272_vm0, %v2532_v16  ;;  %v2466_v4 = vpop.f32.mrf.mxu2  ;;  %2933 = vrot.lane.b32.xlu2 %v6920_v10, %s4676_s8 }
 0x43e   : > { %v2467_v32 = vadd.f32 %v6744_v45, %v2466_v4 }
 0x43f   : > { %v2433_v34 = vpop.f32.mrf.mxu0 }
 0x440   : > { %v2512_v13 = vmax.f32 %v2467_v32, 0.0  ;;  %v2434_v14 = vadd.f32 %v6744_v45, %v2433_v34  ;;  %v2649_v32 = vld [vmem:[#allocation3 + $0xa] sm:$0xff] }
 0x442   : > { %v2544_v56 = vsel %vm622_vm1, %v2512_v13, 0.0  ;;  %v2501_v23 = vmax.f32 %v2434_v14, 0.0  ;;  %v6999_v6 = vld [vmem:[#allocation3 + $0x139] sm:$0xff] }
 0x443   : > { %2577 = vst.msk [vmem:[#allocation3 + $0x141] sm:$0xff] %vm272_vm0, %v2544_v56  ;;  %v7021_v14 = vld [vmem:[#allocation3 + $0x32] sm:$0xff]  ;;  %v7026_v56 = vld [vmem:[#allocation3 + $0x1a] sm:$0xff] }
 0x444   : > { %v2533_v52 = vsel %vm622_vm1, %v2501_v23, 0.0  ;;  %v6930_v61 = vld [vmem:[#allocation3 + $0xb1] sm:$0xff]  ;;  %v7030_v23 = vld [vmem:[#allocation3 + $0x22] sm:$0xff] }
 0x445   : > { %2566 = vst.msk [vmem:[#allocation3 + $0xc1] sm:$0xff] %vm272_vm0, %v2533_v52  ;;  %v2469_v43 = vpop.f32.mrf.mxu2  ;;  %2935 = vrot.lane.b32.xlu0 %v6930_v61, %s4676_s8  ;;  %v7032_v52 = vld [vmem:[#allocation3 + $0x52] sm:$0xff] }
 0x446   : > { %v2470_v24 = vadd.f32 %v6744_v45, %v2469_v43  ;;  %v7038_v43 = vld [vmem:[#allocation3 + $0x3a] sm:$0xff] }
 0x447   : > { %v2436_v15 = vpop.f32.mrf.mxu0 }
 0x448   : > { %v2513_v58 = vmax.f32 %v2470_v24, 0.0  ;;  %v2437_v60 = vadd.f32 %v6744_v45, %v2436_v15  ;;  %v7042_v24 = vpop.permute.xlu2 %2909  ;;  %v7044_v15 = vld [vmem:[#allocation3 + $0x4a] sm:$0xff] }
 0x449   : > { %8840 = vst [vmem:[#allocation4_spill] sm:$0xff] %v7042_v24 }
 0x44a   : > { %v2545_v7 = vsel %vm622_vm1, %v2513_v58, 0.0  ;;  %v2502_v27 = vmax.f32 %v2437_v60, 0.0  ;;  %v6982_v59 = vld [vmem:[#allocation3 + $0x141] sm:$0xff]  ;;  %v7048_v60 = vpop.permute.xlu0 %2905 }
 0x44b   : > { %2578 = vst.msk [vmem:[#allocation3 + $0x151] sm:$0xff] %vm272_vm0, %v2545_v7  ;;  %v7046_v58 = vld [vmem:[#allocation3 + $0x7a] sm:$0xff]  ;;  %v7054_v7 = vld [vmem:[#allocation3 + $0x62] sm:$0xff] }
 0x44c   : > { %v2534_v19 = vsel %vm622_vm1, %v2502_v27, 0.0  ;;  %v6942_v44 = vld [vmem:[#allocation3 + $0xc1] sm:$0xff]  ;;  %8841 = vst [vmem:[#allocation50_spill] sm:$0xff] %v7048_v60 }
 0x44d   : > { %2567 = vst.msk [vmem:[#allocation3 + $0xc9] sm:$0xff] %vm272_vm0, %v2534_v19  ;;  %v2472_v33 = vpop.f32.mrf.mxu2  ;;  %2941 = vrot.lane.b32.xlu0 %v6940_v29, %s4676_s8  ;;  %2937 = vrot.lane.b32.xlu1 %v6942_v44, %s4676_s8  ;;  %v7060_v19 = vld [vmem:[#allocation3 + $0x6a] sm:$0xff] }
 0x44e   : > { %v2473_v11 = vadd.f32 %v6744_v45, %v2472_v33  ;;  %v7062_v33 = vld [vmem:[#allocation3 + $0x9a] sm:$0xff] }
 0x450   : > { %v2514_v2 = vmax.f32 %v2473_v11, 0.0  ;;  %v7058_v27 = vpop.permute.xlu2 %2915  ;;  %v7068_v11 = vld [vmem:[#allocation3 + $0x82] sm:$0xff] }
 0x451   : > { %8842 = vst [vmem:[#allocation6_spill] sm:$0xff] %v7058_v27  ;;  %v7150_v27 = vld [vmem:[#allocation3 + $0x122] sm:$0xff] }
 0x452   : > { %v2546_v55 = vsel %vm622_vm1, %v2514_v2, 0.0  ;;  %v7005_v62 = vld [vmem:[#allocation3 + $0x151] sm:$0xff]  ;;  %v7070_v2 = vpop.permute.xlu1 %2907 }
 0x453   : > { %2579 = vst.msk [vmem:[#allocation3 + $0x159] sm:$0xff] %vm272_vm0, %v2546_v55 }
 0x454   : > { %v6954_v28 = vld [vmem:[#allocation3 + $0xc9] sm:$0xff]  ;;  %8843 = vst [vmem:[#allocation41_spill] sm:$0xff] %v7070_v2 }
 0x455   : > { %v2475_v57 = vpop.f32.mrf.mxu2  ;;  %2947 = vrot.lane.b32.xlu0 %v6952_v22, %s4676_s8  ;;  %2939 = vrot.lane.b32.xlu2 %v6954_v28, %s4676_s8 }
 0x456   : > { %v2476_v47 = vadd.f32 %v6744_v45, %v2475_v57  ;;  %2943 = vrot.lane.b32.xlu1 %v6960_v54, %s4676_s8 }
 0x457   : > { %v7074_v55 = vpop.permute.xlu0 %2911 }
 0x458   : > { %v2515_v49 = vmax.f32 %v2476_v47, 0.0  ;;  %8844 = vst [vmem:[#allocation9_spill] sm:$0xff] %v7074_v55  ;;  %v7078_v47 = vld [vmem:[#allocation3 + $0x92] sm:$0xff]  ;;  %v7158_v55 = vld [vmem:[#allocation3 + $0x13a] sm:$0xff] }
 0x459   : > { %8859 = vst [vmem:[#allocation82_spill] sm:$0xff] %v7158_v55 }
 0x45a   : > { %v2547_v63 = vsel %vm622_vm1, %v2515_v49, 0.0  ;;  %v7012_v34 = vld [vmem:[#allocation3 + $0x159] sm:$0xff]  ;;  %v7080_v49 = vld [vmem:[#allocation3 + $0xc2] sm:$0xff] }
 0x45b   : > { %2580 = vst.msk [vmem:[#allocation3 + $0x169] sm:$0xff] %vm272_vm0, %v2547_v63  ;;  %v7086_v63 = vld [vmem:[#allocation3 + $0xaa] sm:$0xff] }
 0x45d   : > { %v2478_v1 = vpop.f32.mrf.mxu2  ;;  %2953 = vrot.lane.b32.xlu0 %v6967_v12, %s4676_s8  ;;  %2945 = vrot.lane.b32.xlu2 %v6969_v17, %s4676_s8 }
 0x45e   : > { %v2479_v48 = vadd.f32 %v6744_v45, %v2478_v1  ;;  %2949 = vrot.lane.b32.xlu1 %v6975_v5, %s4676_s8 }
 0x460   : > { %v2516_v3 = vmax.f32 %v2479_v48, 0.0 }
 0x462   : > { %v2548_v42 = vsel %vm622_vm1, %v2516_v3, 0.0  ;;  %v6997_v40 = vld [vmem:[#allocation3 + $0x169] sm:$0xff]  ;;  %v7094_v3 = vpop.permute.xlu1 %2913 }
 0x463   : > { %2581 = vst.msk [vmem:[#allocation3 + $0x171] sm:$0xff] %vm272_vm0, %v2548_v42  ;;  %v7096_v42 = vld [vmem:[#allocation3 + $0xb2] sm:$0xff] }
 0x464   : > { %8848 = vst [vmem:[#allocation55_spill] sm:$0xff] %v7094_v3  ;;  %v7152_v3 = vld [vmem:[#allocation3 + $0x152] sm:$0xff] }
 0x465   : > { %v2481_v18 = vpop.f32.mrf.mxu2  ;;  %2959 = vrot.lane.b32.xlu0 %v6982_v59, %s4676_s8  ;;  %2951 = vrot.lane.b32.xlu2 %v6984_v50, %s4676_s8  ;;  %8858 = vst [vmem:[#allocation60_spill] sm:$0xff] %v7152_v3 }
 0x466   : > { %v2482_v39 = vadd.f32 %v6744_v45, %v2481_v18  ;;  %2955 = vrot.lane.b32.xlu1 %v6990_v30, %s4676_s8  ;;  %v7098_v18 = vld [vmem:[#allocation3 + $0xe2] sm:$0xff] }
 0x467   : > { %v7076_v57 = vpop.permute.xlu2 %2921 }
 0x468   : > { %v2517_v31 = vmax.f32 %v2482_v39, 0.0  ;;  %8845 = vst [vmem:[#allocation49_spill] sm:$0xff] %v7076_v57  ;;  %v7104_v39 = vld [vmem:[#allocation3 + $0xca] sm:$0xff] }
 0x469   : > { %v7134_v57 = vld [vmem:[#allocation3 + $0x12a] sm:$0xff] }
 0x46a   : > { %v2549_v41 = vsel %vm622_vm1, %v2517_v31, 0.0  ;;  %v7017_v13 = vld [vmem:[#allocation3 + $0x171] sm:$0xff]  ;;  %8855 = vst [vmem:[#allocation54_spill] sm:$0xff] %v7134_v57 }
 0x46b   : > { %2582 = vst.msk [vmem:[#allocation3 + $0x181] sm:$0xff] %vm272_vm0, %v2549_v41 }
 0x46d   : > { %v2484_v25 = vpop.f32.mrf.mxu2  ;;  %2965 = vrot.lane.b32.xlu0 %v6997_v40, %s4676_s8  ;;  %2957 = vrot.lane.b32.xlu2 %v6999_v6, %s4676_s8 }
 0x46e   : > { %v2485_v46 = vadd.f32 %v6744_v45, %v2484_v25  ;;  %2961 = vrot.lane.b32.xlu1 %v7005_v62, %s4676_s8  ;;  %v2648_v45 = vld [vmem:[#allocation3 + $0x2] sm:$0xff] }
 0x46f   : > { %v7090_v1 = vpop.permute.xlu0 %2917 }
 0x470   : > { %v2518_v16 = vmax.f32 %v2485_v46, 0.0  ;;  %8846 = vst [vmem:[#allocation5_spill] sm:$0xff] %v7090_v1  ;;  %v7114_v46 = vld [vmem:[#allocation3 + $0xda] sm:$0xff] }
 0x472   : > { %v2550_v4 = vsel %vm622_vm1, %v2518_v16, 0.0  ;;  %v7116_v16 = vld [vmem:[#allocation3 + $0x10a] sm:$0xff] }
 0x473   : > { %2583 = vst.msk [vmem:[#allocation3 + $0x189] sm:$0xff] %vm272_vm0, %v2550_v4  ;;  %v7122_v4 = vld [vmem:[#allocation3 + $0xf2] sm:$0xff] }
 0x475   : > { %3035 = vrot.lane.b32.xlu0 %v2649_v32, %s4677_s9  ;;  %2963 = vrot.lane.b32.xlu2 %v7012_v34, %s4676_s8 }
 0x476   : > { %2967 = vrot.lane.b32.xlu1 %v7017_v13, %s4676_s8 }
 0x477   : > { %v7112_v25 = vpop.permute.xlu1 %2919 }
 0x478   : > { %8851 = vst [vmem:[#allocation46_spill] sm:$0xff] %v7112_v25  ;;  %v7140_v25 = vld [vmem:[#allocation3 + $0x112] sm:$0xff] }
 0x47d   : > { %3033 = vrot.lane.b32.xlu2 %v2648_v45, %s4677_s9  ;;  %3041 = vrot.lane.b32.xlu0 %v7021_v14, %s4677_s9 }
 0x47e   : > { %3037 = vrot.lane.b32.xlu1 %v7026_v56, %s4677_s9 }
 0x47f   : > { %v7092_v48 = vpop.permute.xlu2 %2927 }
 0x480   : > { %8847 = vst [vmem:[#allocation20_spill] sm:$0xff] %v7092_v48 }
 0x485   : > { %3039 = vrot.lane.b32.xlu2 %v7030_v23, %s4677_s9  ;;  %3047 = vrot.lane.b32.xlu0 %v7032_v52, %s4677_s9 }
 0x486   : > { %3043 = vrot.lane.b32.xlu1 %v7038_v43, %s4677_s9 }
 0x487   : > { %v7108_v31 = vpop.permute.xlu0 %2923 }
 0x488   : > { %8849 = vst [vmem:[#allocation67_spill] sm:$0xff] %v7108_v31  ;;  %v7132_v31 = vld [vmem:[#allocation3 + $0xfa] sm:$0xff] }
 0x48d   : > { %3045 = vrot.lane.b32.xlu2 %v7044_v15, %s4677_s9  ;;  %3053 = vrot.lane.b32.xlu0 %v7046_v58, %s4677_s9 }
 0x48e   : > { %3049 = vrot.lane.b32.xlu1 %v7054_v7, %s4677_s9 }
 0x48f   : > { %v7130_v48 = vpop.permute.xlu1 %2925 }
 0x490   : > { %8854 = vst [vmem:[#allocation76_spill] sm:$0xff] %v7130_v48 }
 0x495   : > { %3051 = vrot.lane.b32.xlu2 %v7060_v19, %s4677_s9  ;;  %3059 = vrot.lane.b32.xlu0 %v7062_v33, %s4677_s9 }
 0x496   : > { %3055 = vrot.lane.b32.xlu1 %v7068_v11, %s4677_s9 }
 0x497   : > { %v7110_v41 = vpop.permute.xlu2 %2933 }
 0x498   : > { %8850 = vst [vmem:[#allocation8_spill] sm:$0xff] %v7110_v41  ;;  %v7173_v41 = vld [vmem:[#allocation3 + $0x15a] sm:$0xff] }
 0x499   : > { %8864 = vst [vmem:[#allocation115_spill] sm:$0xff] %v7173_v41 }
 0x49d   : > { %3057 = vrot.lane.b32.xlu2 %v7078_v47, %s4677_s9  ;;  %3065 = vrot.lane.b32.xlu0 %v7080_v49, %s4677_s9 }
 0x49e   : > { %3061 = vrot.lane.b32.xlu1 %v7086_v63, %s4677_s9 }
 0x49f   : > { %v7126_v32 = vpop.permute.xlu0 %2929 }
 0x4a0   : > { %8852 = vst [vmem:[#allocation26_spill] sm:$0xff] %v7126_v32 }
 0x4a5   : > { %3063 = vrot.lane.b32.xlu2 %v7096_v42, %s4677_s9  ;;  %3071 = vrot.lane.b32.xlu0 %v7098_v18, %s4677_s9 }
 0x4a6   : > { %3067 = vrot.lane.b32.xlu1 %v7104_v39, %s4677_s9 }
 0x4a7   : > { %v7148_v48 = vpop.permute.xlu1 %2931 }
 0x4a8   : > { %8857 = vst [vmem:[#allocation19_spill] sm:$0xff] %v7148_v48  ;;  %v2591_v48 = vld [vmem:[#allocation3 + $0x50] sm:$0xff] }
 0x4ad   : > { %3069 = vrot.lane.b32.xlu2 %v7114_v46, %s4677_s9  ;;  %3077 = vrot.lane.b32.xlu0 %v7116_v16, %s4677_s9 }
 0x4ae   : > { %3073 = vrot.lane.b32.xlu1 %v7122_v4, %s4677_s9 }
 0x4af   : > { %v7128_v45 = vpop.permute.xlu2 %2939 }
 0x4b0   : > { %8853 = vst [vmem:[#allocation12_spill] sm:$0xff] %v7128_v45  ;;  %v7168_v45 = vld [vmem:[#allocation3 + $0x142] sm:$0xff] }
 0x4b1   : > { %8863 = vst [vmem:[#allocation73_spill] sm:$0xff] %v7168_v45 }
 0x4b5   : > { %3075 = vrot.lane.b32.xlu2 %v7132_v31, %s4677_s9  ;;  %3083 = vrot.lane.b32.xlu0 %v7134_v57, %s4677_s9  ;;  %v2586_v57 = vld [vmem:[#allocation3 + $0x18] sm:$0xff] }
 0x4b6   : > { %3079 = vrot.lane.b32.xlu1 %v7140_v25, %s4677_s9 }
 0x4b7   : > { %v7144_v32 = vpop.permute.xlu0 %2935  ;;  %v7146_v1 = vpop.permute.xlu2 %2945 }
 0x4b8   : > { %8856 = vst [vmem:[#allocation7_spill] sm:$0xff] %v7146_v1  ;;  %v2679_v1 = vld [vmem:[#allocation3 + $0x172] sm:$0xff] }
 0x4bd   : > { %3081 = vrot.lane.b32.xlu2 %v7150_v27, %s4677_s9  ;;  %3089 = vrot.lane.b32.xlu0 %v7152_v3, %s4677_s9 }
 0x4be   : > { %3085 = vrot.lane.b32.xlu1 %v7158_v55, %s4677_s9 }
 0x4bf   : > { %v7162_v24 = vpop.permute.xlu0 %2941  ;;  %v7164_v2 = vpop.permute.xlu2 %2951 }
 0x4c0   : > { %8860 = vst [vmem:[#allocation11_spill] sm:$0xff] %v7162_v24  ;;  %v7166_v60 = vpop.permute.xlu1 %2937  ;;  %v7183_v24 = vld [vmem:[#allocation3 + $0x16a] sm:$0xff] }
 0x4c1   : > { %8861 = vst [vmem:[#allocation25_spill] sm:$0xff] %v7164_v2 }
 0x4c2   : > { %8862 = vst [vmem:[#allocation51_spill] sm:$0xff] %v7166_v60  ;;  %v2588_v60 = vld [vmem:[#allocation3 + $0x30] sm:$0xff] }
 0x4c3   : > { %8868 = vst [vmem:[#allocation135_spill] sm:$0xff] %v7183_v24 }
 0x4c5   : > { %3087 = vrot.lane.b32.xlu2 %v7168_v45, %s4677_s9  ;;  %3095 = vrot.lane.b32.xlu0 %v2679_v1, %s4677_s9  ;;  %v2594_v45 = vld [vmem:[#allocation3 + $0x78] sm:$0xff] }
 0x4c6   : > { %3091 = vrot.lane.b32.xlu1 %v7173_v41, %s4677_s9 }
 0x4c7   : > { %v7177_v3 = vpop.permute.xlu0 %2947  ;;  %v7179_v55 = vpop.permute.xlu2 %2957 }
 0x4c8   : > { %8865 = vst [vmem:[#allocation33_spill] sm:$0xff] %v7177_v3  ;;  %v7181_v2 = vpop.permute.xlu1 %2943 }
 0x4c9   : > { %8866 = vst [vmem:[#allocation58_spill] sm:$0xff] %v7179_v55  ;;  %v2587_v55 = vld [vmem:[#allocation3 + $0x20] sm:$0xff] }
 0x4ca   : > { %8867 = vst [vmem:[#allocation68_spill] sm:$0xff] %v7181_v2  ;;  %v2589_v2 = vld [vmem:[#allocation3 + $0x38] sm:$0xff] }
 0x4cd   : > { %3093 = vrot.lane.b32.xlu2 %v7183_v24, %s4677_s9  ;;  %3165 = vrot.lane.b32.xlu0 %v2588_v60, %s4678_s10 }
 0x4ce   : > { %3161 = vrot.lane.b32.xlu1 %v2586_v57, %s4678_s10 }
 0x4cf   : > { %v7189_v1 = vpop.permute.xlu0 %2953  ;;  %v7191_v41 = vpop.permute.xlu2 %2963 }
 0x4d0   : > { %8869 = vst [vmem:[#allocation144_spill] sm:$0xff] %v7189_v1  ;;  %v7193_v3 = vpop.permute.xlu1 %2949  ;;  %v2590_v1 = vld [vmem:[#allocation3 + $0x48] sm:$0xff] }
 0x4d1   : > { %8870 = vst [vmem:[#allocation155_spill] sm:$0xff] %v7191_v41  ;;  %v2592_v41 = vld [vmem:[#allocation3 + $0x60] sm:$0xff] }
 0x4d2   : > { %8871 = vst [vmem:[#allocation164_spill] sm:$0xff] %v7193_v3  ;;  %v2593_v3 = vld [vmem:[#allocation3 + $0x68] sm:$0xff] }
 0x4d5   : > { %3163 = vrot.lane.b32.xlu2 %v2587_v55, %s4678_s10  ;;  %3171 = vrot.lane.b32.xlu0 %v2591_v48, %s4678_s10 }
 0x4d6   : > { %3167 = vrot.lane.b32.xlu1 %v2589_v2, %s4678_s10 }
 0x4d7   : > { %v7198_v24 = vpop.permute.xlu0 %2959  ;;  %v7200_v60 = vpop.permute.xlu2 %3033 }
 0x4d8   : > { %8872 = vst [vmem:[#allocation15_spill] sm:$0xff] %v7198_v24  ;;  %v7202_v57 = vpop.permute.xlu1 %2955  ;;  %v7213_v24 = vld [vmem:[#allocation3 + $0x98] sm:$0xff] }
 0x4d9   : > { %8873 = vst [vmem:[#allocation30_spill] sm:$0xff] %v7200_v60  ;;  %v2595_v60 = vld [vmem:[#allocation3 + $0x80] sm:$0xff] }
 0x4da   : > { %8874 = vst [vmem:[#allocation59_spill] sm:$0xff] %v7202_v57  ;;  %v7225_v57 = vld [vmem:[#allocation3 + $0xc0] sm:$0xff] }
 0x4db   : > { %8878 = vst [vmem:[#allocation118_spill] sm:$0xff] %v7213_v24 }
 0x4dc   : > { %8882 = vst [vmem:[#allocation132_spill] sm:$0xff] %v7225_v57 }
 0x4dd   : > { %3169 = vrot.lane.b32.xlu2 %v2590_v1, %s4678_s10  ;;  %3177 = vrot.lane.b32.xlu0 %v2594_v45, %s4678_s10 }
 0x4de   : > { %3173 = vrot.lane.b32.xlu1 %v2592_v41, %s4678_s10 }
 0x4df   : > { %v7207_v55 = vpop.permute.xlu0 %2965  ;;  %v7209_v48 = vpop.permute.xlu2 %3039 }
 0x4e0   : > { %8875 = vst [vmem:[#allocation81_spill] sm:$0xff] %v7207_v55  ;;  %v7211_v2 = vpop.permute.xlu1 %2961  ;;  %v7244_v55 = vld [vmem:[#allocation3 + $0xc8] sm:$0xff] }
 0x4e1   : > { %8876 = vst [vmem:[#allocation94_spill] sm:$0xff] %v7209_v48  ;;  %v2596_v48 = vld [vmem:[#allocation3 + $0x90] sm:$0xff] }
 0x4e2   : > { %8877 = vst [vmem:[#allocation102_spill] sm:$0xff] %v7211_v2  ;;  %v7227_v2 = vld [vmem:[#allocation3 + $0xa8] sm:$0xff] }
 0x4e3   : > { %8883 = vst [vmem:[#allocation141_spill] sm:$0xff] %v7227_v2 }
 0x4e4   : > { %8888 = vst [vmem:[#allocation66_spill] sm:$0xff] %v7244_v55 }
 0x4e5   : > { %3175 = vrot.lane.b32.xlu2 %v2593_v3, %s4678_s10  ;;  %3183 = vrot.lane.b32.xlu0 %v7213_v24, %s4678_s10  ;;  %v7280_v24 = vld [vmem:[#allocation3 + $0x110] sm:$0xff] }
 0x4e6   : > { %3179 = vrot.lane.b32.xlu1 %v2595_v60, %s4678_s10  ;;  %8900 = vst [vmem:[#allocation14_spill] sm:$0xff] %v7280_v24 }
 0x4e7   : > { %v7219_v45 = vpop.permute.xlu0 %3035  ;;  %v7221_v41 = vpop.permute.xlu2 %3045 }
 0x4e8   : > { %8879 = vst [vmem:[#allocation38_spill] sm:$0xff] %v7219_v45  ;;  %v7223_v1 = vpop.permute.xlu1 %2967  ;;  %v7240_v45 = vld [vmem:[#allocation3 + $0xb0] sm:$0xff] }
 0x4e9   : > { %8880 = vst [vmem:[#allocation64_spill] sm:$0xff] %v7221_v41 }
 0x4ea   : > { %8881 = vst [vmem:[#allocation75_spill] sm:$0xff] %v7223_v1  ;;  %v7242_v1 = vld [vmem:[#allocation3 + $0xe0] sm:$0xff] }
 0x4eb   : > { %8887 = vst [vmem:[#allocation22_spill] sm:$0xff] %v7242_v1 }
 0x4ed   : > { %3181 = vrot.lane.b32.xlu2 %v2596_v48, %s4678_s10  ;;  %3189 = vrot.lane.b32.xlu0 %v7225_v57, %s4678_s10  ;;  %v7262_v57 = vld [vmem:[#allocation3 + $0xf0] sm:$0xff] }
 0x4ee   : > { %3185 = vrot.lane.b32.xlu1 %v7227_v2, %s4678_s10  ;;  %v7260_v2 = vld [vmem:[#allocation3 + $0x108] sm:$0xff]  ;;  %8894 = vst [vmem:[#allocation57_spill] sm:$0xff] %v7262_v57 }
 0x4ef   : > { %v7234_v3 = vpop.permute.xlu2 %3051  ;;  %v7236_v60 = vpop.permute.xlu0 %3041  ;;  %8893 = vst [vmem:[#allocation123_spill] sm:$0xff] %v7260_v2 }
 0x4f0   : > { %8884 = vst [vmem:[#allocation158_spill] sm:$0xff] %v7234_v3  ;;  %v7238_v41 = vpop.permute.xlu1 %3037 }
 0x4f1   : > { %8885 = vst [vmem:[#allocation167_spill] sm:$0xff] %v7236_v60 }
 0x4f2   : > { %8886 = vst [vmem:[#allocation10_spill] sm:$0xff] %v7238_v41  ;;  %v7258_v41 = vld [vmem:[#allocation3 + $0xd8] sm:$0xff] }
 0x4f3   : > { %8892 = vst [vmem:[#allocation114_spill] sm:$0xff] %v7258_v41 }
 0x4f5   : > { %3187 = vrot.lane.b32.xlu2 %v7240_v45, %s4678_s10  ;;  %3195 = vrot.lane.b32.xlu0 %v7242_v1, %s4678_s10  ;;  %v7278_v1 = vld [vmem:[#allocation3 + $0x128] sm:$0xff] }
 0x4f6   : > { %3191 = vrot.lane.b32.xlu1 %v7244_v55, %s4678_s10  ;;  %v7276_v55 = vld [vmem:[#allocation3 + $0xf8] sm:$0xff]  ;;  %8899 = vst [vmem:[#allocation163_spill] sm:$0xff] %v7278_v1 }
 0x4f7   : > { %v7252_v48 = vpop.permute.xlu2 %3057  ;;  %v7254_v3 = vpop.permute.xlu0 %3047  ;;  %8898 = vst [vmem:[#allocation154_spill] sm:$0xff] %v7276_v55 }
 0x4f8   : > { %8889 = vst [vmem:[#allocation86_spill] sm:$0xff] %v7252_v48  ;;  %v7256_v60 = vpop.permute.xlu1 %3043 }
 0x4f9   : > { %8890 = vst [vmem:[#allocation96_spill] sm:$0xff] %v7254_v3 }
 0x4fa   : > { %8891 = vst [vmem:[#allocation104_spill] sm:$0xff] %v7256_v60 }
 0x4fd   : > { %3193 = vrot.lane.b32.xlu2 %v7258_v41, %s4678_s10  ;;  %3201 = vrot.lane.b32.xlu0 %v7260_v2, %s4678_s10  ;;  %v7296_v41 = vld [vmem:[#allocation3 + $0x150] sm:$0xff] }
 0x4fe   : > { %3197 = vrot.lane.b32.xlu1 %v7262_v57, %s4678_s10  ;;  %v7294_v57 = vld [vmem:[#allocation3 + $0x120] sm:$0xff]  ;;  %8905 = vst [vmem:[#allocation107_spill] sm:$0xff] %v7296_v41 }
 0x4ff   : > { %v7270_v48 = vpop.permute.xlu2 %3063  ;;  %v7272_v3 = vpop.permute.xlu0 %3053  ;;  %8904 = vst [vmem:[#allocation99_spill] sm:$0xff] %v7294_v57 }
 0x500   : > { %8895 = vst [vmem:[#allocation84_spill] sm:$0xff] %v7270_v48  ;;  %v7274_v60 = vpop.permute.xlu1 %3049  ;;  %v7298_v48 = vld [vmem:[#allocation3 + $0x138] sm:$0xff] }
 0x501   : > { %8896 = vst [vmem:[#allocation134_spill] sm:$0xff] %v7272_v3 }
 0x502   : > { %8897 = vst [vmem:[#allocation143_spill] sm:$0xff] %v7274_v60 }
 0x503   : > { %8906 = vst [vmem:[#allocation117_spill] sm:$0xff] %v7298_v48 }
 0x505   : > { %3199 = vrot.lane.b32.xlu2 %v7276_v55, %s4678_s10  ;;  %3207 = vrot.lane.b32.xlu0 %v7278_v1, %s4678_s10  ;;  %v7312_v55 = vld [vmem:[#allocation3 + $0x140] sm:$0xff] }
 0x506   : > { %3203 = vrot.lane.b32.xlu1 %v7280_v24, %s4678_s10  ;;  %8909 = vst [vmem:[#allocation74_spill] sm:$0xff] %v7312_v55 }
 0x507   : > { %v7288_v2 = vpop.permute.xlu2 %3069  ;;  %v7290_v3 = vpop.permute.xlu0 %3059 }
 0x508   : > { %8901 = vst [vmem:[#allocation29_spill] sm:$0xff] %v7288_v2  ;;  %v7292_v60 = vpop.permute.xlu1 %3055  ;;  %v7314_v2 = vld [vmem:[#allocation3 + $0x170] sm:$0xff] }
 0x509   : > { %8902 = vst [vmem:[#allocation56_spill] sm:$0xff] %v7290_v3  ;;  %v2613_v3 = vld [vmem:[#allocation3 + $0x158] sm:$0xff] }
 0x50a   : > { %8903 = vst [vmem:[#allocation78_spill] sm:$0xff] %v7292_v60 }
 0x50b   : > { %8910 = vst [vmem:[#allocation138_spill] sm:$0xff] %v7314_v2 }
 0x50d   : > { %3205 = vrot.lane.b32.xlu2 %v7294_v57, %s4678_s10  ;;  %3213 = vrot.lane.b32.xlu0 %v7296_v41, %s4678_s10  ;;  %v2710_v41 = vld [vmem:[#allocation3 + $0x180] sm:$0xff] }
 0x50e   : > { %3209 = vrot.lane.b32.xlu1 %v7298_v48, %s4678_s10 }
 0x50f   : > { %v7306_v1 = vpop.permute.xlu2 %3075  ;;  %v7308_v24 = vpop.permute.xlu0 %3065 }
 0x510   : > { %8907 = vst [vmem:[#allocation24_spill] sm:$0xff] %v7306_v1  ;;  %v7310_v60 = vpop.permute.xlu1 %3061 }
 0x511   : > { %8908 = vst [vmem:[#allocation47_spill] sm:$0xff] %v7310_v60  ;;  %v7327_v60 = vld [vmem:[#allocation3 + $0x168] sm:$0xff] }
 0x515   : > { %3211 = vrot.lane.b32.xlu2 %v7312_v55, %s4678_s10  ;;  %3219 = vrot.lane.b32.xlu0 %v7314_v2, %s4678_s10  ;;  %v2711_v55 = vld [vmem:[#allocation3 + $0x188] sm:$0xff] }
 0x516   : > { %3215 = vrot.lane.b32.xlu1 %v2613_v3, %s4678_s10 }
 0x517   : > { %v7321_v48 = vpop.permute.xlu2 %3081  ;;  %v7323_v1 = vpop.permute.xlu0 %3071 }
 0x518   : > { %8911 = vst [vmem:[#allocation147_spill] sm:$0xff] %v7321_v48  ;;  %v7325_v57 = vpop.permute.xlu1 %3067 }
 0x519   : > { %8912 = vst [vmem:[#allocation157_spill] sm:$0xff] %v7325_v57 }
 0x51d   : > { %3217 = vrot.lane.b32.xlu2 %v7327_v60, %s4678_s10  ;;  %3289 = vrot.lane.b32.xlu0 %v6783_v38, %s4679_s11 }
 0x51e   : > { %3221 = vrot.lane.b32.xlu1 %v2710_v41, %s4678_s10 }
 0x51f   : > { %v7334_v2 = vpop.permute.xlu2 %3087  ;;  %v7336_v3 = vpop.permute.xlu0 %3077 }
 0x520   : > { %v7338_v48 = vpop.permute.xlu1 %3073 }
 0x525   : > { %3223 = vrot.lane.b32.xlu2 %v2711_v55, %s4678_s10  ;;  %3295 = vrot.lane.b32.xlu0 %v6833_v9, %s4679_s11 }
 0x526   : > { %3291 = vrot.lane.b32.xlu1 %v6806_v53, %s4679_s11 }
 0x527   : > { %v7345_v57 = vpop.permute.xlu2 %3093  ;;  %v7347_v38 = vpop.permute.xlu0 %3083 }
 0x528   : > { %v7349_v41 = vpop.permute.xlu1 %3079 }
 0x52d   : > { %3293 = vrot.lane.b32.xlu2 %v6823_v8, %s4679_s11  ;;  %3301 = vrot.lane.b32.xlu0 %v6860_v20, %s4679_s11 }
 0x52e   : > { %3297 = vrot.lane.b32.xlu1 %v6840_v35, %s4679_s11 }
 0x52f   : > { %v7357_v55 = vpop.permute.xlu2 %3163  ;;  %v7359_v9 = vpop.permute.xlu0 %3089 }
 0x530   : > { %v7361_v53 = vpop.permute.xlu1 %3085 }
 0x535   : > { %3299 = vrot.lane.b32.xlu2 %v6850_v0, %s4679_s11  ;;  %3307 = vrot.lane.b32.xlu0 %v6890_v21, %s4679_s11 }
 0x536   : > { %3303 = vrot.lane.b32.xlu1 %v6870_v37, %s4679_s11 }
 0x537   : > { %v7369_v8 = vpop.permute.xlu2 %3169  ;;  %v7371_v20 = vpop.permute.xlu0 %3095 }
 0x538   : > { %v7373_v35 = vpop.permute.xlu1 %3091 }
 0x539   : > { %8913 = vst [vmem:[#allocation166_spill] sm:$0xff] %v7373_v35  ;;  %v7447_v35 = vld [vmem:[#allocation3 + $0x181] sm:$0xff] }
 0x53a   : > { %8922 = vst [vmem:[#allocation70_spill] sm:$0xff] %v7447_v35 }
 0x53d   : > { %3305 = vrot.lane.b32.xlu2 %v6880_v36, %s4679_s11  ;;  %3313 = vrot.lane.b32.xlu0 %v6920_v10, %s4679_s11 }
 0x53e   : > { %3309 = vrot.lane.b32.xlu1 %v6900_v51, %s4679_s11 }
 0x53f   : > { %v7381_v0 = vpop.permute.xlu2 %3175  ;;  %v7383_v21 = vpop.permute.xlu0 %3165 }
 0x540   : > { %8914 = vst [vmem:[#allocation18_spill] sm:$0xff] %v7381_v0  ;;  %v7385_v37 = vpop.permute.xlu1 %3161  ;;  %v8936_v0 = vld [vmem:[#allocation84_spill] sm:$0xff] }
 0x545   : > { %3311 = vrot.lane.b32.xlu2 %v6910_v26, %s4679_s11  ;;  %3319 = vrot.lane.b32.xlu0 %v6954_v28, %s4679_s11 }
 0x546   : > { %3315 = vrot.lane.b32.xlu1 %v6930_v61, %s4679_s11 }
 0x547   : > { %v7393_v36 = vpop.permute.xlu2 %3181  ;;  %v7395_v10 = vpop.permute.xlu0 %3171 }
 0x548   : > { %8915 = vst [vmem:[#allocation35_spill] sm:$0xff] %v7393_v36  ;;  %v7397_v51 = vpop.permute.xlu1 %3167 }
 0x549   : > { %8916 = vst [vmem:[#allocation65_spill] sm:$0xff] %v7395_v10 }
 0x54d   : > { %3317 = vrot.lane.b32.xlu2 %v6942_v44, %s4679_s11  ;;  %3325 = vrot.lane.b32.xlu0 %v6969_v17, %s4679_s11 }
 0x54e   : > { %3321 = vrot.lane.b32.xlu1 %v6940_v29, %s4679_s11 }
 0x54f   : > { %v7405_v26 = vpop.permute.xlu2 %3187  ;;  %v7407_v28 = vpop.permute.xlu0 %3177 }
 0x550   : > { %8917 = vst [vmem:[#allocation85_spill] sm:$0xff] %v7407_v28  ;;  %v7409_v61 = vpop.permute.xlu1 %3173  ;;  %v8935_v28 = vld [vmem:[#allocation118_spill] sm:$0xff] }
 0x551   : > { %8918 = vst [vmem:[#allocation95_spill] sm:$0xff] %v7409_v61 }
 0x555   : > { %3323 = vrot.lane.b32.xlu2 %v6960_v54, %s4679_s11  ;;  %3331 = vrot.lane.b32.xlu0 %v6984_v50, %s4679_s11 }
 0x556   : > { %3327 = vrot.lane.b32.xlu1 %v6952_v22, %s4679_s11 }
 0x557   : > { %v7417_v44 = vpop.permute.xlu2 %3193  ;;  %v7419_v17 = vpop.permute.xlu0 %3183 }
 0x558   : > { %8919 = vst [vmem:[#allocation103_spill] sm:$0xff] %v7419_v17  ;;  %v7421_v29 = vpop.permute.xlu1 %3179 }
 0x559   : > { %8920 = vst [vmem:[#allocation121_spill] sm:$0xff] %v7421_v29 }
 0x55d   : > { %3329 = vrot.lane.b32.xlu2 %v6975_v5, %s4679_s11  ;;  %3337 = vrot.lane.b32.xlu0 %v6999_v6, %s4679_s11 }
 0x55e   : > { %3333 = vrot.lane.b32.xlu1 %v6967_v12, %s4679_s11 }
 0x55f   : > { %v7429_v54 = vpop.permute.xlu2 %3199  ;;  %v7431_v50 = vpop.permute.xlu0 %3189 }
 0x560   : > { %v7433_v22 = vpop.permute.xlu1 %3185 }
 0x561   : > { %8921 = vst [vmem:[#allocation32_spill] sm:$0xff] %v7433_v22  ;;  %v7465_v22 = vld [vmem:[#allocation3 + $0x189] sm:$0xff] }
 0x562   : > { %8923 = vst [vmem:[#allocation80_spill] sm:$0xff] %v7465_v22 }
 0x565   : > { %3335 = vrot.lane.b32.xlu2 %v6990_v30, %s4679_s11  ;;  %3343 = vrot.lane.b32.xlu0 %v7012_v34, %s4679_s11 }
 0x566   : > { %3339 = vrot.lane.b32.xlu1 %v6982_v59, %s4679_s11 }
 0x567   : > { %v7441_v5 = vpop.permute.xlu2 %3205  ;;  %v7443_v6 = vpop.permute.xlu0 %3195 }
 0x568   : > { %v7445_v12 = vpop.permute.xlu1 %3191 }
 0x56d   : > { %3341 = vrot.lane.b32.xlu2 %v7005_v62, %s4679_s11  ;;  %3349 = vrot.lane.b32.xlu0 %v7447_v35, %s4679_s11 }
 0x56e   : > { %3345 = vrot.lane.b32.xlu1 %v6997_v40, %s4679_s11 }
 0x56f   : > { %v7455_v30 = vpop.permute.xlu2 %3211  ;;  %v7457_v59 = vpop.permute.xlu0 %3201 }
 0x570   : > { %v7459_v34 = vpop.permute.xlu1 %3197 }
 0x575   : > { %3347 = vrot.lane.b32.xlu2 %v7017_v13, %s4679_s11  ;;  %3419 = vrot.lane.b32.xlu0 %v7030_v23, %s4680_s12 }
 0x576   : > { %3351 = vrot.lane.b32.xlu1 %v7465_v22, %s4679_s11 }
 0x577   : > { %v7469_v62 = vpop.permute.xlu2 %3217  ;;  %v7471_v40 = vpop.permute.xlu0 %3207 }
 0x578   : > { %v7473_v17 = vpop.permute.xlu1 %3203 }
 0x57d   : > { %3417 = vrot.lane.b32.xlu2 %v7026_v56, %s4680_s12  ;;  %3425 = vrot.lane.b32.xlu0 %v7044_v15, %s4680_s12 }
 0x57e   : > { %3421 = vrot.lane.b32.xlu1 %v7021_v14, %s4680_s12 }
 0x57f   : > { %v7481_v13 = vpop.permute.xlu2 %3223  ;;  %v7483_v23 = vpop.permute.xlu0 %3213 }
 0x580   : > { %v7485_v36 = vpop.permute.xlu1 %3209 }
 0x585   : > { %3423 = vrot.lane.b32.xlu2 %v7038_v43, %s4680_s12  ;;  %3431 = vrot.lane.b32.xlu0 %v7060_v19, %s4680_s12 }
 0x586   : > { %3427 = vrot.lane.b32.xlu1 %v7032_v52, %s4680_s12 }
 0x587   : > { %v7493_v56 = vpop.permute.xlu2 %3293  ;;  %v7495_v15 = vpop.permute.xlu0 %3219 }
 0x588   : > { %8924 = vst [vmem:[#allocation133_spill] sm:$0xff] %v7495_v15  ;;  %v7497_v29 = vpop.permute.xlu1 %3215 }
 0x58d   : > { %3429 = vrot.lane.b32.xlu2 %v7054_v7, %s4680_s12  ;;  %3437 = vrot.lane.b32.xlu0 %v7078_v47, %s4680_s12 }
 0x58e   : > { %3433 = vrot.lane.b32.xlu1 %v7046_v58, %s4680_s12 }
 0x58f   : > { %v7505_v43 = vpop.permute.xlu2 %3299  ;;  %v7507_v19 = vpop.permute.xlu0 %3289 }
 0x590   : > { %8925 = vst [vmem:[#allocation142_spill] sm:$0xff] %v7505_v43  ;;  %v7509_v52 = vpop.permute.xlu1 %3221  ;;  %v8944_v43 = vld [vmem:[#allocation132_spill] sm:$0xff] }
 0x595   : > { %3435 = vrot.lane.b32.xlu2 %v7068_v11, %s4680_s12  ;;  %3443 = vrot.lane.b32.xlu0 %v7096_v42, %s4680_s12 }
 0x596   : > { %3439 = vrot.lane.b32.xlu1 %v7062_v33, %s4680_s12 }
 0x597   : > { %v7517_v7 = vpop.permute.xlu2 %3305  ;;  %v7519_v47 = vpop.permute.xlu0 %3295 }
 0x598   : > { %8926 = vst [vmem:[#allocation161_spill] sm:$0xff] %v7517_v7  ;;  %v7521_v58 = vpop.permute.xlu1 %3291  ;;  %v8934_v7 = vld [vmem:[#allocation19_spill] sm:$0xff] }
 0x59d   : > { %3441 = vrot.lane.b32.xlu2 %v7086_v63, %s4680_s12  ;;  %3449 = vrot.lane.b32.xlu0 %v7114_v46, %s4680_s12 }
 0x59e   : > { %3445 = vrot.lane.b32.xlu1 %v7080_v49, %s4680_s12 }
 0x59f   : > { %v7529_v11 = vpop.permute.xlu2 %3311  ;;  %v7531_v42 = vpop.permute.xlu0 %3301 }
 0x5a0   : > { %8927 = vst [vmem:[#allocation13_spill] sm:$0xff] %v7529_v11  ;;  %v7533_v33 = vpop.permute.xlu1 %3297  ;;  %v3912_v11 = vsel %vm272_vm0, %v7240_v45, %v7144_v32 }
 0x5a1   : > { %8928 = vst [vmem:[#allocation27_spill] sm:$0xff] %v7531_v42  ;;  %v3944_v42 = vsel %vm2033_vm3, %v3912_v11, %v8936_v0  ;;  %v8940_v11 = vld [vmem:[#allocation114_spill] sm:$0xff] }
 0x5a2   : > { %v3976_v32 = vsel %vm2066_vm5, %v3944_v42, %v7445_v12  ;;  %v8942_v12 = vld [vmem:[#allocation135_spill] sm:$0xff] }
 0x5a3   : > { %v8943_v42 = vld [vmem:[#allocation51_spill] sm:$0xff] }
 0x5a5   : > { %3447 = vrot.lane.b32.xlu2 %v7104_v39, %s4680_s12  ;;  %3455 = vrot.lane.b32.xlu0 %v7132_v31, %s4680_s12 }
 0x5a6   : > { %3451 = vrot.lane.b32.xlu1 %v7098_v18, %s4680_s12 }
 0x5a7   : > { %v7541_v63 = vpop.permute.xlu2 %3317  ;;  %v7543_v46 = vpop.permute.xlu0 %3307 }
 0x5a8   : > { %8929 = vst [vmem:[#allocation72_spill] sm:$0xff] %v7543_v46  ;;  %v7545_v49 = vpop.permute.xlu1 %3303  ;;  %v8933_v46 = vld [vmem:[#allocation73_spill] sm:$0xff] }
 0x5a9   : > { %8930 = vst [vmem:[#allocation89_spill] sm:$0xff] %v7545_v49  ;;  %v3910_v49 = vsel %vm272_vm0, %v8935_v28, %v8934_v7 }
 0x5ad   : > { %3453 = vrot.lane.b32.xlu2 %v7122_v4, %s4680_s12  ;;  %3461 = vrot.lane.b32.xlu0 %v7150_v27, %s4680_s12 }
 0x5ae   : > { %3457 = vrot.lane.b32.xlu1 %v7116_v16, %s4680_s12 }
 0x5af   : > { %v7553_v39 = vpop.permute.xlu2 %3323  ;;  %v7555_v15 = vpop.permute.xlu0 %3313 }
 0x5b0   : > { %8931 = vst [vmem:[#allocation98_spill] sm:$0xff] %v7555_v15  ;;  %v7557_v18 = vpop.permute.xlu1 %3309  ;;  %v8937_v15 = vld [vmem:[#allocation54_spill] sm:$0xff] }
 0x5b1   : > { %8932 = vst [vmem:[#allocation106_spill] sm:$0xff] %v7557_v18  ;;  %v8938_v18 = vld [vmem:[#allocation56_spill] sm:$0xff] }
 0x5b2   : > { %v3942_v61 = vsel %vm2033_vm3, %v3910_v49, %v8938_v18  ;;  %v8941_v18 = vld [vmem:[#allocation82_spill] sm:$0xff] }
 0x5b5   : > { %3459 = vrot.lane.b32.xlu2 %v7140_v25, %s4680_s12  ;;  %3467 = vrot.lane.b32.xlu0 %v8933_v46, %s4680_s12  ;;  %v3974_v46 = vsel %vm2066_vm5, %v3942_v61, %v7405_v26  ;;  %v3913_v26 = vsel %vm272_vm0, %v8944_v43, %v8943_v42  ;;  %v8945_v61 = vld [vmem:[#allocation29_spill] sm:$0xff]  ;;  %v8947_v42 = vld [vmem:[#allocation115_spill] sm:$0xff] }
 0x5b6   : > { %3463 = vrot.lane.b32.xlu1 %v8937_v15, %s4680_s12  ;;  %v8939_v15 = vld [vmem:[#allocation11_spill] sm:$0xff] }
 0x5b7   : > { %v7577_v45 = vpop.permute.xlu2 %3329  ;;  %v3320_v22 = vpop.permute.xlu0 %3319  ;;  %v3915_v49 = vsel %vm272_vm0, %v8940_v11, %v8939_v15 }
 0x5b8   : > { %v7582_v28 = vsel %vm2099_vm4, %v3976_v32, %v3320_v22  ;;  %v3316_v7 = vpop.permute.xlu1 %3315  ;;  %v3947_v22 = vsel %vm2033_vm3, %v3915_v49, %v8945_v61  ;;  %v8946_v32 = vld [vmem:[#allocation60_spill] sm:$0xff]  ;;  %v8950_v61 = vld [vmem:[#allocation57_spill] sm:$0xff] }
 0x5b9   : > { %v7585_v0 = vsel %vm2099_vm4, %v3974_v46, %v3316_v7  ;;  %v3945_v46 = vsel %vm2033_vm3, %v3913_v26, %v7308_v24  ;;  %v3979_v7 = vsel %vm2066_vm5, %v3947_v22, %v7459_v34  ;;  %v8948_v24 = vld [vmem:[#allocation68_spill] sm:$0xff]  ;;  %v8949_v34 = vld [vmem:[#allocation22_spill] sm:$0xff] }
 0x5ba   : > { %v3916_v26 = vsel %vm272_vm0, %v8949_v34, %v8948_v24  ;;  %v8953_v34 = vld [vmem:[#allocation15_spill] sm:$0xff] }
 0x5bd   : > { %3465 = vrot.lane.b32.xlu2 %v8941_v18, %s4680_s12  ;;  %3473 = vrot.lane.b32.xlu0 %v8942_v12, %s4680_s12  ;;  %v3977_v18 = vsel %vm2066_vm5, %v3945_v46, %v7417_v44  ;;  %v3948_v44 = vsel %vm2033_vm3, %v3916_v26, %v7323_v1  ;;  %v8954_v26 = vld [vmem:[#allocation74_spill] sm:$0xff] }
 0x5be   : > { %3469 = vrot.lane.b32.xlu1 %v8946_v32, %s4680_s12  ;;  %v3980_v46 = vsel %vm2066_vm5, %v3948_v44, %v7429_v54  ;;  %v2809_v54 = vld [vmem:[#allocation3 + $0x31] sm:$0xff]  ;;  %v3924_v44 = vsel %vm272_vm0, %v8954_v26, %v8953_v34 }
 0x5bf   : > { %v7605_v15 = vpop.permute.xlu2 %3335  ;;  %v3326_v11 = vpop.permute.xlu0 %3325  ;;  %v8955_v26 = vld [vmem:[#allocation81_spill] sm:$0xff] }
 0x5c0   : > { %v7610_v43 = vsel %vm2099_vm4, %v3979_v7, %v3326_v11  ;;  %v3322_v12 = vpop.permute.xlu1 %3321  ;;  %v2825_v11 = vld [vmem:[#allocation3 + $0xf1] sm:$0xff] }
 0x5c1   : > { %v7613_v49 = vsel %vm2099_vm4, %v3977_v18, %v3322_v12  ;;  %v8951_v18 = vld [vmem:[#allocation154_spill] sm:$0xff]  ;;  %v2777_v12 = vld [vmem:[#allocation3 + $0x30] sm:$0xff] }
 0x5c5   : > { %3471 = vrot.lane.b32.xlu2 %v8947_v42, %s4680_s12  ;;  %3833 = vrot.lane.b32.xlu0 %v7122_v4, %s4683_s15 }
 0x5c6   : > { %3577 = vrot.lane.b32.xlu1 %v8950_v61, %s4681_s13 }
 0x5c7   : > { %v7626_v22 = vpop.permute.xlu2 %3341  ;;  %v7628_v32 = vpop.permute.xlu0 %3331 }
 0x5c8   : > { %v3328_v7 = vpop.permute.xlu1 %3327 }
 0x5c9   : > { %v7633_v4 = vsel %vm2099_vm4, %v3980_v46, %v3328_v7  ;;  %v3956_v46 = vsel %vm2033_vm3, %v3924_v44, %v7334_v2  ;;  %v2778_v2 = vld [vmem:[#allocation3 + $0x38] sm:$0xff]  ;;  %v8958_v44 = vld [vmem:[#allocation107_spill] sm:$0xff] }
 0x5ca   : > { %v3988_v7 = vsel %vm2066_vm5, %v3956_v46, %v7497_v29  ;;  %v8957_v29 = vld [vmem:[#allocation102_spill] sm:$0xff] }
 0x5cb   : > { %v3925_v46 = vsel %vm272_vm0, %v8958_v44, %v8957_v29 }
 0x5cd   : > { %3705 = vrot.lane.b32.xlu2 %v2825_v11, %s4682_s14  ;;  %3579 = vrot.lane.b32.xlu0 %v8951_v18, %s4681_s13 }
 0x5ce   : > { %3545 = vrot.lane.b32.xlu1 %v2777_v12, %s4681_s13 }
 0x5cf   : > { %v7639_v1 = vpop.permute.xlu2 %3347  ;;  %v7641_v42 = vpop.permute.xlu0 %3337 }
 0x5d0   : > { %8952 = vst [vmem:[#allocation116_spill] sm:$0xff] %v7639_v1  ;;  %v7643_v24 = vpop.permute.xlu1 %3333 }
 0x5d5   : > { %3673 = vrot.lane.b32.xlu2 %v2809_v54, %s4682_s14  ;;  %3835 = vrot.lane.b32.xlu0 %v7132_v31, %s4683_s15  ;;  %v2826_v54 = vld [vmem:[#allocation3 + $0xf9] sm:$0xff]  ;;  %v3927_v31 = vsel %vm272_vm0, %v7327_v60, %v8955_v26 }
 0x5d6   : > { %3801 = vrot.lane.b32.xlu1 %v7021_v14, %s4683_s15  ;;  %v8956_v14 = vld [vmem:[#allocation123_spill] sm:$0xff] }
 0x5d7   : > { %v7657_v11 = vpop.permute.xlu2 %3417  ;;  %v3344_v12 = vpop.permute.xlu0 %3343 }
 0x5d8   : > { %v7660_v1 = vsel %vm2099_vm4, %v3988_v7, %v3344_v12  ;;  %v7662_v34 = vpop.permute.xlu1 %3339  ;;  %v3959_v7 = vsel %vm2033_vm3, %v3927_v31, %v7345_v57  ;;  %v3957_v12 = vsel %vm2033_vm3, %v3925_v46, %v7359_v9  ;;  %v2810_v31 = vld [vmem:[#allocation3 + $0x39] sm:$0xff] }
 0x5d9   : > { %v3991_v60 = vsel %vm2066_vm5, %v3959_v7, %v7509_v52  ;;  %v3989_v10 = vsel %vm2066_vm5, %v3957_v12, %v7469_v62  ;;  %v2842_v9 = vld [vmem:[#allocation3 + $0x3a] sm:$0xff]  ;;  %v8960_v52 = vld [vmem:[#allocation75_spill] sm:$0xff] }
 0x5dd   : > { %3707 = vrot.lane.b32.xlu2 %v2826_v54, %s4682_s14  ;;  %3581 = vrot.lane.b32.xlu0 %v8956_v14, %s4681_s13 }
 0x5de   : > { %3547 = vrot.lane.b32.xlu1 %v2778_v2, %s4681_s13  ;;  %v8961_v2 = vld [vmem:[#allocation138_spill] sm:$0xff] }
 0x5df   : > { %v7680_v54 = vpop.permute.xlu2 %3423  ;;  %v3350_v26 = vpop.permute.xlu0 %3349  ;;  %v3928_v44 = vsel %vm272_vm0, %v8961_v2, %v8960_v52  ;;  %v2843_v52 = vld [vmem:[#allocation3 + $0x4a] sm:$0xff] }
 0x5e0   : > { %v7685_v35 = vsel %vm2099_vm4, %v3991_v60, %v3350_v26  ;;  %v3346_v29 = vpop.permute.xlu1 %3345  ;;  %v3960_v62 = vsel %vm2033_vm3, %v3928_v44, %v7371_v20  ;;  %v2827_v60 = vld [vmem:[#allocation3 + $0x109] sm:$0xff]  ;;  %v8963_v26 = vld [vmem:[#allocation14_spill] sm:$0xff] }
 0x5e1   : > { %8959 = vst [vmem:[#allocation23_spill] sm:$0xff] %v7685_v35  ;;  %v7688_v57 = vsel %vm2099_vm4, %v3989_v10, %v3346_v29  ;;  %v3992_v7 = vsel %vm2066_vm5, %v3960_v62, %v7481_v13  ;;  %v2779_v29 = vld [vmem:[#allocation3 + $0x48] sm:$0xff] }
 0x5e2   : > { %v2811_v13 = vld [vmem:[#allocation3 + $0x49] sm:$0xff] }
 0x5e5   : > { %3675 = vrot.lane.b32.xlu2 %v2810_v31, %s4682_s14  ;;  %3837 = vrot.lane.b32.xlu0 %v7116_v16, %s4683_s15 }
 0x5e6   : > { %3803 = vrot.lane.b32.xlu1 %v2842_v9, %s4683_s15 }
 0x5e7   : > { %v7699_v46 = vpop.permute.xlu2 %3429  ;;  %v7701_v10 = vpop.permute.xlu0 %3419 }
 0x5e8   : > { %v3352_v12 = vpop.permute.xlu1 %3351 }
 0x5e9   : > { %v7706_v16 = vsel %vm2099_vm4, %v3992_v7, %v3352_v12  ;;  %v2828_v7 = vld [vmem:[#allocation3 + $0x111] sm:$0xff]  ;;  %v8966_v12 = vld [vmem:[#allocation99_spill] sm:$0xff] }
 0x5ea   : > { %8962 = vst [vmem:[#allocation63_spill] sm:$0xff] %v7706_v16  ;;  %v2812_v16 = vld [vmem:[#allocation3 + $0x51] sm:$0xff] }
 0x5ed   : > { %3709 = vrot.lane.b32.xlu2 %v2827_v60, %s4682_s14  ;;  %3583 = vrot.lane.b32.xlu0 %v8963_v26, %s4681_s13  ;;  %v2780_v60 = vld [vmem:[#allocation3 + $0x50] sm:$0xff] }
 0x5ee   : > { %3549 = vrot.lane.b32.xlu1 %v2779_v29, %s4681_s13 }
 0x5ef   : > { %v7712_v20 = vpop.permute.xlu2 %3435  ;;  %v7714_v31 = vpop.permute.xlu0 %3425 }
 0x5f0   : > { %8964 = vst [vmem:[#allocation127_spill] sm:$0xff] %v7712_v20  ;;  %v7716_v9 = vpop.permute.xlu1 %3421  ;;  %v8977_v20 = vld [vmem:[#allocation47_spill] sm:$0xff] }
 0x5f5   : > { %3677 = vrot.lane.b32.xlu2 %v2811_v13, %s4682_s14  ;;  %3839 = vrot.lane.b32.xlu0 %v7140_v25, %s4683_s15 }
 0x5f6   : > { %3805 = vrot.lane.b32.xlu1 %v2843_v52, %s4683_s15 }
 0x5f7   : > { %v7722_v2 = vpop.permute.xlu2 %3441  ;;  %v7724_v44 = vpop.permute.xlu0 %3431 }
 0x5f8   : > { %8965 = vst [vmem:[#allocation137_spill] sm:$0xff] %v7722_v2  ;;  %v7726_v62 = vpop.permute.xlu1 %3427 }
 0x5fd   : > { %3711 = vrot.lane.b32.xlu2 %v2828_v7, %s4682_s14  ;;  %3585 = vrot.lane.b32.xlu0 %v8966_v12, %s4681_s13  ;;  %v2844_v7 = vld [vmem:[#allocation3 + $0x52] sm:$0xff] }
 0x5fe   : > { %3551 = vrot.lane.b32.xlu1 %v2780_v60, %s4681_s13 }
 0x5ff   : > { %v3448_v29 = vpop.permute.xlu2 %3447  ;;  %v7732_v25 = vpop.permute.xlu0 %3437 }
 0x600   : > { %8967 = vst [vmem:[#allocation146_spill] sm:$0xff] %v7732_v25  ;;  %v7736_v13 = vsel %vm2132_vm6, %v7582_v28, %v3448_v29  ;;  %v7738_v52 = vpop.permute.xlu1 %3433  ;;  %v8976_v25 = vld [vmem:[#allocation163_spill] sm:$0xff] }
 0x601   : > { %8968 = vst [vmem:[#allocation156_spill] sm:$0xff] %v7736_v13 }
 0x602   : > { %8969 = vst [vmem:[#allocation165_spill] sm:$0xff] %v7738_v52 }
 0x605   : > { %3679 = vrot.lane.b32.xlu2 %v2812_v16, %s4682_s14  ;;  %3841 = vrot.lane.b32.xlu0 %v7150_v27, %s4683_s15  ;;  %v4161_v16 = vld [vmem:[%s8387_s4 + $0x40] sm:$0xff]  ;;  %v4160_v27 = vld [vmem:[%s8387_s4 + $0x38] sm:$0xff] }
 0x606   : > { %3807 = vrot.lane.b32.xlu1 %v2844_v7, %s4683_s15  ;;  %4595 = vmatpush.msra.mxu3 %v4161_v16  ;;  %v8972_v7 = vld [vmem:[#allocation33_spill] sm:$0xff] }
 0x607   : > { %v3454_v35 = vpop.permute.xlu2 %3453  ;;  %v3444_v60 = vpop.permute.xlu0 %3443  ;;  %4269 = vmatpush.msra.mxu1 %v4161_v16  ;;  %v2781_v16 = vld [vmem:[#allocation3 + $0x60] sm:$0xff] }
 0x608   : > { %v7746_v2 = vsel %vm2132_vm6, %v7610_v43, %v3454_v35  ;;  %v7750_v28 = vsel %vm2132_vm6, %v7585_v0, %v3444_v60  ;;  %v7752_v29 = vpop.permute.xlu1 %3439  ;;  %v3918_v35 = vsel %vm272_vm0, %v8951_v18, %v8972_v7  ;;  %v2829_v43 = vld [vmem:[#allocation3 + $0x121] sm:$0xff]  ;;  %4596 = vmatpush.msra.mxu3 %v4160_v27  ;;  %v8973_v0 = vld [vmem:[#allocation8_spill] sm:$0xff]  ;;  %v8974_v60 = vld [vmem:[#allocation141_spill] sm:$0xff] }
 0x609   : > { %8970 = vst [vmem:[#allocation17_spill] sm:$0xff] %v7750_v28  ;;  %4270 = vmatpush.msra.mxu1 %v4160_v27  ;;  %v3911_v13 = vsel %vm272_vm0, %v8974_v60, %v8973_v0  ;;  %v8975_v28 = vld [vmem:[#allocation24_spill] sm:$0xff]  ;;  %v4159_v27 = vld [vmem:[%s8387_s4 + $0x30] sm:$0xff] }
 0x60a   : > { %8971 = vst [vmem:[#allocation34_spill] sm:$0xff] %v7752_v29  ;;  %v3950_v29 = vsel %vm2033_vm3, %v3918_v35, %v8975_v28  ;;  %v3943_v52 = vsel %vm2033_vm3, %v3911_v13, %v8977_v20  ;;  %4597 = vmatpush.msra.mxu3 %v4159_v27  ;;  %v2813_v60 = vld [vmem:[#allocation3 + $0x61] sm:$0xff] }
 0x60b   : > { %v3982_v18 = vsel %vm2066_vm5, %v3950_v29, %v7473_v17  ;;  %v3975_v28 = vsel %vm2066_vm5, %v3943_v52, %v7431_v50  ;;  %4271 = vmatpush.msra.mxu1 %v4159_v27  ;;  %v4158_v50 = vld [vmem:[%s8387_s4 + $0x28] sm:$0xff]  ;;  %v8978_v52 = vld [vmem:[#allocation144_spill] sm:$0xff] }
 0x60c   : > { %v4014_v7 = vsel %vm2099_vm4, %v3982_v18, %v7628_v32  ;;  %v4007_v17 = vsel %vm2099_vm4, %v3975_v28, %v7541_v63  ;;  %v4157_v32 = vld [vmem:[%s8387_s4 + $0x20] sm:$0xff]  ;;  %4598 = vmatpush.msra.mxu3 %v4158_v50  ;;  %v4156_v63 = vld [vmem:[%s8387_s4 + $0x18] sm:$0xff]  ;;  %v3921_v0 = vsel %vm272_vm0, %v8966_v12, %v8978_v52  ;;  %v4155_v12 = vld [vmem:[%s8387_s4 + $0x10] sm:$0xff] }
 0x60d   : > { %3713 = vrot.lane.b32.xlu2 %v2829_v43, %s4682_s14  ;;  %3587 = vrot.lane.b32.xlu0 %v8976_v25, %s4681_s13  ;;  %v8979_v18 = vld [vmem:[#allocation147_spill] sm:$0xff]  ;;  %v4154_v52 = vld [vmem:[%s8387_s4 + $0x8] sm:$0xff] }
 0x60e   : > { %3553 = vrot.lane.b32.xlu1 %v2781_v16, %s4681_s13  ;;  %4272 = vmatpush.msra.mxu1 %v4158_v50  ;;  %v2862_v16 = vld [vmem:[#allocation3 + $0x12a] sm:$0xff]  ;;  %v3953_v27 = vsel %vm2033_vm3, %v3921_v0, %v8979_v18  ;;  %v2845_v28 = vld [vmem:[#allocation3 + $0x62] sm:$0xff] }
 0x60f   : > { %v3460_v35 = vpop.permute.xlu2 %3459  ;;  %v7783_v43 = vpop.permute.xlu0 %3449  ;;  %4599 = vmatpush.msra.mxu3 %v4157_v32 }
 0x610   : > { %v7788_v20 = vsel %vm2132_vm6, %v4014_v7, %v3460_v35  ;;  %v3446_v13 = vpop.permute.xlu1 %3445  ;;  %4273 = vmatpush.msra.mxu1 %v4157_v32  ;;  %v3985_v7 = vsel %vm2066_vm5, %v3953_v27, %v7485_v36 }
 0x611   : > { %v7791_v29 = vsel %vm2132_vm6, %v4007_v17, %v3446_v13  ;;  %4600 = vmatpush.msra.mxu3 %v4156_v63  ;;  %v4017_v35 = vsel %vm2099_vm4, %v3985_v7, %v7641_v42  ;;  %v4153_v42 = vld [vmem:[%s8387_s4] sm:$0xff] }
 0x612   : > { %4274 = vmatpush.msra.mxu1 %v4156_v63  ;;  %v8980_v63 = vld [vmem:[#allocation164_spill] sm:$0xff] }
 0x613   : > { %4601 = vmatpush.msra.mxu3 %v4155_v12  ;;  %v3919_v0 = vsel %vm272_vm0, %v8956_v14, %v8980_v63  ;;  %v2863_v63 = vld [vmem:[#allocation3 + $0x13a] sm:$0xff] }
 0x614   : > { %4275 = vmatpush.msra.mxu1 %v4155_v12  ;;  %v3951_v27 = vsel %vm2033_vm3, %v3919_v0, %v7336_v3  ;;  %v8983_v0 = vld [vmem:[#allocation25_spill] sm:$0xff] }
 0x615   : > { %3681 = vrot.lane.b32.xlu2 %v2813_v60, %s4682_s14  ;;  %3843 = vrot.lane.b32.xlu0 %v2862_v16, %s4683_s15  ;;  %v2799_v60 = vld [vmem:[#allocation3 + $0x138] sm:$0xff]  ;;  %v8981_v16 = vld [vmem:[#allocation7_spill] sm:$0xff]  ;;  %v3983_v14 = vsel %vm2066_vm5, %v3951_v27, %v7441_v5 }
 0x616   : > { %3809 = vrot.lane.b32.xlu1 %v2845_v28, %s4683_s15  ;;  %4602 = vmatpush.msra.mxu3 %v4154_v52  ;;  %v3917_v18 = vsel %vm272_vm0, %v8950_v61, %v8981_v16  ;;  %v2782_v28 = vld [vmem:[#allocation3 + $0x68] sm:$0xff]  ;;  %v4015_v3 = vsel %vm2099_vm4, %v3983_v14, %v7643_v24  ;;  %v2800_v14 = vld [vmem:[#allocation3 + $0x140] sm:$0xff] }
 0x617   : > { %v3466_v17 = vpop.permute.xlu2 %3465  ;;  %v3456_v13 = vpop.permute.xlu0 %3455  ;;  %4276 = vmatpush.msra.mxu1 %v4154_v52  ;;  %v3949_v7 = vsel %vm2033_vm3, %v3917_v18, %v7338_v48 }
 0x618   : > { %v7818_v50 = vsel %vm2132_vm6, %v4017_v35, %v3466_v17  ;;  %v7822_v32 = vsel %vm2132_vm6, %v7633_v4, %v3456_v13  ;;  %v7824_v36 = vpop.permute.xlu1 %3451  ;;  %v2830_v4 = vld [vmem:[#allocation3 + $0x129] sm:$0xff]  ;;  %4603 = vmatpush.msra.mxu3 %v4153_v42  ;;  %v3981_v61 = vsel %vm2066_vm5, %v3949_v7, %v7457_v59 }
 0x619   : > { %4277 = vmatpush.msra.mxu1 %v4153_v42  ;;  %v4013_v17 = vsel %vm2099_vm4, %v3981_v61, %v7577_v45  ;;  %v8982_v59 = vld [vmem:[#allocation59_spill] sm:$0xff]  ;;  %v3920_v45 = vsel %vm272_vm0, %v8963_v26, %v8983_v0  ;;  %v8984_v61 = vld [vmem:[#allocation58_spill] sm:$0xff] }
 0x61a   : > { %v3922_v24 = vsel %vm272_vm0, %v8976_v25, %v8982_v59  ;;  %v2814_v42 = vld [vmem:[#allocation3 + $0x69] sm:$0xff] }
 0x61d   : > { %3715 = vrot.lane.b32.xlu2 %v2830_v4, %s4682_s14  ;;  %3589 = vrot.lane.b32.xlu0 %v2799_v60, %s4681_s13  ;;  %v2846_v4 = vld [vmem:[#allocation3 + $0x6a] sm:$0xff]  ;;  %v3952_v60 = vsel %vm2033_vm3, %v3920_v45, %v7349_v41 }
 0x61e   : > { %3555 = vrot.lane.b32.xlu1 %v2782_v28, %s4681_s13  ;;  %v3984_v16 = vsel %vm2066_vm5, %v3952_v60, %v7471_v40 }
 0x61f   : > { %v3472_v12 = vpop.permute.xlu2 %3471  ;;  %v3462_v35 = vpop.permute.xlu0 %3461  ;;  %v4016_v27 = vsel %vm2099_vm4, %v3984_v16, %v7605_v15  ;;  %v2801_v16 = vld [vmem:[#allocation3 + $0x150] sm:$0xff] }
 0x620   : > { %v7855_v48 = vsel %vm2132_vm6, %v7660_v1, %v3472_v12  ;;  %v7858_v5 = vsel %vm2132_vm6, %v4015_v3, %v3462_v35  ;;  %v3458_v13 = vpop.permute.xlu1 %3457  ;;  %v3954_v1 = vsel %vm2033_vm3, %v3922_v24, %v7347_v38  ;;  %v8985_v3 = vld [vmem:[#allocation117_spill] sm:$0xff] }
 0x621   : > { %v7861_v52 = vsel %vm2132_vm6, %v4013_v17, %v3458_v13  ;;  %v3986_v25 = vsel %vm2066_vm5, %v3954_v1, %v7455_v30  ;;  %v2831_v30 = vld [vmem:[#allocation3 + $0x139] sm:$0xff]  ;;  %v3923_v40 = vsel %vm272_vm0, %v8985_v3, %v8984_v61 }
 0x622   : > { %v4018_v26 = vsel %vm2099_vm4, %v3986_v25, %v7662_v34  ;;  %v2783_v34 = vld [vmem:[#allocation3 + $0x78] sm:$0xff]  ;;  %v3955_v15 = vsel %vm2033_vm3, %v3923_v40, %v7361_v53  ;;  %v2864_v53 = vld [vmem:[#allocation3 + $0x142] sm:$0xff] }
 0x623   : > { %v3987_v12 = vsel %vm2066_vm5, %v3955_v15, %v7483_v23  ;;  %v2847_v23 = vld [vmem:[#allocation3 + $0x7a] sm:$0xff] }
 0x624   : > { %v4019_v13 = vsel %vm2099_vm4, %v3987_v12, %v7626_v22  ;;  %v4041_v22 = vsel %vm2132_vm6, %v7613_v49, %v7783_v43  ;;  %v2832_v25 = vld [vmem:[#allocation3 + $0x141] sm:$0xff]  ;;  %v8986_v49 = vld [vmem:[#allocation12_spill] sm:$0xff]  ;;  %v8989_v61 = vld [vmem:[#allocation157_spill] sm:$0xff] }
 0x625   : > { %3683 = vrot.lane.b32.xlu2 %v2814_v42, %s4682_s14  ;;  %3845 = vrot.lane.b32.xlu0 %v2863_v63, %s4683_s15  ;;  %v2815_v63 = vld [vmem:[#allocation3 + $0x79] sm:$0xff] }
 0x626   : > { %3811 = vrot.lane.b32.xlu1 %v2846_v4, %s4683_s15  ;;  %v8987_v43 = vld [vmem:[#allocation66_spill] sm:$0xff] }
 0x627   : > { %v3706_v38 = vpop.permute.xlu2 %3705  ;;  %v3468_v18 = vpop.permute.xlu0 %3467 }
 0x628   : > { %v7885_v28 = vsel %vm2132_vm6, %v4018_v26, %v3468_v18  ;;  %v3464_v41 = vpop.permute.xlu1 %3463  ;;  %v2584_v26 = vld [vmem:[#allocation3] sm:$0xff] }
 0x629   : > { %v7888_v7 = vsel %vm2132_vm6, %v4016_v27, %v3464_v41  ;;  %v2784_v18 = vld [vmem:[#allocation3 + $0x80] sm:$0xff]  ;;  %v3914_v27 = vsel %vm272_vm0, %v8987_v43, %v8986_v49 }
 0x62a   : > { %v3946_v3 = vsel %vm2033_vm3, %v3914_v27, %v8989_v61  ;;  %v8992_v27 = vld [vmem:[#allocation38_spill] sm:$0xff] }
 0x62b   : > { %v3978_v12 = vsel %vm2066_vm5, %v3946_v3, %v7443_v6 }
 0x62d   : > { %3717 = vrot.lane.b32.xlu2 %v2831_v30, %s4682_s14  ;;  %3591 = vrot.lane.b32.xlu0 %v2800_v14, %s4681_s13  ;;  %v8988_v30 = vld [vmem:[#allocation50_spill] sm:$0xff] }
 0x62e   : > { %3557 = vrot.lane.b32.xlu1 %v2783_v34, %s4681_s13  ;;  %v3897_v14 = vsel %vm272_vm0, %v2584_v26, %v8988_v30  ;;  %v8990_v34 = vld [vmem:[#allocation30_spill] sm:$0xff]  ;;  %v2785_v26 = vld [vmem:[#allocation3 + $0x90] sm:$0xff] }
 0x62f   : > { %v3674_v35 = vpop.permute.xlu2 %3673  ;;  %v3474_v17 = vpop.permute.xlu0 %3473  ;;  %v3929_v15 = vsel %vm2033_vm3, %v3897_v14, %v8990_v34  ;;  %v2866_v34 = vld [vmem:[#allocation3 + $0x15a] sm:$0xff] }
 0x630   : > { %v7904_v59 = vsel %vm2132_vm6, %v7688_v57, %v3474_v17  ;;  %v3470_v24 = vpop.permute.xlu1 %3469  ;;  %v3961_v17 = vsel %vm2066_vm5, %v3929_v15, %v7385_v37  ;;  %v2848_v37 = vld [vmem:[#allocation3 + $0x82] sm:$0xff] }
 0x631   : > { %v7907_v42 = vsel %vm2132_vm6, %v4019_v13, %v3470_v24  ;;  %v4010_v13 = vsel %vm2099_vm4, %v3978_v12, %v7553_v39  ;;  %v3993_v24 = vsel %vm2099_vm4, %v3961_v17, %v7507_v19  ;;  %v2849_v12 = vld [vmem:[#allocation3 + $0x92] sm:$0xff] }
 0x635   : > { %3685 = vrot.lane.b32.xlu2 %v2815_v63, %s4682_s14  ;;  %3847 = vrot.lane.b32.xlu0 %v2864_v53, %s4683_s15  ;;  %v4042_v63 = vsel %vm2132_vm6, %v4010_v13, %v7824_v36  ;;  %v4025_v53 = vsel %vm2132_vm6, %v3993_v24, %v7657_v11 }
 0x636   : > { %3813 = vrot.lane.b32.xlu1 %v2847_v23, %s4683_s15 }
 0x637   : > { %v3708_v0 = vpop.permute.xlu2 %3707  ;;  %v3834_v45 = vpop.permute.xlu0 %3833 }
 0x638   : > { %v3578_v57 = vpop.permute.xlu1 %3577 }
 0x639   : > { %v4073_v1 = vsel %vm2165_vm8, %v4041_v22, %v3578_v57  ;;  %v2865_v22 = vld [vmem:[#allocation3 + $0x152] sm:$0xff] }
 0x63a   : > { %v4105_v4 = vsel %vm2198_vm7, %v4073_v1, %v3706_v38 }
 0x63b   : > { %v4137_v60 = vsel %vm2231_vm10, %v4105_v4, %v3834_v45  ;;  %v2816_v45 = vld [vmem:[#allocation3 + $0x81] sm:$0xff] }
 0x63c   : > { %4565 = vmatmul.msk.f32.vlgmr.msra.gmra.mxu3 %vm2277_vm9, %v4137_v60  ;;  %v2833_v60 = vld [vmem:[#allocation3 + $0x151] sm:$0xff] }
 0x63d   : > { %3719 = vrot.lane.b32.xlu2 %v2832_v25, %s4682_s14  ;;  %3593 = vrot.lane.b32.xlu0 %v2801_v16, %s4681_s13  ;;  %v2802_v25 = vld [vmem:[#allocation3 + $0x158] sm:$0xff]  ;;  %v2585_v16 = vld [vmem:[#allocation3 + $0x8] sm:$0xff] }
 0x63e   : > { %3559 = vrot.lane.b32.xlu1 %v2784_v18, %s4681_s13  ;;  %v8991_v18 = vld [vmem:[#allocation41_spill] sm:$0xff] }
 0x63f   : > { %v3676_v41 = vpop.permute.xlu2 %3675  ;;  %v3580_v38 = vpop.permute.xlu0 %3579  ;;  %v3898_v49 = vsel %vm272_vm0, %v2585_v16, %v8991_v18 }
 0x640   : > { %v3546_v40 = vpop.permute.xlu1 %3545  ;;  %v4074_v23 = vsel %vm2165_vm8, %v4042_v63, %v3580_v38  ;;  %v3930_v38 = vsel %vm2033_vm3, %v3898_v49, %v8992_v27  ;;  %v2834_v63 = vld [vmem:[#allocation3 + $0x159] sm:$0xff]  ;;  %v2804_v27 = vld [vmem:[#allocation3 + $0x170] sm:$0xff] }
 0x641   : > { %v4057_v6 = vsel %vm2165_vm8, %v4025_v53, %v3546_v40  ;;  %v4106_v36 = vsel %vm2198_vm7, %v4074_v23, %v3708_v0  ;;  %v3962_v30 = vsel %vm2066_vm5, %v3930_v38, %v7357_v55  ;;  %v2817_v40 = vld [vmem:[#allocation3 + $0x91] sm:$0xff]  ;;  %v2803_v53 = vld [vmem:[#allocation3 + $0x168] sm:$0xff] }
 0x642   : > { %v4089_v11 = vsel %vm2198_vm7, %v4057_v6, %v3674_v35  ;;  %v3994_v14 = vsel %vm2099_vm4, %v3962_v30, %v7521_v58  ;;  %v2786_v23 = vld [vmem:[#allocation3 + $0x98] sm:$0xff]  ;;  %v8993_v6 = vld [vmem:[#allocation4_spill] sm:$0xff]  ;;  %v2787_v38 = vld [vmem:[#allocation3 + $0xa8] sm:$0xff] }
 0x643   : > { %v4026_v61 = vsel %vm2132_vm6, %v3994_v14, %v7701_v10 }
 0x645   : > { %3687 = vrot.lane.b32.xlu2 %v2816_v45, %s4682_s14  ;;  %3849 = vrot.lane.b32.xlu0 %v2865_v22, %s4683_s15 }
 0x646   : > { %3815 = vrot.lane.b32.xlu1 %v2848_v37, %s4683_s15 }
 0x647   : > { %v3710_v19 = vpop.permute.xlu2 %3709  ;;  %v3836_v39 = vpop.permute.xlu0 %3835 }
 0x648   : > { %v3802_v57 = vpop.permute.xlu1 %3801  ;;  %v4138_v1 = vsel %vm2231_vm10, %v4106_v36, %v3836_v39  ;;  %v8994_v39 = vld [vmem:[#allocation10_spill] sm:$0xff] }
 0x649   : > { %v4121_v4 = vsel %vm2231_vm10, %v4089_v11, %v3802_v57  ;;  %4566 = vmatmul.msk.f32.gmra.mxu3 %vm2277_vm9, %v4138_v1 }
 0x64a   : > { %4549 = vmatmul.msk.f32.vlgmr.msra.gmra.mxu1 %vm2277_vm9, %v4121_v4 }
 0x64d   : > { %3721 = vrot.lane.b32.xlu2 %v2833_v60, %s4682_s14  ;;  %3595 = vrot.lane.b32.xlu0 %v2802_v25, %s4681_s13  ;;  %v2818_v60 = vld [vmem:[#allocation3 + $0x99] sm:$0xff]  ;;  %v2867_v25 = vld [vmem:[#allocation3 + $0x16a] sm:$0xff] }
 0x64e   : > { %3561 = vrot.lane.b32.xlu1 %v2785_v26, %s4681_s13  ;;  %v2850_v26 = vld [vmem:[#allocation3 + $0x9a] sm:$0xff] }
 0x64f   : > { %v3678_v0 = vpop.permute.xlu2 %3677  ;;  %v3582_v35 = vpop.permute.xlu0 %3581 }
 0x650   : > { %v3548_v43 = vpop.permute.xlu1 %3547  ;;  %v4075_v3 = vsel %vm2165_vm8, %v7746_v2, %v3582_v35 }
 0x651   : > { %v4058_v15 = vsel %vm2165_vm8, %v4026_v61, %v3548_v43  ;;  %v4107_v58 = vsel %vm2198_vm7, %v4075_v3, %v3710_v19  ;;  %v2835_v43 = vld [vmem:[#allocation3 + $0x169] sm:$0xff]  ;;  %v8995_v61 = vld [vmem:[#allocation9_spill] sm:$0xff] }
 0x652   : > { %v4090_v10 = vsel %vm2198_vm7, %v4058_v15, %v3676_v41  ;;  %v4654_v41 = vld [vmem:[#allocation3 + $0x18] sm:$0xff] }
 0x653   : > { %v3899_v37 = vsel %vm272_vm0, %v4654_v41, %v8993_v6  ;;  %v2805_v41 = vld [vmem:[#allocation3 + $0x180] sm:$0xff]  ;;  %v2788_v6 = vld [vmem:[#allocation3 + $0xb0] sm:$0xff] }
 0x654   : > { %v3931_v36 = vsel %vm2033_vm3, %v3899_v37, %v8994_v39  ;;  %v8997_v39 = vld [vmem:[#allocation55_spill] sm:$0xff] }
 0x655   : > { %3689 = vrot.lane.b32.xlu2 %v2817_v40, %s4682_s14  ;;  %3851 = vrot.lane.b32.xlu0 %v2866_v34, %s4683_s15  ;;  %v3963_v57 = vsel %vm2066_vm5, %v3931_v36, %v7383_v21  ;;  %v8996_v34 = vld [vmem:[#allocation94_spill] sm:$0xff] }
 0x656   : > { %3817 = vrot.lane.b32.xlu1 %v2849_v12, %s4683_s15  ;;  %v3995_v11 = vsel %vm2099_vm4, %v3963_v57, %v7493_v56 }
 0x657   : > { %v3712_v55 = vpop.permute.xlu2 %3711  ;;  %v3838_v17 = vpop.permute.xlu0 %3837  ;;  %v4027_v1 = vsel %vm2132_vm6, %v3995_v11, %v7716_v9  ;;  %v8998_v11 = vld [vmem:[#allocation167_spill] sm:$0xff] }
 0x658   : > { %v3804_v13 = vpop.permute.xlu1 %3803  ;;  %v4139_v2 = vsel %vm2231_vm10, %v4107_v58, %v3838_v17 }
 0x659   : > { %v4122_v24 = vsel %vm2231_vm10, %v4090_v10, %v3804_v13  ;;  %4567 = vmatmul.msk.f32.gmra.mxu3 %vm2277_vm9, %v4139_v2  ;;  %v2819_v13 = vld [vmem:[#allocation3 + $0xa9] sm:$0xff]  ;;  %v8019_v10 = vld [vmem:[#allocation3 + $0x172] sm:$0xff] }
 0x65a   : > { %4550 = vmatmul.msk.f32.gmra.mxu1 %vm2277_vm9, %v4122_v24 }
 0x65d   : > { %3723 = vrot.lane.b32.xlu2 %v2834_v63, %s4682_s14  ;;  %3597 = vrot.lane.b32.xlu0 %v2803_v53, %s4681_s13 }
 0x65e   : > { %3563 = vrot.lane.b32.xlu1 %v2786_v23, %s4681_s13 }
 0x65f   : > { %v3680_v45 = vpop.permute.xlu2 %3679  ;;  %v3584_v22 = vpop.permute.xlu0 %3583 }
 0x660   : > { %v3550_v19 = vpop.permute.xlu1 %3549  ;;  %v4076_v4 = vsel %vm2165_vm8, %v7822_v32, %v3584_v22  ;;  %v2836_v22 = vld [vmem:[#allocation3 + $0x171] sm:$0xff] }
 0x661   : > { %v4059_v16 = vsel %vm2165_vm8, %v4027_v1, %v3550_v19  ;;  %v4108_v56 = vsel %vm2198_vm7, %v4076_v4, %v3712_v55 }
 0x662   : > { %v4091_v9 = vsel %vm2198_vm7, %v4059_v16, %v3678_v0  ;;  %v4655_v0 = vld [vmem:[#allocation3 + $0x20] sm:$0xff] }
 0x663   : > { %v3900_v3 = vsel %vm272_vm0, %v4655_v0, %v8995_v61  ;;  %v9000_v0 = vld [vmem:[#allocation6_spill] sm:$0xff] }
 0x664   : > { %v3932_v15 = vsel %vm2033_vm3, %v3900_v3, %v8996_v34 }
 0x665   : > { %3691 = vrot.lane.b32.xlu2 %v2818_v60, %s4682_s14  ;;  %3853 = vrot.lane.b32.xlu0 %v2867_v25, %s4683_s15  ;;  %v3964_v12 = vsel %vm2066_vm5, %v3932_v15, %v7397_v51  ;;  %v2851_v51 = vld [vmem:[#allocation3 + $0xaa] sm:$0xff]  ;;  %v9002_v15 = vld [vmem:[#allocation65_spill] sm:$0xff] }
 0x666   : > { %3819 = vrot.lane.b32.xlu1 %v2850_v26, %s4683_s15  ;;  %v3996_v55 = vsel %vm2099_vm4, %v3964_v12, %v7519_v47  ;;  %v2820_v26 = vld [vmem:[#allocation3 + $0xb1] sm:$0xff] }
 0x667   : > { %v3714_v21 = vpop.permute.xlu2 %3713  ;;  %v3840_v35 = vpop.permute.xlu0 %3839  ;;  %v4028_v17 = vsel %vm2132_vm6, %v3996_v55, %v7680_v54  ;;  %v9003_v55 = vld [vmem:[#allocation142_spill] sm:$0xff] }
 0x668   : > { %v3806_v18 = vpop.permute.xlu1 %3805  ;;  %v4140_v32 = vsel %vm2231_vm10, %v4108_v56, %v3840_v35  ;;  %v2852_v56 = vld [vmem:[#allocation3 + $0xb2] sm:$0xff] }
 0x669   : > { %v4123_v49 = vsel %vm2231_vm10, %v4091_v9, %v3806_v18  ;;  %4568 = vmatmul.msk.f32.gmra.mxu3 %vm2277_vm9, %v4140_v32 }
 0x66a   : > { %4551 = vmatmul.msk.f32.gmra.mxu1 %vm2277_vm9, %v4123_v49  ;;  %v2821_v49 = vld [vmem:[#allocation3 + $0xc1] sm:$0xff] }
 0x66d   : > { %3725 = vrot.lane.b32.xlu2 %v2835_v43, %s4682_s14  ;;  %3599 = vrot.lane.b32.xlu0 %v2804_v27, %s4681_s13  ;;  %v8999_v43 = vld [vmem:[#allocation70_spill] sm:$0xff] }
 0x66e   : > { %3565 = vrot.lane.b32.xlu1 %v2787_v38, %s4681_s13  ;;  %v2789_v27 = vld [vmem:[#allocation3 + $0xc0] sm:$0xff] }
 0x66f   : > { %v3682_v30 = vpop.permute.xlu2 %3681  ;;  %v3586_v14 = vpop.permute.xlu0 %3585 }
 0x670   : > { %v3552_v40 = vpop.permute.xlu1 %3551  ;;  %v4077_v58 = vsel %vm2165_vm8, %v7861_v52, %v3586_v14 }
 0x671   : > { %v4060_v2 = vsel %vm2165_vm8, %v4028_v17, %v3552_v40  ;;  %v4109_v54 = vsel %vm2198_vm7, %v4077_v58, %v3714_v21  ;;  %v2869_v21 = vld [vmem:[#allocation3 + $0x182] sm:$0xff]  ;;  %v9001_v40 = vld [vmem:[#allocation104_spill] sm:$0xff] }
 0x672   : > { %v4092_v52 = vsel %vm2198_vm7, %v4060_v2, %v3680_v45  ;;  %v4656_v45 = vld [vmem:[#allocation3 + $0x30] sm:$0xff] }
 0x673   : > { %v3901_v36 = vsel %vm272_vm0, %v4656_v45, %v8997_v39  ;;  %v9006_v39 = vld [vmem:[#allocation64_spill] sm:$0xff] }
 0x674   : > { %v3933_v1 = vsel %vm2033_vm3, %v3901_v36, %v8998_v11 }
 0x675   : > { %3693 = vrot.lane.b32.xlu2 %v2819_v13, %s4682_s14  ;;  %3855 = vrot.lane.b32.xlu0 %v8019_v10, %s4683_s15  ;;  %v3965_v4 = vsel %vm2066_vm5, %v3933_v1, %v7369_v8  ;;  %v9008_v1 = vld [vmem:[#allocation27_spill] sm:$0xff] }
 0x676   : > { %3821 = vrot.lane.b32.xlu1 %v2851_v51, %s4683_s15  ;;  %v3997_v60 = vsel %vm2099_vm4, %v3965_v4, %v7533_v33  ;;  %v9004_v51 = vld [vmem:[#allocation80_spill] sm:$0xff] }
 0x677   : > { %v3716_v47 = vpop.permute.xlu2 %3715  ;;  %v3842_v24 = vpop.permute.xlu0 %3841  ;;  %v4029_v25 = vsel %vm2132_vm6, %v3997_v60, %v7714_v31 }
 0x678   : > { %v3808_v63 = vpop.permute.xlu1 %3807  ;;  %v4141_v53 = vsel %vm2231_vm10, %v4109_v54, %v3842_v24 }
 0x679   : > { %v4124_v23 = vsel %vm2231_vm10, %v4092_v52, %v3808_v63  ;;  %4569 = vmatmul.msk.f32.gmra.mxu3 %vm2277_vm9, %v4141_v53 }
 0x67a   : > { %4552 = vmatmul.msk.f32.gmra.mxu1 %vm2277_vm9, %v4124_v23  ;;  %v2870_v23 = vld [vmem:[#allocation3 + $0x18a] sm:$0xff] }
 0x67d   : > { %3727 = vrot.lane.b32.xlu2 %v2836_v22, %s4682_s14  ;;  %3601 = vrot.lane.b32.xlu0 %v2805_v41, %s4681_s13 }
 0x67e   : > { %3567 = vrot.lane.b32.xlu1 %v2788_v6, %s4681_s13  ;;  %v4658_v6 = vld [vmem:[#allocation3 + $0x48] sm:$0xff] }
 0x67f   : > { %v3684_v37 = vpop.permute.xlu2 %3683  ;;  %v3588_v19 = vpop.permute.xlu0 %3587 }
 0x680   : > { %v3554_v57 = vpop.permute.xlu1 %3553  ;;  %v4078_v16 = vsel %vm2165_vm8, %v7788_v20, %v3588_v19 }
 0x681   : > { %v4061_v35 = vsel %vm2165_vm8, %v4029_v25, %v3554_v57  ;;  %v4110_v33 = vsel %vm2198_vm7, %v4078_v16, %v3716_v47  ;;  %v2806_v47 = vld [vmem:[#allocation3 + $0x188] sm:$0xff] }
 0x682   : > { %v4093_v31 = vsel %vm2198_vm7, %v4061_v35, %v3682_v30  ;;  %v4657_v30 = vld [vmem:[#allocation3 + $0x38] sm:$0xff]  ;;  %v9007_v57 = vld [vmem:[#allocation95_spill] sm:$0xff] }
 0x683   : > { %v3902_v61 = vsel %vm272_vm0, %v4657_v30, %v9000_v0  ;;  %v2790_v16 = vld [vmem:[#allocation3 + $0xc8] sm:$0xff]  ;;  %v9010_v0 = vld [vmem:[#allocation96_spill] sm:$0xff] }
 0x684   : > { %v3934_v34 = vsel %vm2033_vm3, %v3902_v61, %v9001_v40  ;;  %v2822_v35 = vld [vmem:[#allocation3 + $0xc9] sm:$0xff] }
 0x685   : > { %3695 = vrot.lane.b32.xlu2 %v2820_v26, %s4682_s14  ;;  %3857 = vrot.lane.b32.xlu0 %v2869_v21, %s4683_s15  ;;  %v3966_v12 = vsel %vm2066_vm5, %v3934_v34, %v9002_v15  ;;  %v2854_v26 = vld [vmem:[#allocation3 + $0xca] sm:$0xff]  ;;  %v2871_v34 = vld [vmem:[#allocation3 + $0x19a] sm:$0xff] }
 0x686   : > { %3823 = vrot.lane.b32.xlu1 %v2852_v56, %s4683_s15  ;;  %v3998_v17 = vsel %vm2099_vm4, %v3966_v12, %v9003_v55  ;;  %v2808_v15 = vld [vmem:[#allocation3 + $0x1a0] sm:$0xff]  ;;  %v9012_v12 = vld [vmem:[#allocation89_spill] sm:$0xff] }
 0x687   : > { %v3718_v8 = vpop.permute.xlu2 %3717  ;;  %v3844_v18 = vpop.permute.xlu0 %3843  ;;  %v4030_v58 = vsel %vm2132_vm6, %v3998_v17, %v7726_v62 }
 0x688   : > { %v3810_v9 = vpop.permute.xlu1 %3809  ;;  %v4142_v20 = vsel %vm2231_vm10, %v4110_v33, %v3844_v18 }
 0x689   : > { %v4125_v32 = vsel %vm2231_vm10, %v4093_v31, %v3810_v9  ;;  %4570 = vmatmul.msk.f32.gmra.mxu3 %vm2277_vm9, %v4142_v20  ;;  %v2807_v31 = vld [vmem:[#allocation3 + $0x198] sm:$0xff] }
 0x68a   : > { %4553 = vmatmul.msk.f32.gmra.mxu1 %vm2277_vm9, %v4125_v32  ;;  %v2839_v20 = vld [vmem:[#allocation3 + $0x199] sm:$0xff] }
 0x68b   : > { %v2791_v32 = vld [vmem:[#allocation3 + $0xd8] sm:$0xff] }
 0x68d   : > { %3729 = vrot.lane.b32.xlu2 %v8999_v43, %s4682_s14  ;;  %3697 = vrot.lane.b32.xlu0 %v2821_v49, %s4682_s14 }
 0x68e   : > { %3569 = vrot.lane.b32.xlu1 %v2789_v27, %s4681_s13  ;;  %v4659_v27 = vld [vmem:[#allocation3 + $0x50] sm:$0xff] }
 0x68f   : > { %v3686_v38 = vpop.permute.xlu2 %3685  ;;  %v3590_v14 = vpop.permute.xlu0 %3589 }
 0x690   : > { %v3556_v3 = vpop.permute.xlu1 %3555  ;;  %v4079_v13 = vsel %vm2165_vm8, %v7858_v5, %v3590_v14 }
 0x691   : > { %v4062_v2 = vsel %vm2165_vm8, %v4030_v58, %v3556_v3  ;;  %v4111_v63 = vsel %vm2198_vm7, %v4079_v13, %v3718_v8  ;;  %v9011_v3 = vld [vmem:[#allocation18_spill] sm:$0xff] }
 0x692   : > { %v4094_v62 = vsel %vm2198_vm7, %v4062_v2, %v3684_v37  ;;  %v9005_v37 = vld [vmem:[#allocation5_spill] sm:$0xff] }
 0x693   : > { %v3903_v19 = vsel %vm272_vm0, %v4658_v6, %v9005_v37 }
 0x694   : > { %v3935_v36 = vsel %vm2033_vm3, %v3903_v19, %v9006_v39 }
 0x695   : > { %3475 = vrot.lane.b32.xlu2 %v8019_v10, %s4680_s12  ;;  %3731 = vrot.lane.b32.xlu0 %v9004_v51, %s4682_s14  ;;  %v2853_v10 = vld [vmem:[#allocation3 + $0xc2] sm:$0xff]  ;;  %v3967_v11 = vsel %vm2066_vm5, %v3935_v36, %v9007_v57  ;;  %v9015_v36 = vld [vmem:[#allocation85_spill] sm:$0xff] }
 0x696   : > { %3603 = vrot.lane.b32.xlu1 %v2806_v47, %s4681_s13  ;;  %v3999_v4 = vsel %vm2099_vm4, %v3967_v11, %v9008_v1  ;;  %v2840_v1 = vld [vmem:[#allocation3 + $0x1a1] sm:$0xff] }
 0x697   : > { %v3720_v24 = vpop.permute.xlu2 %3719  ;;  %v3846_v54 = vpop.permute.xlu0 %3845  ;;  %v4031_v60 = vsel %vm2132_vm6, %v3999_v4, %v7699_v46  ;;  %v9016_v4 = vld [vmem:[#allocation161_spill] sm:$0xff] }
 0x698   : > { %v3812_v52 = vpop.permute.xlu1 %3811  ;;  %v4143_v5 = vsel %vm2231_vm10, %v4111_v63, %v3846_v54 }
 0x699   : > { %v4126_v53 = vsel %vm2231_vm10, %v4094_v62, %v3812_v52  ;;  %4571 = vmatmul.msk.f32.gmra.mxu3 %vm2277_vm9, %v4143_v5  ;;  %v2823_v52 = vld [vmem:[#allocation3 + $0xd9] sm:$0xff]  ;;  %v8138_v62 = vld [vmem:[%s8388_s5] ss:$0 sm:$0xff] }
 0x69a   : > { %4554 = vmatmul.msk.f32.gmra.mxu1 %vm2277_vm9, %v4126_v53  ;;  %v2855_v5 = vld [vmem:[#allocation3 + $0xda] sm:$0xff] }
 0x69d   : > { %3825 = vrot.lane.b32.xlu2 %v2853_v10, %s4683_s15  ;;  %3477 = vrot.lane.b32.xlu0 %v2869_v21, %s4680_s12 }
 0x69e   : > { %3859 = vrot.lane.b32.xlu1 %v2870_v23, %s4683_s15 }
 0x69f   : > { %v3688_v22 = vpop.permute.xlu2 %3687  ;;  %v3592_v41 = vpop.permute.xlu0 %3591 }
 0x6a0   : > { %v3558_v45 = vpop.permute.xlu1 %3557  ;;  %v4080_v25 = vsel %vm2165_vm8, %v7888_v7, %v3592_v41 }
 0x6a1   : > { %v4063_v21 = vsel %vm2165_vm8, %v4031_v60, %v3558_v45  ;;  %v4112_v18 = vsel %vm2198_vm7, %v4080_v25, %v3720_v24  ;;  %v9014_v45 = vld [vmem:[#allocation143_spill] sm:$0xff]  ;;  %v9017_v25 = vld [vmem:[#allocation165_spill] sm:$0xff] }
 0x6a2   : > { %v4095_v46 = vsel %vm2198_vm7, %v4063_v21, %v3686_v38  ;;  %v9009_v38 = vld [vmem:[#allocation46_spill] sm:$0xff] }
 0x6a3   : > { %v3904_v14 = vsel %vm272_vm0, %v4659_v27, %v9009_v38  ;;  %v2824_v27 = vld [vmem:[#allocation3 + $0xe1] sm:$0xff] }
 0x6a4   : > { %v3936_v61 = vsel %vm2033_vm3, %v3904_v14, %v9010_v0  ;;  %v9018_v0 = vld [vmem:[#allocation67_spill] sm:$0xff] }
 0x6a5   : > { %3571 = vrot.lane.b32.xlu2 %v2790_v16, %s4681_s13  ;;  %3827 = vrot.lane.b32.xlu0 %v2854_v26, %s4683_s15  ;;  %v3968_v40 = vsel %vm2066_vm5, %v3936_v61, %v9011_v3  ;;  %v2856_v26 = vld [vmem:[#allocation3 + $0xe2] sm:$0xff] }
 0x6a6   : > { %3699 = vrot.lane.b32.xlu1 %v2822_v35, %s4682_s14  ;;  %v4000_v55 = vsel %vm2099_vm4, %v3968_v40, %v9012_v12  ;;  %v9020_v12 = vld [vmem:[#allocation121_spill] sm:$0xff] }
 0x6a7   : > { %v3722_v56 = vpop.permute.xlu2 %3721  ;;  %v3848_v8 = vpop.permute.xlu0 %3847  ;;  %v4032_v17 = vsel %vm2132_vm6, %v4000_v55, %v7724_v44 }
 0x6a8   : > { %v3814_v33 = vpop.permute.xlu1 %3813  ;;  %v4144_v7 = vsel %vm2231_vm10, %v4112_v18, %v3848_v8 }
 0x6a9   : > { %v4127_v9 = vsel %vm2231_vm10, %v4095_v46, %v3814_v33  ;;  %4572 = vmatmul.msk.f32.gmra.mxu3 %vm2277_vm9, %v4144_v7 }
 0x6aa   : > { %4555 = vmatmul.msk.f32.gmra.mxu1 %vm2277_vm9, %v4127_v9 }
 0x6ad   : > { %3605 = vrot.lane.b32.xlu2 %v2807_v31, %s4681_s13  ;;  %3573 = vrot.lane.b32.xlu0 %v2791_v32, %s4681_s13 }
 0x6ae   : > { %3733 = vrot.lane.b32.xlu1 %v2839_v20, %s4682_s14 }
 0x6af   : > { %v3690_v49 = vpop.permute.xlu2 %3689  ;;  %v3594_v43 = vpop.permute.xlu0 %3593 }
 0x6b0   : > { %v3560_v30 = vpop.permute.xlu1 %3559  ;;  %v4081_v58 = vsel %vm2165_vm8, %v7818_v50, %v3594_v43  ;;  %v2872_v50 = vld [vmem:[#allocation3 + $0x1a2] sm:$0xff] }
 0x6b1   : > { %v4064_v13 = vsel %vm2165_vm8, %v4032_v17, %v3560_v30  ;;  %v4113_v47 = vsel %vm2198_vm7, %v4081_v58, %v3722_v56  ;;  %v2792_v56 = vld [vmem:[#allocation3 + $0xe0] sm:$0xff]  ;;  %v4661_v30 = vld [vmem:[#allocation3 + $0x68] sm:$0xff]  ;;  %v9021_v17 = vld [vmem:[#allocation72_spill] sm:$0xff] }
 0x6b2   : > { %v4096_v54 = vsel %vm2198_vm7, %v4064_v13, %v3688_v22  ;;  %v9013_v22 = vld [vmem:[#allocation49_spill] sm:$0xff]  ;;  %v3906_v61 = vsel %vm272_vm0, %v4661_v30, %v9018_v0  ;;  %v9022_v13 = vld [vmem:[#allocation127_spill] sm:$0xff]  ;;  %v9029_v0 = vld [vmem:[#allocation78_spill] sm:$0xff] }
 0x6b5   : > { %3861 = vrot.lane.b32.xlu2 %v2871_v34, %s4683_s15  ;;  %3607 = vrot.lane.b32.xlu0 %v2808_v15, %s4681_s13  ;;  %v9019_v34 = vld [vmem:[#allocation158_spill] sm:$0xff] }
 0x6b6   : > { %3479 = vrot.lane.b32.xlu1 %v2870_v23, %s4680_s12  ;;  %v4660_v23 = vld [vmem:[#allocation3 + $0x60] sm:$0xff]  ;;  %v3938_v15 = vsel %vm2033_vm3, %v3906_v61, %v9019_v34  ;;  %v9031_v34 = vld [vmem:[#allocation13_spill] sm:$0xff] }
 0x6b7   : > { %v3724_v2 = vpop.permute.xlu2 %3723  ;;  %v3850_v51 = vpop.permute.xlu0 %3849  ;;  %v3905_v41 = vsel %vm272_vm0, %v4660_v23, %v9013_v22  ;;  %v3970_v55 = vsel %vm2066_vm5, %v3938_v15, %v9020_v12 }
 0x6b8   : > { %v3816_v24 = vpop.permute.xlu1 %3815  ;;  %v4145_v44 = vsel %vm2231_vm10, %v4113_v47, %v3850_v51  ;;  %v3937_v39 = vsel %vm2033_vm3, %v3905_v41, %v9014_v45  ;;  %v4002_v58 = vsel %vm2099_vm4, %v3970_v55, %v9021_v17  ;;  %v9032_v55 = vld [vmem:[#allocation34_spill] sm:$0xff] }
 0x6b9   : > { %v4128_v63 = vsel %vm2231_vm10, %v4096_v54, %v3816_v24  ;;  %4573 = vmatmul.msk.f32.gmra.mxu3 %vm2277_vm9, %v4145_v44  ;;  %v3969_v57 = vsel %vm2066_vm5, %v3937_v39, %v9015_v36 }
 0x6ba   : > { %4556 = vmatmul.msk.f32.gmra.mxu1 %vm2277_vm9, %v4128_v63  ;;  %v4001_v60 = vsel %vm2099_vm4, %v3969_v57, %v9016_v4  ;;  %v9024_v57 = vld [vmem:[#allocation134_spill] sm:$0xff] }
 0x6bb   : > { %v4033_v16 = vsel %vm2132_vm6, %v4001_v60, %v9017_v25  ;;  %v9026_v60 = vld [vmem:[#allocation106_spill] sm:$0xff] }
 0x6bd   : > { %3701 = vrot.lane.b32.xlu2 %v2823_v52, %s4682_s14  ;;  %3863 = vrot.lane.b32.xlu0 %v2872_v50, %s4683_s15 }
 0x6be   : > { %3829 = vrot.lane.b32.xlu1 %v2855_v5, %s4683_s15 }
 0x6bf   : > { %v4327_v53 = vpop.f32.mrf.mxu3  ;;  %v3692_v10 = vpop.permute.xlu2 %3691 }
 0x6c0   : > { %v4328_v6 = vadd.f32 %v8138_v62, %v4327_v53  ;;  %v3596_v37 = vpop.permute.xlu0 %3595  ;;  %v3562_v19 = vpop.permute.xlu1 %3561 }
 0x6c1   : > { %v4082_v21 = vsel %vm2165_vm8, %v7885_v28, %v3596_v37  ;;  %v4065_v35 = vsel %vm2165_vm8, %v4033_v16, %v3562_v19  ;;  %v9023_v19 = vld [vmem:[#allocation76_spill] sm:$0xff]  ;;  %v9027_v16 = vld [vmem:[#allocation146_spill] sm:$0xff] }
 0x6c2   : > { %v4391_v11 = vmax.f32 %v4328_v6, 0.0  ;;  %v4097_v9 = vsel %vm2198_vm7, %v4065_v35, %v3690_v49  ;;  %v4114_v28 = vsel %vm2198_vm7, %v4082_v21, %v3724_v2  ;;  %v4034_v2 = vsel %vm2132_vm6, %v4002_v58, %v9022_v13 }
 0x6c4   : > { %4423 = vst.msk [vmem:[%s8151_s26 + $0x80] sm:$0xff] %vm272_vm0, %v4391_v11 }
 0x6c5   : > { %3735 = vrot.lane.b32.xlu2 %v2840_v1, %s4682_s14  ;;  %3831 = vrot.lane.b32.xlu0 %v2856_v26, %s4683_s15  ;;  %v9025_v1 = vld [vmem:[#allocation35_spill] sm:$0xff] }
 0x6c6   : > { %3575 = vrot.lane.b32.xlu1 %v2792_v56, %s4681_s13 }
 0x6c7   : > { %v4279_v8 = vpop.f32.mrf.mxu1  ;;  %v3726_v18 = vpop.permute.xlu2 %3725 }
 0x6c8   : > { %v4280_v33 = vadd.f32 %v8138_v62, %v4279_v8  ;;  %v3852_v46 = vpop.permute.xlu0 %3851  ;;  %v3818_v7 = vpop.permute.xlu1 %3817 }
 0x6c9   : > { %v4129_v31 = vsel %vm2231_vm10, %v4097_v9, %v3818_v7  ;;  %v4146_v20 = vsel %vm2231_vm10, %v4114_v28, %v3852_v46 }
 0x6ca   : > { %v4375_v32 = vmax.f32 %v4280_v33, 0.0  ;;  %4557 = vmatmul.msk.f32.gmra.mxu1 %vm2277_vm9, %v4129_v31  ;;  %4574 = vmatmul.msk.f32.gmra.mxu3 %vm2277_vm9, %v4146_v20 }
 0x6cc   : > { %4407 = vst.msk [vmem:[%s8151_s26] sm:$0xff] %vm272_vm0, %v4375_v32  ;;  %v4330_v43 = vpop.f32.mrf.mxu3 }
 0x6cd   : > { %v4331_v38 = vadd.f32 %v8138_v62, %v4330_v43  ;;  %3703 = vrot.lane.b32.xlu2 %v2824_v27, %s4682_s14  ;;  %v4663_v27 = vld [vmem:[#allocation3 + $0x80] sm:$0xff] }
 0x6cf   : > { %v4392_v49 = vmax.f32 %v4331_v38, 0.0  ;;  %v3694_v14 = vpop.permute.xlu2 %3693  ;;  %v9028_v38 = vld [vmem:[#allocation20_spill] sm:$0xff] }
 0x6d0   : > { %v3598_v3 = vpop.permute.xlu0 %3597  ;;  %v3564_v40 = vpop.permute.xlu1 %3563 }
 0x6d1   : > { %4424 = vst.msk [vmem:[%s8151_s26 + $0x88] sm:$0xff] %vm272_vm0, %v4392_v49  ;;  %v4083_v51 = vsel %vm2165_vm8, %v7907_v42, %v3598_v3  ;;  %v4066_v47 = vsel %vm2165_vm8, %v4034_v2, %v3564_v40  ;;  %v3908_v49 = vsel %vm272_vm0, %v4663_v27, %v9028_v38  ;;  %v9030_v3 = vld [vmem:[#allocation103_spill] sm:$0xff] }
 0x6d2   : > { %v4098_v52 = vsel %vm2198_vm7, %v4066_v47, %v3692_v10  ;;  %v4115_v5 = vsel %vm2198_vm7, %v4083_v51, %v3726_v18  ;;  %v4662_v10 = vld [vmem:[#allocation3 + $0x78] sm:$0xff]  ;;  %v3940_v61 = vsel %vm2033_vm3, %v3908_v49, %v9029_v0 }
 0x6d3   : > { %v3907_v45 = vsel %vm272_vm0, %v4662_v10, %v9023_v19  ;;  %v3972_v40 = vsel %vm2066_vm5, %v3940_v61, %v9030_v3  ;;  %v9036_v19 = vld [vmem:[#allocation98_spill] sm:$0xff] }
 0x6d4   : > { %v3939_v11 = vsel %vm2033_vm3, %v3907_v45, %v9024_v57  ;;  %v4004_v15 = vsel %vm2099_vm4, %v3972_v40, %v9031_v34  ;;  %v9042_v34 = vld [vmem:[#allocation17_spill] sm:$0xff] }
 0x6d5   : > { %v3971_v4 = vsel %vm2066_vm5, %v3939_v11, %v9025_v1  ;;  %v4036_v17 = vsel %vm2132_vm6, %v4004_v15, %v9032_v55 }
 0x6d6   : > { %v4003_v25 = vsel %vm2099_vm4, %v3971_v4, %v9026_v60 }
 0x6d7   : > { %v4282_v24 = vpop.f32.mrf.mxu1  ;;  %v3728_v54 = vpop.permute.xlu2 %3727  ;;  %v4035_v26 = vsel %vm2132_vm6, %v4003_v25, %v9027_v16 }
 0x6d8   : > { %v4283_v44 = vadd.f32 %v8138_v62, %v4282_v24  ;;  %v3854_v63 = vpop.permute.xlu0 %3853  ;;  %v3820_v50 = vpop.permute.xlu1 %3819 }
 0x6d9   : > { %v4130_v53 = vsel %vm2231_vm10, %v4098_v52, %v3820_v50  ;;  %v4147_v23 = vsel %vm2231_vm10, %v4115_v5, %v3854_v63  ;;  %v9033_v5 = vld [vmem:[#allocation26_spill] sm:$0xff] }
 0x6da   : > { %v4376_v22 = vmax.f32 %v4283_v44, 0.0  ;;  %4558 = vmatmul.msk.f32.gmra.mxu1 %vm2277_vm9, %v4130_v53  ;;  %4575 = vmatmul.msk.f32.gmra.mxu3 %vm2277_vm9, %v4147_v23 }
 0x6dc   : > { %4408 = vst.msk [vmem:[%s8151_s26 + $0x8] sm:$0xff] %vm272_vm0, %v4376_v22  ;;  %v4333_v42 = vpop.f32.mrf.mxu3  ;;  %v9034_v22 = vld [vmem:[#allocation86_spill] sm:$0xff] }
 0x6dd   : > { %v4334_v41 = vadd.f32 %v8138_v62, %v4333_v42 }
 0x6df   : > { %v4393_v6 = vmax.f32 %v4334_v41, 0.0  ;;  %v3696_v37 = vpop.permute.xlu2 %3695 }
 0x6e0   : > { %v3600_v39 = vpop.permute.xlu0 %3599  ;;  %v3566_v36 = vpop.permute.xlu1 %3565 }
 0x6e1   : > { %4425 = vst.msk [vmem:[%s8151_s26 + $0x90] sm:$0xff] %vm272_vm0, %v4393_v6  ;;  %v4084_v21 = vsel %vm2165_vm8, %v7855_v48, %v3600_v39  ;;  %v4067_v35 = vsel %vm2165_vm8, %v4035_v26, %v3566_v36  ;;  %v9037_v36 = vld [vmem:[#allocation137_spill] sm:$0xff] }
 0x6e2   : > { %v4099_v46 = vsel %vm2198_vm7, %v4067_v35, %v3694_v14  ;;  %v4116_v7 = vsel %vm2198_vm7, %v4084_v21, %v3728_v54  ;;  %v4665_v21 = vld [vmem:[#allocation3 + $0x158] sm:$0xff]  ;;  %v9038_v35 = vld [vmem:[#allocation155_spill] sm:$0xff] }
 0x6e7   : > { %v4285_v56 = vpop.f32.mrf.mxu1  ;;  %v3730_v9 = vpop.permute.xlu2 %3729 }
 0x6e8   : > { %v4286_v8 = vadd.f32 %v8138_v62, %v4285_v56  ;;  %v3856_v18 = vpop.permute.xlu0 %3855  ;;  %v3822_v33 = vpop.permute.xlu1 %3821  ;;  %v3926_v56 = vsel %vm272_vm0, %v4665_v21, %v9038_v35 }
 0x6e9   : > { %v4131_v28 = vsel %vm2231_vm10, %v4099_v46, %v3822_v33  ;;  %v4148_v31 = vsel %vm2231_vm10, %v4116_v7, %v3856_v18  ;;  %v9039_v46 = vld [vmem:[#allocation166_spill] sm:$0xff] }
 0x6ea   : > { %v4377_v20 = vmax.f32 %v4286_v8, 0.0  ;;  %4559 = vmatmul.msk.f32.gmra.mxu1 %vm2277_vm9, %v4131_v28  ;;  %4576 = vmatmul.msk.f32.gmra.mxu3 %vm2277_vm9, %v4148_v31  ;;  %v3958_v7 = vsel %vm2033_vm3, %v3926_v56, %v9039_v46 }
 0x6ec   : > { %4409 = vst.msk [vmem:[%s8151_s26 + $0x10] sm:$0xff] %vm272_vm0, %v4377_v20  ;;  %v4336_v48 = vpop.f32.mrf.mxu3  ;;  %v9041_v20 = vld [vmem:[#allocation116_spill] sm:$0xff] }
 0x6ed   : > { %v4337_v32 = vadd.f32 %v8138_v62, %v4336_v48 }
 0x6ef   : > { %v4394_v43 = vmax.f32 %v4337_v32, 0.0  ;;  %v3476_v12 = vpop.permute.xlu2 %3475 }
 0x6f0   : > { %v3602_v14 = vpop.permute.xlu0 %3601  ;;  %v3568_v30 = vpop.permute.xlu1 %3567 }
 0x6f1   : > { %4426 = vst.msk [vmem:[%s8151_s26 + $0x98] sm:$0xff] %vm272_vm0, %v4394_v43  ;;  %v4085_v58 = vsel %vm2165_vm8, %v7904_v59, %v3602_v14  ;;  %v4068_v13 = vsel %vm2165_vm8, %v4036_v17, %v3568_v30  ;;  %v4664_v59 = vld [vmem:[#allocation3 + $0x90] sm:$0xff] }
 0x6f2   : > { %v4100_v54 = vsel %vm2198_vm7, %v4068_v13, %v3696_v37  ;;  %v4117_v44 = vsel %vm2198_vm7, %v4085_v58, %v3730_v9  ;;  %v3909_v53 = vsel %vm272_vm0, %v4664_v59, %v9033_v5  ;;  %v9035_v37 = vld [vmem:[#allocation32_spill] sm:$0xff]  ;;  %v9040_v9 = vld [vmem:[#allocation133_spill] sm:$0xff] }
 0x6f3   : > { %v3941_v42 = vsel %vm2033_vm3, %v3909_v53, %v9034_v22  ;;  %v3990_v28 = vsel %vm2066_vm5, %v3958_v7, %v9040_v9 }
 0x6f4   : > { %v3973_v10 = vsel %vm2066_vm5, %v3941_v42, %v9035_v37  ;;  %v4022_v48 = vsel %vm2099_vm4, %v3990_v28, %v9041_v20 }
 0x6f5   : > { %v4005_v45 = vsel %vm2099_vm4, %v3973_v10, %v9036_v19  ;;  %v4054_v32 = vsel %vm2132_vm6, %v4022_v48, %v3476_v12  ;;  %v9044_v10 = vld [vmem:[#allocation63_spill] sm:$0xff] }
 0x6f6   : > { %v4037_v57 = vsel %vm2132_vm6, %v4005_v45, %v9037_v36 }
 0x6f7   : > { %v4288_v2 = vpop.f32.mrf.mxu1  ;;  %v3826_v41 = vpop.permute.xlu2 %3825 }
 0x6f8   : > { %v4289_v51 = vadd.f32 %v8138_v62, %v4288_v2  ;;  %v3858_v47 = vpop.permute.xlu0 %3857  ;;  %v3824_v24 = vpop.permute.xlu1 %3823 }
 0x6f9   : > { %v4132_v63 = vsel %vm2231_vm10, %v4100_v54, %v3824_v24  ;;  %v4149_v50 = vsel %vm2231_vm10, %v4117_v44, %v3858_v47  ;;  %v9043_v24 = vld [vmem:[#allocation23_spill] sm:$0xff] }
 0x6fa   : > { %v4378_v52 = vmax.f32 %v4289_v51, 0.0  ;;  %4560 = vmatmul.msk.f32.gmra.mxu1 %vm2277_vm9, %v4132_v63  ;;  %4577 = vmatmul.msk.f32.gmra.mxu3 %vm2277_vm9, %v4149_v50 }
 0x6fc   : > { %4410 = vst.msk [vmem:[%s8151_s26 + $0x18] sm:$0xff] %vm272_vm0, %v4378_v52  ;;  %v4339_v23 = vpop.f32.mrf.mxu3 }
 0x6fd   : > { %v4340_v6 = vadd.f32 %v8138_v62, %v4339_v23 }
 0x6ff   : > { %v4395_v39 = vmax.f32 %v4340_v6, 0.0  ;;  %v3572_v16 = vpop.permute.xlu2 %3571 }
 0x700   : > { %v3698_v11 = vpop.permute.xlu0 %3697  ;;  %v3570_v1 = vpop.permute.xlu1 %3569  ;;  %v4070_v15 = vsel %vm2165_vm8, %v9042_v34, %v3572_v16 }
 0x701   : > { %4427 = vst.msk [vmem:[%s8151_s26 + $0xa0] sm:$0xff] %vm272_vm0, %v4395_v39  ;;  %v4069_v4 = vsel %vm2165_vm8, %v4037_v57, %v3570_v1 }
 0x702   : > { %v4101_v60 = vsel %vm2198_vm7, %v4069_v4, %v3698_v11 }
 0x703   : > { %v4133_v25 = vsel %vm2231_vm10, %v4101_v60, %v3826_v41 }
 0x704   : > { %4561 = vmatmul.msk.f32.gmra.mxu1 %vm2277_vm9, %v4133_v25 }
 0x707   : > { %v4291_v26 = vpop.f32.mrf.mxu1  ;;  %v3606_v61 = vpop.permute.xlu2 %3605 }
 0x708   : > { %v4292_v8 = vadd.f32 %v8138_v62, %v4291_v26  ;;  %v3732_v18 = vpop.permute.xlu0 %3731  ;;  %v3604_v33 = vpop.permute.xlu1 %3603 }
 0x709   : > { %v4086_v27 = vsel %vm2165_vm8, %v4054_v32, %v3604_v33 }
 0x70a   : > { %v4379_v31 = vmax.f32 %v4292_v8, 0.0  ;;  %v4118_v0 = vsel %vm2198_vm7, %v4086_v27, %v3732_v18  ;;  %v9045_v18 = vld [vmem:[#allocation156_spill] sm:$0xff] }
 0x70c   : > { %4411 = vst.msk [vmem:[%s8151_s26 + $0x20] sm:$0xff] %vm272_vm0, %v4379_v31  ;;  %v4342_v43 = vpop.f32.mrf.mxu3 }
 0x70d   : > { %v4343_v38 = vadd.f32 %v8138_v62, %v4342_v43 }
 0x70f   : > { %v4396_v49 = vmax.f32 %v4343_v38, 0.0  ;;  %v3862_v51 = vpop.permute.xlu2 %3861 }
 0x710   : > { %v3478_v14 = vpop.permute.xlu0 %3477  ;;  %v3860_v30 = vpop.permute.xlu1 %3859 }
 0x711   : > { %4428 = vst.msk [vmem:[%s8151_s26 + $0xa8] sm:$0xff] %vm272_vm0, %v4396_v49  ;;  %v4150_v3 = vsel %vm2231_vm10, %v4118_v0, %v3860_v30  ;;  %v4055_v54 = vsel %vm2132_vm6, %v9043_v24, %v3478_v14 }
 0x712   : > { %4578 = vmatmul.msk.f32.gmra.mxu3 %vm2277_vm9, %v4150_v3  ;;  %v4087_v52 = vsel %vm2165_vm8, %v4055_v54, %v3606_v61 }
 0x717   : > { %v4294_v40 = vpop.f32.mrf.mxu1  ;;  %v3702_v23 = vpop.permute.xlu2 %3701 }
 0x718   : > { %v4295_v12 = vadd.f32 %v8138_v62, %v4294_v40  ;;  %v3828_v55 = vpop.permute.xlu0 %3827  ;;  %v3700_v17 = vpop.permute.xlu1 %3699 }
 0x719   : > { %v4102_v58 = vsel %vm2198_vm7, %v4070_v15, %v3700_v17 }
 0x71a   : > { %v4380_v13 = vmax.f32 %v4295_v12, 0.0  ;;  %v4134_v2 = vsel %vm2231_vm10, %v4102_v58, %v3828_v55 }
 0x71b   : > { %4562 = vmatmul.msk.f32.gmra.mxu1 %vm2277_vm9, %v4134_v2 }
 0x71c   : > { %4412 = vst.msk [vmem:[%s8151_s26 + $0x28] sm:$0xff] %vm272_vm0, %v4380_v13  ;;  %v4345_v47 = vpop.f32.mrf.mxu3 }
 0x71d   : > { %v4346_v44 = vadd.f32 %v8138_v62, %v4345_v47 }
 0x71f   : > { %v4397_v63 = vmax.f32 %v4346_v44, 0.0  ;;  %v3736_v11 = vpop.permute.xlu2 %3735 }
 0x720   : > { %v3574_v50 = vpop.permute.xlu0 %3573  ;;  %v3734_v59 = vpop.permute.xlu1 %3733 }
 0x721   : > { %4429 = vst.msk [vmem:[%s8151_s26 + $0xb0] sm:$0xff] %vm272_vm0, %v4397_v63  ;;  %v4119_v5 = vsel %vm2198_vm7, %v4087_v52, %v3734_v59  ;;  %v4071_v39 = vsel %vm2165_vm8, %v7791_v29, %v3574_v50 }
 0x722   : > { %v4151_v53 = vsel %vm2231_vm10, %v4119_v5, %v3862_v51  ;;  %v4103_v25 = vsel %vm2198_vm7, %v4071_v39, %v3702_v23 }
 0x723   : > { %4579 = vmatmul.msk.f32.gmra.mxu3 %vm2277_vm9, %v4151_v53 }
 0x727   : > { %v4297_v22 = vpop.f32.mrf.mxu1  ;;  %v3704_v8 = vpop.permute.xlu2 %3703 }
 0x728   : > { %v4298_v42 = vadd.f32 %v8138_v62, %v4297_v22  ;;  %v3608_v41 = vpop.permute.xlu0 %3607  ;;  %v3480_v6 = vpop.permute.xlu1 %3479 }
 0x729   : > { %v4056_v19 = vsel %vm2132_vm6, %v9044_v10, %v3480_v6 }
 0x72a   : > { %v4381_v37 = vmax.f32 %v4298_v42, 0.0  ;;  %v4088_v36 = vsel %vm2165_vm8, %v4056_v19, %v3608_v41 }
 0x72b   : > { %v4120_v16 = vsel %vm2198_vm7, %v4088_v36, %v3736_v11 }
 0x72c   : > { %4413 = vst.msk [vmem:[%s8151_s26 + $0x30] sm:$0xff] %vm272_vm0, %v4381_v37  ;;  %v4348_v45 = vpop.f32.mrf.mxu3 }
 0x72d   : > { %v4349_v57 = vadd.f32 %v8138_v62, %v4348_v45 }
 0x72f   : > { %v4398_v1 = vmax.f32 %v4349_v57, 0.0 }
 0x730   : > { %v3864_v4 = vpop.permute.xlu0 %3863  ;;  %v3830_v60 = vpop.permute.xlu1 %3829 }
 0x731   : > { %4430 = vst.msk [vmem:[%s8151_s26 + $0xb8] sm:$0xff] %vm272_vm0, %v4398_v1  ;;  %v4135_v26 = vsel %vm2231_vm10, %v4103_v25, %v3830_v60  ;;  %v4152_v21 = vsel %vm2231_vm10, %v4120_v16, %v3864_v4 }
 0x732   : > { %4563 = vmatmul.msk.f32.gmra.mxu1 %vm2277_vm9, %v4135_v26  ;;  %4580 = vmatmul.msk.f32.gmra.mxu3 %vm2277_vm9, %v4152_v21 }
 0x737   : > { %v4300_v29 = vpop.f32.mrf.mxu1 }
 0x738   : > { %v4301_v35 = vadd.f32 %v8138_v62, %v4300_v29  ;;  %v3576_v56 = vpop.permute.xlu1 %3575  ;;  %v3832_v7 = vpop.permute.xlu0 %3831 }
 0x739   : > { %v4072_v33 = vsel %vm2165_vm8, %v9045_v18, %v3576_v56 }
 0x73a   : > { %v4382_v46 = vmax.f32 %v4301_v35, 0.0  ;;  %v4104_v9 = vsel %vm2198_vm7, %v4072_v33, %v3704_v8 }
 0x73b   : > { %v4136_v28 = vsel %vm2231_vm10, %v4104_v9, %v3832_v7 }
 0x73c   : > { %4414 = vst.msk [vmem:[%s8151_s26 + $0x38] sm:$0xff] %vm272_vm0, %v4382_v46  ;;  %4564 = vmatmul.msk.f32.gmra.mxu1 %vm2277_vm9, %v4136_v28  ;;  %v4351_v31 = vpop.f32.mrf.mxu3 }
 0x73d   : > { %v4352_v20 = vadd.f32 %v8138_v62, %v4351_v31 }
 0x73f   : > { %v4399_v48 = vmax.f32 %v4352_v20, 0.0 }
 0x741   : > { %4431 = vst.msk [vmem:[%s8151_s26 + $0xc0] sm:$0xff] %vm272_vm0, %v4399_v48 }
 0x747   : > { %v4303_v32 = vpop.f32.mrf.mxu1 }
 0x748   : > { %v4304_v43 = vadd.f32 %v8138_v62, %v4303_v32 }
 0x74a   : > { %v4383_v27 = vmax.f32 %v4304_v43, 0.0 }
 0x74c   : > { %4415 = vst.msk [vmem:[%s8151_s26 + $0x40] sm:$0xff] %vm272_vm0, %v4383_v27 }
 0x74d   : > { %v4354_v38 = vpop.f32.mrf.mxu3 }
 0x74e   : > { %v4355_v49 = vadd.f32 %v8138_v62, %v4354_v38 }
 0x750   : > { %v4400_v14 = vmax.f32 %v4355_v49, 0.0 }
 0x752   : > { %4432 = vst.msk [vmem:[%s8151_s26 + $0xc8] sm:$0xff] %vm272_vm0, %v4400_v14 }
 0x757   : > { %v4306_v30 = vpop.f32.mrf.mxu1 }
 0x758   : > { %v4307_v0 = vadd.f32 %v8138_v62, %v4306_v30 }
 0x75a   : > { %v4384_v61 = vmax.f32 %v4307_v0, 0.0 }
 0x75c   : > { %4416 = vst.msk [vmem:[%s8151_s26 + $0x48] sm:$0xff] %vm272_vm0, %v4384_v61 }
 0x75d   : > { %v4357_v3 = vpop.f32.mrf.mxu3 }
 0x75e   : > { %v4358_v40 = vadd.f32 %v8138_v62, %v4357_v3 }
 0x760   : > { %v4401_v34 = vmax.f32 %v4358_v40, 0.0 }
 0x762   : > { %4433 = vst.msk [vmem:[%s8151_s26 + $0xd0] sm:$0xff] %vm272_vm0, %v4401_v34 }
 0x767   : > { %v4309_v15 = vpop.f32.mrf.mxu1 }
 0x768   : > { %v4310_v12 = vadd.f32 %v8138_v62, %v4309_v15 }
 0x76a   : > { %v4385_v55 = vmax.f32 %v4310_v12, 0.0 }
 0x76c   : > { %4417 = vst.msk [vmem:[%s8151_s26 + $0x50] sm:$0xff] %vm272_vm0, %v4385_v55 }
 0x76d   : > { %v4360_v17 = vpop.f32.mrf.mxu3 }
 0x76e   : > { %v4361_v58 = vadd.f32 %v8138_v62, %v4360_v17 }
 0x770   : > { %v4402_v13 = vmax.f32 %v4361_v58, 0.0 }
 0x772   : > { %4434 = vst.msk [vmem:[%s8151_s26 + $0xd8] sm:$0xff] %vm272_vm0, %v4402_v13 }
 0x777   : > { %v4312_v2 = vpop.f32.mrf.mxu1 }
 0x778   : > { %v4313_v51 = vadd.f32 %v8138_v62, %v4312_v2 }
 0x77a   : > { %v4386_v47 = vmax.f32 %v4313_v51, 0.0 }
 0x77c   : > { %4418 = vst.msk [vmem:[%s8151_s26 + $0x58] sm:$0xff] %vm272_vm0, %v4386_v47 }
 0x77d   : > { %v4363_v24 = vpop.f32.mrf.mxu3 }
 0x77e   : > { %v4364_v54 = vadd.f32 %v8138_v62, %v4363_v24 }
 0x780   : > { %v4403_v44 = vmax.f32 %v4364_v54, 0.0 }
 0x781   : > { %v4315_v63 = vpop.f32.mrf.mxu1 }
 0x782   : > { %4435 = vst.msk [vmem:[%s8151_s26 + $0xe0] sm:$0xff] %vm272_vm0, %v4403_v44  ;;  %v4316_v50 = vadd.f32 %v8138_v62, %v4315_v63 }
 0x784   : > { %v4387_v52 = vmax.f32 %v4316_v50, 0.0 }
 0x786   : > { %4419 = vst.msk [vmem:[%s8151_s26 + $0x60] sm:$0xff] %vm272_vm0, %v4387_v52 }
 0x795   : > { %v4366_v59 = vpop.f32.mrf.mxu3 }
 0x796   : > { %v4367_v5 = vadd.f32 %v8138_v62, %v4366_v59 }
 0x798   : > { %v4404_v53 = vmax.f32 %v4367_v5, 0.0  ;;  %v4318_v23 = vpop.f32.mrf.mxu1 }
 0x799   : > { %v4319_v22 = vadd.f32 %v8138_v62, %v4318_v23 }
 0x79a   : > { %4436 = vst.msk [vmem:[%s8151_s26 + $0xe8] sm:$0xff] %vm272_vm0, %v4404_v53 }
 0x79b   : > { %v4388_v42 = vmax.f32 %v4319_v22, 0.0 }
 0x79d   : > { %4420 = vst.msk [vmem:[%s8151_s26 + $0x68] sm:$0xff] %vm272_vm0, %v4388_v42 }
 0x7a6   : > { %v4369_v41 = vpop.f32.mrf.mxu3 }
 0x7a7   : > { %v4370_v6 = vadd.f32 %v8138_v62, %v4369_v41 }
 0x7a9   : > { %v4405_v37 = vmax.f32 %v4370_v6, 0.0 }
 0x7ab   : > { %4437 = vst.msk [vmem:[%s8151_s26 + $0xf0] sm:$0xff] %vm272_vm0, %v4405_v37 }
 0x7af   : > { %v4321_v10 = vpop.f32.mrf.mxu1 }
 0x7b0   : > { %v4322_v19 = vadd.f32 %v8138_v62, %v4321_v10 }
 0x7b2   : > { %v4389_v45 = vmax.f32 %v4322_v19, 0.0 }
 0x7b4   : > { %4421 = vst.msk [vmem:[%s8151_s26 + $0x70] sm:$0xff] %vm272_vm0, %v4389_v45 }
 0x7b5   : > { %v4372_v39 = vpop.f32.mrf.mxu3 }
 0x7b6   : > { %v4373_v36 = vadd.f32 %v8138_v62, %v4372_v39 }
 0x7b8   : > { %v4406_v57 = vmax.f32 %v4373_v36, 0.0 }
 0x7b9   : > { %v4324_v11 = vpop.f32.mrf.mxu1 }
 0x7ba   : > { %4438 = vst.msk [vmem:[%s8151_s26 + $0xf8] sm:$0xff] %vm272_vm0, %v4406_v57  ;;  %v4325_v1 = vadd.f32 %v8138_v62, %v4324_v11 }
 0x7bc   : > { %v4390_v4 = vmax.f32 %v4325_v1, 0.0 }
 0x7be   : > { %4422 = vst.msk [vmem:[%s8151_s26 + $0x78] sm:$0xff] %vm272_vm0, %v4390_v4 }
 0x7bf PF: > { %s16_s21 = sadd.s32 1, %s4672_s21  }
 0x7c0   : > { %p13_p4 = scmp.ge.s32.totalorder %s16_s21, 4  }
 0x7c2   :  { %15 = sbr.rel (!%p13_p4) target bundleno = 1 (0x1), region = 81 }

</bundles_post_ra>
